<compile_context>
chip_gen: v6e
topology: v6e:2x2x1
jax: 0.10.0
libtpu: 0.0.40
codegen_flags: <defaults>
</compile_context>

<pallas_src>
import jax
import jax.numpy as jnp
from jax.experimental import pallas as pl
from jax.experimental.pallas import tpu as pltpu

# ---- small synthetic shapes consistent with the module's forward ----
BATCH = 2          # batch_size
SEQ = 8            # sequence_length
CHANNELS = 4       # image channels
IMG = 16           # H = W
CNN_FEATURES = 128 # stands in for mobilenet_v2's 1280-dim pooled features
HIDDEN = 32        # LSTM hidden_size
NUM_CLASSES = 2
KSIZE = 3

PIX = IMG * IMG                      # pixels per frame (256)
KDIM = KSIZE * KSIZE * CHANNELS      # im2col contraction dim (36, NOT padded)
N_FRAMES = BATCH * SEQ               # 16 frames total


# ------------------- fused CNN + pool + LSTM + classifier kernel -------------------
def detector_kernel(patches_ref, conv_w_ref, conv_b_ref,
                    w_ih_ref, w_hh_ref, b_lstm_ref,
                    w_cls_ref, b_cls_ref, o_ref):
    # patches_ref : (N_FRAMES*PIX, KDIM) bf16   im2col rows, frame-major (t,b) order
    # conv_w_ref  : (KDIM, F)            bf16
    # conv_b_ref  : (1, F)               f32
    # w_ih_ref    : (F, 4H)              bf16
    # w_hh_ref    : (H, 4H)              bf16
    # b_lstm_ref  : (1, 4H)              f32   (= b_ih + b_hh)
    # w_cls_ref   : (H, NUM_CLASSES)     f32
    # b_cls_ref   : (1, NUM_CLASSES)     f32
    # o_ref       : (BATCH, NUM_CLASSES) f32

    # ---- CNN feature extraction: one MXU matmul covering all 16 frames ----
    acc = jnp.dot(patches_ref[...], conv_w_ref[...],
                  preferred_element_type=jnp.float32)            # (N*PIX, F) f32
    acc = jnp.clip(acc + conv_b_ref[...], 0.0, 6.0)              # bias + ReLU6
    # adaptive_avg_pool2d((1,1)): mean over the PIX spatial positions per frame
    pooled = jnp.mean(acc.reshape(N_FRAMES, PIX, CNN_FEATURES), axis=1)  # (T*B, F)

    # ---- LSTM over the sequence (rows already ordered t-major, b-minor) ----
    # Hoisted input projection: one matmul for all timesteps, bias added once.
    gates_x = jnp.dot(pooled.astype(jnp.bfloat16), w_ih_ref[...],
                      preferred_element_type=jnp.float32) + b_lstm_ref[...]  # (T*B, 4H)

    w_hh = w_hh_ref[...]                                          # load once, reuse
    h = jnp.zeros((BATCH, HIDDEN), jnp.float32)
    c = jnp.zeros((BATCH, HIDDEN), jnp.float32)

    # Statically unrolled recurrence (SEQ is a compile-time constant) so the
    # tiny per-step matmul, EUP transcendentals and VPU work interleave.
    for t in range(SEQ):
        gx = gates_x[t * BATCH:(t + 1) * BATCH, :]                # static (B, 4H) slice
        gates = gx + jnp.dot(h.astype(jnp.bfloat16), w_hh,
                             preferred_element_type=jnp.float32)
        # PyTorch LSTM gate order: i, f, g, o — transcendentals only where needed.
        if_gates = jax.nn.sigmoid(gates[:, :2 * HIDDEN])          # i and f together
        i = if_gates[:, :HIDDEN]
        f = if_gates[:, HIDDEN:]
        g = jnp.tanh(gates[:, 2 * HIDDEN:3 * HIDDEN])
        o = jax.nn.sigmoid(gates[:, 3 * HIDDEN:])
        c = f * c + i * g
        h = o * jnp.tanh(c)

    # ---- classifier on the last-timestep hidden state ----
    logits = jnp.dot(h, w_cls_ref[...],
                     preferred_element_type=jnp.float32) + b_cls_ref[...]
    o_ref[...] = logits


# --------------------------- full forward (glue in plain JAX) ---------------------------
def lightweight_deepfake_detector(x, params):
    # x: (batch, seq, C, H, W) -- same convention as the PyTorch module
    b, t, c, h, w = x.shape
    # Reorder frames to (t, b) so pooled CNN rows are already in the order the
    # LSTM consumes (row = t*B + b); NCHW -> NHWC; bf16 early to halve bytes.
    frames = x.transpose(1, 0, 3, 4, 2).reshape(t * b, IMG, IMG, CHANNELS)
    frames = frames.astype(jnp.bfloat16)
    x_pad = jnp.pad(frames, ((0, 0), (1, 1), (1, 1), (0, 0)))

    # Wrapper-side im2col, NO lane padding: (N*PIX, KDIM=36) bf16.
    cols = [x_pad[:, dy:dy + IMG, dx:dx + IMG, :]
            for dy in range(KSIZE) for dx in range(KSIZE)]
    patches = jnp.concatenate(cols, axis=-1).reshape(t * b * PIX, KDIM)

    vmem = pl.BlockSpec(memory_space=pltpu.MemorySpace.VMEM)
    return pl.pallas_call(
        detector_kernel,
        out_shape=jax.ShapeDtypeStruct((BATCH, NUM_CLASSES), jnp.float32),
        in_specs=[vmem] * 8,
        out_specs=vmem,
    )(patches, params["conv_w"], params["conv_b"],
      params["w_ih"], params["w_hh"], params["b_lstm"],
      params["w_cls"], params["b_cls"])


def init_params(key):
    ks = jax.random.split(key, 5)
    s = 0.1
    # conv weight in (ky, kx, cin, cout) order, flattened to (K*K*C, F), bf16 for MXU.
    conv_w = s * jax.random.normal(
        ks[0], (KSIZE, KSIZE, CHANNELS, CNN_FEATURES), jnp.float32)
    return {
        "conv_w": conv_w.reshape(KDIM, CNN_FEATURES).astype(jnp.bfloat16),
        "conv_b": s * jax.random.normal(ks[1], (1, CNN_FEATURES), jnp.float32),
        # LSTM weights pre-transposed to (in, 4H) / (H, 4H); bias = b_ih + b_hh
        "w_ih": (s * jax.random.normal(
            ks[2], (CNN_FEATURES, 4 * HIDDEN), jnp.float32)).astype(jnp.bfloat16),
        "w_hh": (s * jax.random.normal(
            ks[3], (HIDDEN, 4 * HIDDEN), jnp.float32)).astype(jnp.bfloat16),
        "b_lstm": jnp.zeros((1, 4 * HIDDEN), jnp.float32),
        "w_cls": s * jax.random.normal(ks[4], (HIDDEN, NUM_CLASSES), jnp.float32),
        "b_cls": jnp.zeros((1, NUM_CLASSES), jnp.float32),
    }


if __name__ == "__main__":
    key = jax.random.PRNGKey(0)
    pkey, xkey = jax.random.split(key)
    params = init_params(pkey)
    x = jax.random.normal(xkey, (BATCH, SEQ, CHANNELS, IMG, IMG), jnp.float32)

    fwd = jax.jit(lambda xx: lightweight_deepfake_detector(xx, params))
    out = fwd(x)
    jax.block_until_ready(out)
    assert out.shape == (BATCH, NUM_CLASSES), out.shape
    print("KERNEL_OK")
</pallas_src>

<mosaic_0001>
module attributes {stable_mosaic.version = 11 : i64} {
  func.func @detector_kernel(%arg0: memref<4096x36xbf16, #tpu.memory_space<vmem>>, %arg1: memref<36x128xbf16, #tpu.memory_space<vmem>>, %arg2: memref<1x128xf32, #tpu.memory_space<vmem>>, %arg3: memref<128x128xbf16, #tpu.memory_space<vmem>>, %arg4: memref<32x128xbf16, #tpu.memory_space<vmem>>, %arg5: memref<1x128xf32, #tpu.memory_space<vmem>>, %arg6: memref<32x2xf32, #tpu.memory_space<vmem>>, %arg7: memref<1x2xf32, #tpu.memory_space<vmem>>, %arg8: memref<2x2xf32, #tpu.memory_space<vmem>>) attributes {dimension_semantics = [], scalar_prefetch = 0 : i64, scratch_operands = 0 : i64, tpu.core_type = #tpu.core_type<tc>} {
    %c0 = arith.constant 0 : index
    %c0_0 = arith.constant 0 : index
    %0 = vector.load %arg0[%c0, %c0_0] : memref<4096x36xbf16, #tpu.memory_space<vmem>>, vector<4096x36xbf16>
    %c0_1 = arith.constant 0 : index
    %c0_2 = arith.constant 0 : index
    %1 = vector.load %arg1[%c0_1, %c0_2] : memref<36x128xbf16, #tpu.memory_space<vmem>>, vector<36x128xbf16>
    %cst = arith.constant dense<0.000000e+00> : vector<4096x128xf32>
    %2 = tpu.matmul %0, %1, %cst {dimension_numbers = #tpu.dot_dimension_numbers<[1], [0], [0], [1], [0, 0, 1, 1], [], []>} : vector<4096x36xbf16>, vector<36x128xbf16>, vector<4096x128xf32> -> vector<4096x128xf32>
    %c0_3 = arith.constant 0 : index
    %c0_4 = arith.constant 0 : index
    %3 = vector.load %arg2[%c0_3, %c0_4] : memref<1x128xf32, #tpu.memory_space<vmem>>, vector<1x128xf32>
    %4 = vector.broadcast %3 : vector<1x128xf32> to vector<4096x128xf32>
    %5 = arith.addf %2, %4 : vector<4096x128xf32>
    %cst_5 = arith.constant 0.000000e+00 : f32
    %cst_6 = arith.constant 6.000000e+00 : f32
    %6 = vector.broadcast %cst_5 : f32 to vector<4096x128xf32>
    %7 = arith.maximumf %6, %5 : vector<4096x128xf32>
    %8 = vector.broadcast %cst_6 : f32 to vector<4096x128xf32>
    %9 = arith.minimumf %8, %7 : vector<4096x128xf32>
    %10 = vector.shape_cast %9 : vector<4096x128xf32> to vector<16x256x128xf32>
    %cst_7 = arith.constant dense<0.000000e+00> : vector<16x128xf32>
    %11 = vector.multi_reduction <add>, %10, %cst_7 [1] : vector<16x256x128xf32> to vector<16x128xf32>
    %cst_8 = arith.constant 2.560000e+02 : f32
    %12 = vector.broadcast %cst_8 : f32 to vector<16x128xf32>
    %13 = arith.divf %11, %12 : vector<16x128xf32>
    %14 = arith.truncf %13 : vector<16x128xf32> to vector<16x128xbf16>
    %c0_9 = arith.constant 0 : index
    %c0_10 = arith.constant 0 : index
    %15 = vector.load %arg3[%c0_9, %c0_10] : memref<128x128xbf16, #tpu.memory_space<vmem>>, vector<128x128xbf16>
    %cst_11 = arith.constant dense<0.000000e+00> : vector<16x128xf32>
    %16 = tpu.matmul %14, %15, %cst_11 {dimension_numbers = #tpu.dot_dimension_numbers<[1], [0], [0], [1], [0, 0, 1, 1], [], []>} : vector<16x128xbf16>, vector<128x128xbf16>, vector<16x128xf32> -> vector<16x128xf32>
    %c0_12 = arith.constant 0 : index
    %c0_13 = arith.constant 0 : index
    %17 = vector.load %arg5[%c0_12, %c0_13] : memref<1x128xf32, #tpu.memory_space<vmem>>, vector<1x128xf32>
    %18 = vector.broadcast %17 : vector<1x128xf32> to vector<16x128xf32>
    %19 = arith.addf %16, %18 : vector<16x128xf32>
    %c0_14 = arith.constant 0 : index
    %c0_15 = arith.constant 0 : index
    %20 = vector.load %arg4[%c0_14, %c0_15] : memref<32x128xbf16, #tpu.memory_space<vmem>>, vector<32x128xbf16>
    %cst_16 = arith.constant 0.000000e+00 : f32
    %21 = vector.broadcast %cst_16 : f32 to vector<2x32xf32>
    %cst_17 = arith.constant 0.000000e+00 : f32
    %22 = vector.broadcast %cst_17 : f32 to vector<2x32xf32>
    %23 = vector.extract_strided_slice %19 {offsets = [0, 0], sizes = [2, 128], strides = [1, 1]} : vector<16x128xf32> to vector<2x128xf32>
    %24 = arith.truncf %21 : vector<2x32xf32> to vector<2x32xbf16>
    %cst_18 = arith.constant dense<0.000000e+00> : vector<2x128xf32>
    %25 = tpu.matmul %24, %20, %cst_18 {dimension_numbers = #tpu.dot_dimension_numbers<[1], [0], [0], [1], [0, 0, 1, 1], [], []>} : vector<2x32xbf16>, vector<32x128xbf16>, vector<2x128xf32> -> vector<2x128xf32>
    %26 = arith.addf %23, %25 : vector<2x128xf32>
    %27 = vector.extract_strided_slice %26 {offsets = [0, 0], sizes = [2, 64], strides = [1, 1]} : vector<2x128xf32> to vector<2x64xf32>
    %28 = arith.negf %27 : vector<2x64xf32>
    %29 = math.exp %28 : vector<2x64xf32>
    %cst_19 = arith.constant 1.000000e+00 : f32
    %30 = vector.broadcast %cst_19 : f32 to vector<2x64xf32>
    %31 = arith.addf %30, %29 : vector<2x64xf32>
    %32 = arith.divf %30, %31 : vector<2x64xf32>
    %33 = vector.extract_strided_slice %32 {offsets = [0, 0], sizes = [2, 32], strides = [1, 1]} : vector<2x64xf32> to vector<2x32xf32>
    %34 = vector.extract_strided_slice %32 {offsets = [0, 32], sizes = [2, 32], strides = [1, 1]} : vector<2x64xf32> to vector<2x32xf32>
    %35 = vector.extract_strided_slice %26 {offsets = [0, 64], sizes = [2, 32], strides = [1, 1]} : vector<2x128xf32> to vector<2x32xf32>
    %36 = math.tanh %35 : vector<2x32xf32>
    %37 = vector.extract_strided_slice %26 {offsets = [0, 96], sizes = [2, 32], strides = [1, 1]} : vector<2x128xf32> to vector<2x32xf32>
    %38 = arith.negf %37 : vector<2x32xf32>
    %39 = math.exp %38 : vector<2x32xf32>
    %cst_20 = arith.constant 1.000000e+00 : f32
    %40 = vector.broadcast %cst_20 : f32 to vector<2x32xf32>
    %41 = arith.addf %40, %39 : vector<2x32xf32>
    %42 = arith.divf %40, %41 : vector<2x32xf32>
    %43 = arith.mulf %34, %22 : vector<2x32xf32>
    %44 = arith.mulf %33, %36 : vector<2x32xf32>
    %45 = arith.addf %43, %44 : vector<2x32xf32>
    %46 = math.tanh %45 : vector<2x32xf32>
    %47 = arith.mulf %42, %46 : vector<2x32xf32>
    %48 = vector.extract_strided_slice %19 {offsets = [2, 0], sizes = [2, 128], strides = [1, 1]} : vector<16x128xf32> to vector<2x128xf32>
    %49 = arith.truncf %47 : vector<2x32xf32> to vector<2x32xbf16>
    %cst_21 = arith.constant dense<0.000000e+00> : vector<2x128xf32>
    %50 = tpu.matmul %49, %20, %cst_21 {dimension_numbers = #tpu.dot_dimension_numbers<[1], [0], [0], [1], [0, 0, 1, 1], [], []>} : vector<2x32xbf16>, vector<32x128xbf16>, vector<2x128xf32> -> vector<2x128xf32>
    %51 = arith.addf %48, %50 : vector<2x128xf32>
    %52 = vector.extract_strided_slice %51 {offsets = [0, 0], sizes = [2, 64], strides = [1, 1]} : vector<2x128xf32> to vector<2x64xf32>
    %53 = arith.negf %52 : vector<2x64xf32>
    %54 = math.exp %53 : vector<2x64xf32>
    %cst_22 = arith.constant 1.000000e+00 : f32
    %55 = vector.broadcast %cst_22 : f32 to vector<2x64xf32>
    %56 = arith.addf %55, %54 : vector<2x64xf32>
    %57 = arith.divf %55, %56 : vector<2x64xf32>
    %58 = vector.extract_strided_slice %57 {offsets = [0, 0], sizes = [2, 32], strides = [1, 1]} : vector<2x64xf32> to vector<2x32xf32>
    %59 = vector.extract_strided_slice %57 {offsets = [0, 32], sizes = [2, 32], strides = [1, 1]} : vector<2x64xf32> to vector<2x32xf32>
    %60 = vector.extract_strided_slice %51 {offsets = [0, 64], sizes = [2, 32], strides = [1, 1]} : vector<2x128xf32> to vector<2x32xf32>
    %61 = math.tanh %60 : vector<2x32xf32>
    %62 = vector.extract_strided_slice %51 {offsets = [0, 96], sizes = [2, 32], strides = [1, 1]} : vector<2x128xf32> to vector<2x32xf32>
    %63 = arith.negf %62 : vector<2x32xf32>
    %64 = math.exp %63 : vector<2x32xf32>
    %cst_23 = arith.constant 1.000000e+00 : f32
    %65 = vector.broadcast %cst_23 : f32 to vector<2x32xf32>
    %66 = arith.addf %65, %64 : vector<2x32xf32>
    %67 = arith.divf %65, %66 : vector<2x32xf32>
    %68 = arith.mulf %59, %45 : vector<2x32xf32>
    %69 = arith.mulf %58, %61 : vector<2x32xf32>
    %70 = arith.addf %68, %69 : vector<2x32xf32>
    %71 = math.tanh %70 : vector<2x32xf32>
    %72 = arith.mulf %67, %71 : vector<2x32xf32>
    %73 = vector.extract_strided_slice %19 {offsets = [4, 0], sizes = [2, 128], strides = [1, 1]} : vector<16x128xf32> to vector<2x128xf32>
    %74 = arith.truncf %72 : vector<2x32xf32> to vector<2x32xbf16>
    %cst_24 = arith.constant dense<0.000000e+00> : vector<2x128xf32>
    %75 = tpu.matmul %74, %20, %cst_24 {dimension_numbers = #tpu.dot_dimension_numbers<[1], [0], [0], [1], [0, 0, 1, 1], [], []>} : vector<2x32xbf16>, vector<32x128xbf16>, vector<2x128xf32> -> vector<2x128xf32>
    %76 = arith.addf %73, %75 : vector<2x128xf32>
    %77 = vector.extract_strided_slice %76 {offsets = [0, 0], sizes = [2, 64], strides = [1, 1]} : vector<2x128xf32> to vector<2x64xf32>
    %78 = arith.negf %77 : vector<2x64xf32>
    %79 = math.exp %78 : vector<2x64xf32>
    %cst_25 = arith.constant 1.000000e+00 : f32
    %80 = vector.broadcast %cst_25 : f32 to vector<2x64xf32>
    %81 = arith.addf %80, %79 : vector<2x64xf32>
    %82 = arith.divf %80, %81 : vector<2x64xf32>
    %83 = vector.extract_strided_slice %82 {offsets = [0, 0], sizes = [2, 32], strides = [1, 1]} : vector<2x64xf32> to vector<2x32xf32>
    %84 = vector.extract_strided_slice %82 {offsets = [0, 32], sizes = [2, 32], strides = [1, 1]} : vector<2x64xf32> to vector<2x32xf32>
    %85 = vector.extract_strided_slice %76 {offsets = [0, 64], sizes = [2, 32], strides = [1, 1]} : vector<2x128xf32> to vector<2x32xf32>
    %86 = math.tanh %85 : vector<2x32xf32>
    %87 = vector.extract_strided_slice %76 {offsets = [0, 96], sizes = [2, 32], strides = [1, 1]} : vector<2x128xf32> to vector<2x32xf32>
    %88 = arith.negf %87 : vector<2x32xf32>
    %89 = math.exp %88 : vector<2x32xf32>
    %cst_26 = arith.constant 1.000000e+00 : f32
    %90 = vector.broadcast %cst_26 : f32 to vector<2x32xf32>
    %91 = arith.addf %90, %89 : vector<2x32xf32>
    %92 = arith.divf %90, %91 : vector<2x32xf32>
    %93 = arith.mulf %84, %70 : vector<2x32xf32>
    %94 = arith.mulf %83, %86 : vector<2x32xf32>
    %95 = arith.addf %93, %94 : vector<2x32xf32>
    %96 = math.tanh %95 : vector<2x32xf32>
    %97 = arith.mulf %92, %96 : vector<2x32xf32>
    %98 = vector.extract_strided_slice %19 {offsets = [6, 0], sizes = [2, 128], strides = [1, 1]} : vector<16x128xf32> to vector<2x128xf32>
    %99 = arith.truncf %97 : vector<2x32xf32> to vector<2x32xbf16>
    %cst_27 = arith.constant dense<0.000000e+00> : vector<2x128xf32>
    %100 = tpu.matmul %99, %20, %cst_27 {dimension_numbers = #tpu.dot_dimension_numbers<[1], [0], [0], [1], [0, 0, 1, 1], [], []>} : vector<2x32xbf16>, vector<32x128xbf16>, vector<2x128xf32> -> vector<2x128xf32>
    %101 = arith.addf %98, %100 : vector<2x128xf32>
    %102 = vector.extract_strided_slice %101 {offsets = [0, 0], sizes = [2, 64], strides = [1, 1]} : vector<2x128xf32> to vector<2x64xf32>
    %103 = arith.negf %102 : vector<2x64xf32>
    %104 = math.exp %103 : vector<2x64xf32>
    %cst_28 = arith.constant 1.000000e+00 : f32
    %105 = vector.broadcast %cst_28 : f32 to vector<2x64xf32>
    %106 = arith.addf %105, %104 : vector<2x64xf32>
    %107 = arith.divf %105, %106 : vector<2x64xf32>
    %108 = vector.extract_strided_slice %107 {offsets = [0, 0], sizes = [2, 32], strides = [1, 1]} : vector<2x64xf32> to vector<2x32xf32>
    %109 = vector.extract_strided_slice %107 {offsets = [0, 32], sizes = [2, 32], strides = [1, 1]} : vector<2x64xf32> to vector<2x32xf32>
    %110 = vector.extract_strided_slice %101 {offsets = [0, 64], sizes = [2, 32], strides = [1, 1]} : vector<2x128xf32> to vector<2x32xf32>
    %111 = math.tanh %110 : vector<2x32xf32>
    %112 = vector.extract_strided_slice %101 {offsets = [0, 96], sizes = [2, 32], strides = [1, 1]} : vector<2x128xf32> to vector<2x32xf32>
    %113 = arith.negf %112 : vector<2x32xf32>
    %114 = math.exp %113 : vector<2x32xf32>
    %cst_29 = arith.constant 1.000000e+00 : f32
    %115 = vector.broadcast %cst_29 : f32 to vector<2x32xf32>
    %116 = arith.addf %115, %114 : vector<2x32xf32>
    %117 = arith.divf %115, %116 : vector<2x32xf32>
    %118 = arith.mulf %109, %95 : vector<2x32xf32>
    %119 = arith.mulf %108, %111 : vector<2x32xf32>
    %120 = arith.addf %118, %119 : vector<2x32xf32>
    %121 = math.tanh %120 : vector<2x32xf32>
    %122 = arith.mulf %117, %121 : vector<2x32xf32>
    %123 = vector.extract_strided_slice %19 {offsets = [8, 0], sizes = [2, 128], strides = [1, 1]} : vector<16x128xf32> to vector<2x128xf32>
    %124 = arith.truncf %122 : vector<2x32xf32> to vector<2x32xbf16>
    %cst_30 = arith.constant dense<0.000000e+00> : vector<2x128xf32>
    %125 = tpu.matmul %124, %20, %cst_30 {dimension_numbers = #tpu.dot_dimension_numbers<[1], [0], [0], [1], [0, 0, 1, 1], [], []>} : vector<2x32xbf16>, vector<32x128xbf16>, vector<2x128xf32> -> vector<2x128xf32>
    %126 = arith.addf %123, %125 : vector<2x128xf32>
    %127 = vector.extract_strided_slice %126 {offsets = [0, 0], sizes = [2, 64], strides = [1, 1]} : vector<2x128xf32> to vector<2x64xf32>
    %128 = arith.negf %127 : vector<2x64xf32>
    %129 = math.exp %128 : vector<2x64xf32>
    %cst_31 = arith.constant 1.000000e+00 : f32
    %130 = vector.broadcast %cst_31 : f32 to vector<2x64xf32>
    %131 = arith.addf %130, %129 : vector<2x64xf32>
    %132 = arith.divf %130, %131 : vector<2x64xf32>
    %133 = vector.extract_strided_slice %132 {offsets = [0, 0], sizes = [2, 32], strides = [1, 1]} : vector<2x64xf32> to vector<2x32xf32>
    %134 = vector.extract_strided_slice %132 {offsets = [0, 32], sizes = [2, 32], strides = [1, 1]} : vector<2x64xf32> to vector<2x32xf32>
    %135 = vector.extract_strided_slice %126 {offsets = [0, 64], sizes = [2, 32], strides = [1, 1]} : vector<2x128xf32> to vector<2x32xf32>
    %136 = math.tanh %135 : vector<2x32xf32>
    %137 = vector.extract_strided_slice %126 {offsets = [0, 96], sizes = [2, 32], strides = [1, 1]} : vector<2x128xf32> to vector<2x32xf32>
    %138 = arith.negf %137 : vector<2x32xf32>
    %139 = math.exp %138 : vector<2x32xf32>
    %cst_32 = arith.constant 1.000000e+00 : f32
    %140 = vector.broadcast %cst_32 : f32 to vector<2x32xf32>
    %141 = arith.addf %140, %139 : vector<2x32xf32>
    %142 = arith.divf %140, %141 : vector<2x32xf32>
    %143 = arith.mulf %134, %120 : vector<2x32xf32>
    %144 = arith.mulf %133, %136 : vector<2x32xf32>
    %145 = arith.addf %143, %144 : vector<2x32xf32>
    %146 = math.tanh %145 : vector<2x32xf32>
    %147 = arith.mulf %142, %146 : vector<2x32xf32>
    %148 = vector.extract_strided_slice %19 {offsets = [10, 0], sizes = [2, 128], strides = [1, 1]} : vector<16x128xf32> to vector<2x128xf32>
    %149 = arith.truncf %147 : vector<2x32xf32> to vector<2x32xbf16>
    %cst_33 = arith.constant dense<0.000000e+00> : vector<2x128xf32>
    %150 = tpu.matmul %149, %20, %cst_33 {dimension_numbers = #tpu.dot_dimension_numbers<[1], [0], [0], [1], [0, 0, 1, 1], [], []>} : vector<2x32xbf16>, vector<32x128xbf16>, vector<2x128xf32> -> vector<2x128xf32>
    %151 = arith.addf %148, %150 : vector<2x128xf32>
    %152 = vector.extract_strided_slice %151 {offsets = [0, 0], sizes = [2, 64], strides = [1, 1]} : vector<2x128xf32> to vector<2x64xf32>
    %153 = arith.negf %152 : vector<2x64xf32>
    %154 = math.exp %153 : vector<2x64xf32>
    %cst_34 = arith.constant 1.000000e+00 : f32
    %155 = vector.broadcast %cst_34 : f32 to vector<2x64xf32>
    %156 = arith.addf %155, %154 : vector<2x64xf32>
    %157 = arith.divf %155, %156 : vector<2x64xf32>
    %158 = vector.extract_strided_slice %157 {offsets = [0, 0], sizes = [2, 32], strides = [1, 1]} : vector<2x64xf32> to vector<2x32xf32>
    %159 = vector.extract_strided_slice %157 {offsets = [0, 32], sizes = [2, 32], strides = [1, 1]} : vector<2x64xf32> to vector<2x32xf32>
    %160 = vector.extract_strided_slice %151 {offsets = [0, 64], sizes = [2, 32], strides = [1, 1]} : vector<2x128xf32> to vector<2x32xf32>
    %161 = math.tanh %160 : vector<2x32xf32>
    %162 = vector.extract_strided_slice %151 {offsets = [0, 96], sizes = [2, 32], strides = [1, 1]} : vector<2x128xf32> to vector<2x32xf32>
    %163 = arith.negf %162 : vector<2x32xf32>
    %164 = math.exp %163 : vector<2x32xf32>
    %cst_35 = arith.constant 1.000000e+00 : f32
    %165 = vector.broadcast %cst_35 : f32 to vector<2x32xf32>
    %166 = arith.addf %165, %164 : vector<2x32xf32>
    %167 = arith.divf %165, %166 : vector<2x32xf32>
    %168 = arith.mulf %159, %145 : vector<2x32xf32>
    %169 = arith.mulf %158, %161 : vector<2x32xf32>
    %170 = arith.addf %168, %169 : vector<2x32xf32>
    %171 = math.tanh %170 : vector<2x32xf32>
    %172 = arith.mulf %167, %171 : vector<2x32xf32>
    %173 = vector.extract_strided_slice %19 {offsets = [12, 0], sizes = [2, 128], strides = [1, 1]} : vector<16x128xf32> to vector<2x128xf32>
    %174 = arith.truncf %172 : vector<2x32xf32> to vector<2x32xbf16>
    %cst_36 = arith.constant dense<0.000000e+00> : vector<2x128xf32>
    %175 = tpu.matmul %174, %20, %cst_36 {dimension_numbers = #tpu.dot_dimension_numbers<[1], [0], [0], [1], [0, 0, 1, 1], [], []>} : vector<2x32xbf16>, vector<32x128xbf16>, vector<2x128xf32> -> vector<2x128xf32>
    %176 = arith.addf %173, %175 : vector<2x128xf32>
    %177 = vector.extract_strided_slice %176 {offsets = [0, 0], sizes = [2, 64], strides = [1, 1]} : vector<2x128xf32> to vector<2x64xf32>
    %178 = arith.negf %177 : vector<2x64xf32>
    %179 = math.exp %178 : vector<2x64xf32>
    %cst_37 = arith.constant 1.000000e+00 : f32
    %180 = vector.broadcast %cst_37 : f32 to vector<2x64xf32>
    %181 = arith.addf %180, %179 : vector<2x64xf32>
    %182 = arith.divf %180, %181 : vector<2x64xf32>
    %183 = vector.extract_strided_slice %182 {offsets = [0, 0], sizes = [2, 32], strides = [1, 1]} : vector<2x64xf32> to vector<2x32xf32>
    %184 = vector.extract_strided_slice %182 {offsets = [0, 32], sizes = [2, 32], strides = [1, 1]} : vector<2x64xf32> to vector<2x32xf32>
    %185 = vector.extract_strided_slice %176 {offsets = [0, 64], sizes = [2, 32], strides = [1, 1]} : vector<2x128xf32> to vector<2x32xf32>
    %186 = math.tanh %185 : vector<2x32xf32>
    %187 = vector.extract_strided_slice %176 {offsets = [0, 96], sizes = [2, 32], strides = [1, 1]} : vector<2x128xf32> to vector<2x32xf32>
    %188 = arith.negf %187 : vector<2x32xf32>
    %189 = math.exp %188 : vector<2x32xf32>
    %cst_38 = arith.constant 1.000000e+00 : f32
    %190 = vector.broadcast %cst_38 : f32 to vector<2x32xf32>
    %191 = arith.addf %190, %189 : vector<2x32xf32>
    %192 = arith.divf %190, %191 : vector<2x32xf32>
    %193 = arith.mulf %184, %170 : vector<2x32xf32>
    %194 = arith.mulf %183, %186 : vector<2x32xf32>
    %195 = arith.addf %193, %194 : vector<2x32xf32>
    %196 = math.tanh %195 : vector<2x32xf32>
    %197 = arith.mulf %192, %196 : vector<2x32xf32>
    %198 = vector.extract_strided_slice %19 {offsets = [14, 0], sizes = [2, 128], strides = [1, 1]} : vector<16x128xf32> to vector<2x128xf32>
    %199 = arith.truncf %197 : vector<2x32xf32> to vector<2x32xbf16>
    %cst_39 = arith.constant dense<0.000000e+00> : vector<2x128xf32>
    %200 = tpu.matmul %199, %20, %cst_39 {dimension_numbers = #tpu.dot_dimension_numbers<[1], [0], [0], [1], [0, 0, 1, 1], [], []>} : vector<2x32xbf16>, vector<32x128xbf16>, vector<2x128xf32> -> vector<2x128xf32>
    %201 = arith.addf %198, %200 : vector<2x128xf32>
    %202 = vector.extract_strided_slice %201 {offsets = [0, 0], sizes = [2, 64], strides = [1, 1]} : vector<2x128xf32> to vector<2x64xf32>
    %203 = arith.negf %202 : vector<2x64xf32>
    %204 = math.exp %203 : vector<2x64xf32>
    %cst_40 = arith.constant 1.000000e+00 : f32
    %205 = vector.broadcast %cst_40 : f32 to vector<2x64xf32>
    %206 = arith.addf %205, %204 : vector<2x64xf32>
    %207 = arith.divf %205, %206 : vector<2x64xf32>
    %208 = vector.extract_strided_slice %207 {offsets = [0, 0], sizes = [2, 32], strides = [1, 1]} : vector<2x64xf32> to vector<2x32xf32>
    %209 = vector.extract_strided_slice %207 {offsets = [0, 32], sizes = [2, 32], strides = [1, 1]} : vector<2x64xf32> to vector<2x32xf32>
    %210 = vector.extract_strided_slice %201 {offsets = [0, 64], sizes = [2, 32], strides = [1, 1]} : vector<2x128xf32> to vector<2x32xf32>
    %211 = math.tanh %210 : vector<2x32xf32>
    %212 = vector.extract_strided_slice %201 {offsets = [0, 96], sizes = [2, 32], strides = [1, 1]} : vector<2x128xf32> to vector<2x32xf32>
    %213 = arith.negf %212 : vector<2x32xf32>
    %214 = math.exp %213 : vector<2x32xf32>
    %cst_41 = arith.constant 1.000000e+00 : f32
    %215 = vector.broadcast %cst_41 : f32 to vector<2x32xf32>
    %216 = arith.addf %215, %214 : vector<2x32xf32>
    %217 = arith.divf %215, %216 : vector<2x32xf32>
    %218 = arith.mulf %209, %195 : vector<2x32xf32>
    %219 = arith.mulf %208, %211 : vector<2x32xf32>
    %220 = arith.addf %218, %219 : vector<2x32xf32>
    %221 = math.tanh %220 : vector<2x32xf32>
    %222 = arith.mulf %217, %221 : vector<2x32xf32>
    %c0_42 = arith.constant 0 : index
    %c0_43 = arith.constant 0 : index
    %223 = vector.load %arg6[%c0_42, %c0_43] : memref<32x2xf32, #tpu.memory_space<vmem>>, vector<32x2xf32>
    %cst_44 = arith.constant dense<0.000000e+00> : vector<2x2xf32>
    %224 = tpu.matmul %222, %223, %cst_44 {dimension_numbers = #tpu.dot_dimension_numbers<[1], [0], [0], [1], [0, 0, 1, 1], [], []>} : vector<2x32xf32>, vector<32x2xf32>, vector<2x2xf32> -> vector<2x2xf32>
    %c0_45 = arith.constant 0 : index
    %c0_46 = arith.constant 0 : index
    %225 = vector.load %arg7[%c0_45, %c0_46] : memref<1x2xf32, #tpu.memory_space<vmem>>, vector<1x2xf32>
    %226 = vector.broadcast %225 : vector<1x2xf32> to vector<2x2xf32>
    %227 = arith.addf %224, %226 : vector<2x2xf32>
    %c0_47 = arith.constant 0 : index
    %c0_48 = arith.constant 0 : index
    %228 = vector.load %arg8[%c0_47, %c0_48] : memref<2x2xf32, #tpu.memory_space<vmem>>, vector<2x2xf32>
    tpu.vector_store %arg8[%c0_47, %c0_48], %227 {strides = array<i32>} : memref<2x2xf32, #tpu.memory_space<vmem>>, vector<2x2xf32>,
    return
  }
}

</mosaic_0001>

<bundles_post_ra>
// kernel: _lambda_.1
= control target key start
LH: loop header
LB: loop body
LE: loop exit
PB: predicated region body
PF: predicated region fallthrough
CT: control target
= control target key end

     0   :  { %vm2619_vm0 = vcmask 1041408   ;;  %vm1850_vm1 = vcmask 293888   ;;  %s11524_s0 = inlined_call_operand.vmem [shape: bf16[4096,36], index: 0, kind: input, shape index: {}]   ;;  %s11525_s1 = inlined_call_operand.vmem [shape: bf16[36,128], index: 1, kind: input, shape index: {}]   ;;  %s11526_s2 = inlined_call_operand.vmem [shape: f32[1,128], index: 2, kind: input, shape index: {}]   ;;  %s11527_s3 = inlined_call_operand.vmem [shape: bf16[128,128], index: 3, kind: input, shape index: {}]   ;;  %s11528_s4 = inlined_call_operand.vmem [shape: bf16[32,128], index: 4, kind: input, shape index: {}]   ;;  %s11529_s5 = inlined_call_operand.vmem [shape: f32[1,128], index: 5, kind: input, shape index: {}]   ;;  %s11530_s6 = inlined_call_operand.vmem [shape: f32[32,2], index: 6, kind: input, shape index: {}]   ;;  %s11531_s7 = inlined_call_operand.vmem [shape: f32[1,2], index: 7, kind: input, shape index: {}]   ;;  %s11532_s8 = inlined_call_operand.hbm [shape: f32[2,2], index: 8, kind: output, shape index: {}]  }
   0x1   :  { %v8724_v0 = vld [vmem:[%s11525_s1 + $0x10] ss:$0 sps:$4 sm:$0x33]   ;;  %v8725_v1 = vld [vmem:[%s11525_s1 + $0x8] sm:$0xff]   ;;  %v8727_v3 = vld [vmem:[%s11524_s0] sm:$0xff]  }
   0x2   :  { %8716 = vmatprep.subr.msk.bf16.mxu0 %vm2619_vm0, %v8724_v0  ;;  %v2621_v2 = vsel %vm2619_vm0, %v8724_v0, 0  ;;  %8717 = vmatprep.subr.msk.bf16.mxu1 %vm2619_vm0, %v8724_v0  ;;  %v8726_v4 = vld [vmem:[%s11525_s1] sm:$0xff]   ;;  %v8728_v5 = vld [vmem:[%s11524_s0 + $0x8] sm:$0xff]   ;;  %v8729_v6 = vld [vmem:[%s11524_s0 + $0x10] sm:$0xff]  }
   0x3   :  { %8098 = vmatpush3.bf16.msra.mxu0 %v2621_v2  ;;  %8713 = vmatpush3.bf16.msra.mxu1 %v2621_v2  ;;  %v8730_v7 = vld [vmem:[%s11524_s0 + $0x18] sm:$0xff]   ;;  %v8731_v8 = vld [vmem:[%s11524_s0 + $0x20] sm:$0xff]   ;;  %v8732_v9 = vld [vmem:[%s11524_s0 + $0x28] sm:$0xff]  }
   0x4   :  { %8099 = vmatprep.subr.bf16.mxu0 %v8725_v1  ;;  %8711 = vmatprep.subr.bf16.mxu1 %v8725_v1  ;;  %v8733_v10 = vld [vmem:[%s11524_s0 + $0x30] sm:$0xff]   ;;  %v8752_v12 = vld [vmem:[%s11524_s0 + $0x458] sm:$0xff]   ;;  %v8755_v13 = vld [vmem:[%s11524_s0 + $0x460] sm:$0xff]  }
   0x5   :  { %8103 = vmatprep.mubr.msk.bf16.mxu0 %vm1850_vm1, %v8727_v3  ;;  %v8751_v11 = vld [vmem:[%s11524_s0 + $0x450] sm:$0xff]   ;;  %v8734_v14 = vld [vmem:[%s11524_s0 + $0x38] sm:$0xff]   ;;  %v8735_v15 = vld [vmem:[%s11524_s0 + $0x40] sm:$0xff]  }
   0x6   :  { %8379 = vmatprep.mubr.msk.bf16.mxu1 %vm1850_vm1, %v8751_v11  ;;  %v8756_v16 = vld [vmem:[%s11524_s0 + $0x468] sm:$0xff]   ;;  %v8759_v17 = vld [vmem:[%s11524_s0 + $0x470] sm:$0xff]   ;;  %v8760_v20 = vld [vmem:[%s11524_s0 + $0x478] sm:$0xff]  }
   0x7   :  { %8100 = vmatpush3.bf16.msra.mxu0 %v8725_v1  ;;  %8714 = vmatpush3.bf16.msra.mxu1 %v8725_v1  ;;  %v8736_v18 = vld [vmem:[%s11524_s0 + $0x48] sm:$0xff]   ;;  %v8737_v19 = vld [vmem:[%s11524_s0 + $0x50] sm:$0xff]   ;;  %v8763_v21 = vld [vmem:[%s11524_s0 + $0x480] sm:$0xff]  }
   0x8   :  { %8101 = vmatprep.subr.bf16.mxu0 %v8726_v4  ;;  %8712 = vmatprep.subr.bf16.mxu1 %v8726_v4  ;;  %v8738_v22 = vld [vmem:[%s11524_s0 + $0x58] sm:$0xff]   ;;  %v8739_v23 = vld [vmem:[%s11524_s0 + $0x60] sm:$0xff]   ;;  %v8764_v24 = vld [vmem:[%s11524_s0 + $0x488] sm:$0xff]  }
   0x9   :  { %v8767_v25 = vld [vmem:[%s11524_s0 + $0x490] sm:$0xff]   ;;  %v8740_v26 = vld [vmem:[%s11524_s0 + $0x68] sm:$0xff]   ;;  %v8768_v28 = vld [vmem:[%s11524_s0 + $0x498] sm:$0xff]  }
   0xa   :  { %v8741_v27 = vld [vmem:[%s11524_s0 + $0x70] sm:$0xff]   ;;  %v8771_v29 = vld [vmem:[%s11524_s0 + $0x4a0] sm:$0xff]   ;;  %v8742_v30 = vld [vmem:[%s11524_s0 + $0x78] sm:$0xff]  }
   0xb   :  { %8102 = vmatpush3.bf16.msra.mxu0 %v8726_v4  ;;  %8715 = vmatpush3.bf16.msra.mxu1 %v8726_v4  ;;  %v8743_v31 = vld [vmem:[%s11524_s0 + $0x80] sm:$0xff]   ;;  %v8772_v32 = vld [vmem:[%s11524_s0 + $0x4a8] sm:$0xff]   ;;  %v8775_v33 = vld [vmem:[%s11524_s0 + $0x4b0] sm:$0xff]  }
   0xc   :  { %v8744_v34 = vld [vmem:[%s11524_s0 + $0x88] sm:$0xff]   ;;  %v8745_v35 = vld [vmem:[%s11524_s0 + $0x90] sm:$0xff]   ;;  %v8776_v36 = vld [vmem:[%s11524_s0 + $0x4b8] sm:$0xff]  }
   0xd   :  { %v8779_v37 = vld [vmem:[%s11524_s0 + $0x4c0] sm:$0xff]   ;;  %v8746_v38 = vld [vmem:[%s11524_s0 + $0x98] sm:$0xff]   ;;  %v8780_v40 = vld [vmem:[%s11524_s0 + $0x4c8] sm:$0xff]  }
   0xe   :  { %8104 = vmatmul.mubr.msk.bf16.vlgmr.msra.gmra.mxu0 %vm1850_vm1, %v8728_v5  ;;  %8380 = vmatmul.mubr.msk.bf16.vlgmr.msra.gmra.mxu1 %vm1850_vm1, %v8752_v12  ;;  %v8747_v39 = vld [vmem:[%s11524_s0 + $0xa0] sm:$0xff]   ;;  %v8783_v41 = vld [vmem:[%s11524_s0 + $0x4d0] sm:$0xff]   ;;  %v8748_v42 = vld [vmem:[%s11524_s0 + $0xa8] sm:$0xff]  }
   0xf   :  { %8107 = vmatprep.mubr.msk.bf16.mxu0 %vm1850_vm1, %v8729_v6  ;;  %8383 = vmatprep.mubr.msk.bf16.mxu1 %vm1850_vm1, %v8755_v13  ;;  %v8749_v43 = vld [vmem:[%s11524_s0 + $0xb0] sm:$0xff]   ;;  %v8784_v44 = vld [vmem:[%s11524_s0 + $0x4d8] sm:$0xff]   ;;  %v8787_v45 = vld [vmem:[%s11524_s0 + $0x4e0] sm:$0xff]  }
  0x10   :  { %v8750_v46 = vld [vmem:[%s11524_s0 + $0xb8] sm:$0xff]   ;;  %v8753_v47 = vld [vmem:[%s11524_s0 + $0xc0] sm:$0xff]   ;;  %v8788_v48 = vld [vmem:[%s11524_s0 + $0x4e8] sm:$0xff]  }
  0x11   :  { %v8791_v49 = vld [vmem:[%s11524_s0 + $0x4f0] sm:$0xff]   ;;  %v8754_v50 = vld [vmem:[%s11524_s0 + $0xc8] sm:$0xff]   ;;  %v8792_v52 = vld [vmem:[%s11524_s0 + $0x4f8] sm:$0xff]  }
  0x12   :  { %v8757_v51 = vld [vmem:[%s11524_s0 + $0xd0] sm:$0xff]   ;;  %v8795_v53 = vld [vmem:[%s11524_s0 + $0x500] sm:$0xff]   ;;  %v8758_v54 = vld [vmem:[%s11524_s0 + $0xd8] sm:$0xff]  }
  0x13   :  { %v8761_v55 = vld [vmem:[%s11524_s0 + $0xe0] sm:$0xff]   ;;  %v8796_v56 = vld [vmem:[%s11524_s0 + $0x508] sm:$0xff]   ;;  %v8799_v57 = vld [vmem:[%s11524_s0 + $0x510] sm:$0xff]  }
  0x14   :  { %v8762_v58 = vld [vmem:[%s11524_s0 + $0xe8] sm:$0xff]   ;;  %v8765_v59 = vld [vmem:[%s11524_s0 + $0xf0] sm:$0xff]   ;;  %v8800_v60 = vld [vmem:[%s11524_s0 + $0x518] sm:$0xff]  }
  0x15   :  { %v8803_v61 = vld [vmem:[%s11524_s0 + $0x520] sm:$0xff]   ;;  %v8766_v62 = vld [vmem:[%s11524_s0 + $0xf8] sm:$0xff]   ;;  %v8804_v0 = vld [vmem:[%s11524_s0 + $0x528] sm:$0xff]  }
  0x16   :  { %8108 = vmatmul.mubr.msk.bf16.gmra.mxu0 %vm1850_vm1, %v8730_v7  ;;  %8384 = vmatmul.mubr.msk.bf16.gmra.mxu1 %vm1850_vm1, %v8756_v16  ;;  %v8769_v63 = vld [vmem:[%s11524_s0 + $0x100] sm:$0xff]   ;;  %v8807_v1 = vld [vmem:[%s11524_s0 + $0x530] sm:$0xff]   ;;  %v8770_v2 = vld [vmem:[%s11524_s0 + $0x108] sm:$0xff]  }
  0x17   :  { %8111 = vmatprep.mubr.msk.bf16.mxu0 %vm1850_vm1, %v8731_v8  ;;  %8387 = vmatprep.mubr.msk.bf16.mxu1 %vm1850_vm1, %v8759_v17  ;;  %v8773_v3 = vld [vmem:[%s11524_s0 + $0x110] sm:$0xff]   ;;  %v8808_v4 = vld [vmem:[%s11524_s0 + $0x538] sm:$0xff]   ;;  %v8811_v5 = vld [vmem:[%s11524_s0 + $0x540] sm:$0xff]  }
  0x18   :  { %v8774_v6 = vld [vmem:[%s11524_s0 + $0x118] sm:$0xff]   ;;  %v8777_v7 = vld [vmem:[%s11524_s0 + $0x120] sm:$0xff]   ;;  %v8812_v8 = vld [vmem:[%s11524_s0 + $0x548] sm:$0xff]  }
  0x19   :  { %v8781_v11 = vld [vmem:[%s11524_s0 + $0x130] sm:$0xff]   ;;  %v8816_v12 = vld [vmem:[%s11524_s0 + $0x558] sm:$0xff]   ;;  %v8819_v13 = vld [vmem:[%s11524_s0 + $0x560] sm:$0xff]  }
  0x1a   :  { %v8820_v16 = vld [vmem:[%s11524_s0 + $0x568] sm:$0xff]   ;;  %v8823_v17 = vld [vmem:[%s11524_s0 + $0x570] sm:$0xff]  }
  0x1e   :  { %8112 = vmatmul.mubr.msk.bf16.gmra.mxu0 %vm1850_vm1, %v8732_v9  ;;  %8388 = vmatmul.mubr.msk.bf16.gmra.mxu1 %vm1850_vm1, %v8760_v20  ;;  %v8815_v9 = vld [vmem:[%s11524_s0 + $0x550] sm:$0xff]   ;;  %v8824_v20 = vld [vmem:[%s11524_s0 + $0x578] sm:$0xff]  }
  0x1f   :  { %8115 = vmatprep.mubr.msk.bf16.mxu0 %vm1850_vm1, %v8733_v10  ;;  %8391 = vmatprep.mubr.msk.bf16.mxu1 %vm1850_vm1, %v8763_v21  ;;  %v8778_v10 = vld [vmem:[%s11524_s0 + $0x128] sm:$0xff]   ;;  %v8827_v21 = vld [vmem:[%s11524_s0 + $0x580] sm:$0xff]  }
  0x26   :  { %8116 = vmatmul.mubr.msk.bf16.gmra.mxu0 %vm1850_vm1, %v8734_v14  ;;  %8392 = vmatmul.mubr.msk.bf16.gmra.mxu1 %vm1850_vm1, %v8764_v24  ;;  %v8782_v14 = vld [vmem:[%s11524_s0 + $0x138] sm:$0xff]   ;;  %v8828_v24 = vld [vmem:[%s11524_s0 + $0x588] sm:$0xff]  }
  0x27   :  { %8119 = vmatprep.mubr.msk.bf16.mxu0 %vm1850_vm1, %v8735_v15  ;;  %8395 = vmatprep.mubr.msk.bf16.mxu1 %vm1850_vm1, %v8767_v25  ;;  %v8785_v15 = vld [vmem:[%s11524_s0 + $0x140] sm:$0xff]   ;;  %v8831_v25 = vld [vmem:[%s11524_s0 + $0x590] sm:$0xff]  }
  0x2e   :  { %8120 = vmatmul.mubr.msk.bf16.gmra.mxu0 %vm1850_vm1, %v8736_v18  ;;  %8396 = vmatmul.mubr.msk.bf16.gmra.mxu1 %vm1850_vm1, %v8768_v28  ;;  %v8786_v18 = vld [vmem:[%s11524_s0 + $0x148] sm:$0xff]   ;;  %v8832_v28 = vld [vmem:[%s11524_s0 + $0x598] sm:$0xff]  }
  0x2f   :  { %8123 = vmatprep.mubr.msk.bf16.mxu0 %vm1850_vm1, %v8737_v19  ;;  %8399 = vmatprep.mubr.msk.bf16.mxu1 %vm1850_vm1, %v8771_v29  ;;  %v8789_v19 = vld [vmem:[%s11524_s0 + $0x150] sm:$0xff]   ;;  %v8835_v29 = vld [vmem:[%s11524_s0 + $0x5a0] sm:$0xff]  }
  0x36   :  { %8124 = vmatmul.mubr.msk.bf16.gmra.mxu0 %vm1850_vm1, %v8738_v22  ;;  %8400 = vmatmul.mubr.msk.bf16.gmra.mxu1 %vm1850_vm1, %v8772_v32  ;;  %v8790_v22 = vld [vmem:[%s11524_s0 + $0x158] sm:$0xff]   ;;  %v8836_v32 = vld [vmem:[%s11524_s0 + $0x5a8] sm:$0xff]  }
  0x37   :  { %8127 = vmatprep.mubr.msk.bf16.mxu0 %vm1850_vm1, %v8739_v23  ;;  %8403 = vmatprep.mubr.msk.bf16.mxu1 %vm1850_vm1, %v8775_v33  ;;  %v8793_v23 = vld [vmem:[%s11524_s0 + $0x160] sm:$0xff]   ;;  %v8839_v33 = vld [vmem:[%s11524_s0 + $0x5b0] sm:$0xff]  }
  0x3e   :  { %8128 = vmatmul.mubr.msk.bf16.gmra.mxu0 %vm1850_vm1, %v8740_v26  ;;  %8404 = vmatmul.mubr.msk.bf16.gmra.mxu1 %vm1850_vm1, %v8776_v36  ;;  %v8794_v26 = vld [vmem:[%s11524_s0 + $0x168] sm:$0xff]   ;;  %v8840_v36 = vld [vmem:[%s11524_s0 + $0x5b8] sm:$0xff]  }
  0x3f   :  { %8131 = vmatprep.mubr.msk.bf16.mxu0 %vm1850_vm1, %v8741_v27  ;;  %8407 = vmatprep.mubr.msk.bf16.mxu1 %vm1850_vm1, %v8779_v37  ;;  %v8797_v27 = vld [vmem:[%s11524_s0 + $0x170] sm:$0xff]   ;;  %v8843_v37 = vld [vmem:[%s11524_s0 + $0x5c0] sm:$0xff]  }
  0x46   :  { %8132 = vmatmul.mubr.msk.bf16.gmra.mxu0 %vm1850_vm1, %v8742_v30  ;;  %8408 = vmatmul.mubr.msk.bf16.gmra.mxu1 %vm1850_vm1, %v8780_v40  ;;  %v8798_v30 = vld [vmem:[%s11524_s0 + $0x178] sm:$0xff]  }
  0x47   :  { %8135 = vmatprep.mubr.msk.bf16.mxu0 %vm1850_vm1, %v8743_v31  ;;  %8411 = vmatprep.mubr.msk.bf16.mxu1 %vm1850_vm1, %v8783_v41  ;;  %v8801_v31 = vld [vmem:[%s11524_s0 + $0x180] sm:$0xff]  }
  0x4e   :  { %8136 = vmatmul.mubr.msk.bf16.gmra.mxu0 %vm1850_vm1, %v8744_v34  ;;  %8412 = vmatmul.mubr.msk.bf16.gmra.mxu1 %vm1850_vm1, %v8784_v44  ;;  %v8802_v34 = vld [vmem:[%s11524_s0 + $0x188] sm:$0xff]  }
  0x4f   :  { %8139 = vmatprep.mubr.msk.bf16.mxu0 %vm1850_vm1, %v8745_v35  ;;  %8415 = vmatprep.mubr.msk.bf16.mxu1 %vm1850_vm1, %v8787_v45  ;;  %v8805_v35 = vld [vmem:[%s11524_s0 + $0x190] sm:$0xff]   ;;  %v8844_v45 = vld [vmem:[%s11524_s0 + $0x5c8] sm:$0xff]  }
  0x56   :  { %8140 = vmatmul.mubr.msk.bf16.gmra.mxu0 %vm1850_vm1, %v8746_v38  ;;  %8416 = vmatmul.mubr.msk.bf16.gmra.mxu1 %vm1850_vm1, %v8788_v48  ;;  %v9535_v38 = vld [vmem:[%s11526_s2] ss:$0 sm:$0xff]  ;;  %v8847_v48 = vld [vmem:[%s11524_s0 + $0x5d0] sm:$0xff]  }
  0x57   :  { %8143 = vmatprep.mubr.msk.bf16.mxu0 %vm1850_vm1, %v8747_v39  ;;  %8419 = vmatprep.mubr.msk.bf16.mxu1 %vm1850_vm1, %v8791_v49 }
  0x5e   :  { %8144 = vmatmul.mubr.msk.bf16.gmra.mxu0 %vm1850_vm1, %v8748_v42  ;;  %8420 = vmatmul.mubr.msk.bf16.gmra.mxu1 %vm1850_vm1, %v8792_v52 }
  0x5f   :  { %8147 = vmatprep.mubr.msk.bf16.mxu0 %vm1850_vm1, %v8749_v43  ;;  %8423 = vmatprep.mubr.msk.bf16.mxu1 %vm1850_vm1, %v8795_v53  ;;  %v8806_v43 = vld [vmem:[%s11524_s0 + $0x198] sm:$0xff]  }
  0x66   :  { %8148 = vmatmul.mubr.msk.bf16.gmra.mxu0 %vm1850_vm1, %v8750_v46  ;;  %8424 = vmatmul.mubr.msk.bf16.gmra.mxu1 %vm1850_vm1, %v8796_v56 }
  0x67   :  { %8151 = vmatprep.mubr.msk.bf16.mxu0 %vm1850_vm1, %v8753_v47  ;;  %8427 = vmatprep.mubr.msk.bf16.mxu1 %vm1850_vm1, %v8799_v57  ;;  %v8809_v47 = vld [vmem:[%s11524_s0 + $0x1a0] sm:$0xff]   ;;  %v8810_v57 = vld [vmem:[%s11524_s0 + $0x1a8] sm:$0xff]  }
  0x6e   :  { %8152 = vmatmul.mubr.msk.bf16.gmra.mxu0 %vm1850_vm1, %v8754_v50  ;;  %8428 = vmatmul.mubr.msk.bf16.gmra.mxu1 %vm1850_vm1, %v8800_v60 }
  0x6f   :  { %8155 = vmatprep.mubr.msk.bf16.mxu0 %vm1850_vm1, %v8757_v51  ;;  %8431 = vmatprep.mubr.msk.bf16.mxu1 %vm1850_vm1, %v8803_v61 }
  0x76   :  { %8156 = vmatmul.mubr.msk.bf16.gmra.mxu0 %vm1850_vm1, %v8758_v54  ;;  %8432 = vmatmul.mubr.msk.bf16.gmra.mxu1 %vm1850_vm1, %v8804_v0 }
  0x77   :  { %8159 = vmatprep.mubr.msk.bf16.mxu0 %vm1850_vm1, %v8761_v55  ;;  %8435 = vmatprep.mubr.msk.bf16.mxu1 %vm1850_vm1, %v8807_v1 }
  0x7e   :  { %8160 = vmatmul.mubr.msk.bf16.gmra.mxu0 %vm1850_vm1, %v8762_v58  ;;  %8436 = vmatmul.mubr.msk.bf16.gmra.mxu1 %vm1850_vm1, %v8808_v4  ;;  %v8851_v4 = vld [vmem:[%s11524_s0 + $0x5e0] sm:$0xff]  }
  0x7f   :  { %8163 = vmatprep.mubr.msk.bf16.mxu0 %vm1850_vm1, %v8765_v59  ;;  %8439 = vmatprep.mubr.msk.bf16.mxu1 %vm1850_vm1, %v8811_v5 }
  0x86   :  { %8164 = vmatmul.mubr.msk.bf16.gmra.mxu0 %vm1850_vm1, %v8766_v62  ;;  %8440 = vmatmul.mubr.msk.bf16.gmra.mxu1 %vm1850_vm1, %v8812_v8 }
  0x87   :  { %8167 = vmatprep.mubr.msk.bf16.mxu0 %vm1850_vm1, %v8769_v63  ;;  %8443 = vmatprep.mubr.msk.bf16.mxu1 %vm1850_vm1, %v8815_v9  ;;  %v8848_v63 = vld [vmem:[%s11524_s0 + $0x5d8] sm:$0xff]  }
  0x8e   :  { %8168 = vmatmul.mubr.msk.bf16.gmra.mxu0 %vm1850_vm1, %v8770_v2  ;;  %8444 = vmatmul.mubr.msk.bf16.gmra.mxu1 %vm1850_vm1, %v8816_v12 }
  0x8f   :  { %8171 = vmatprep.mubr.msk.bf16.mxu0 %vm1850_vm1, %v8773_v3  ;;  %8447 = vmatprep.mubr.msk.bf16.mxu1 %vm1850_vm1, %v8819_v13  ;;  %v8813_v3 = vld [vmem:[%s11524_s0 + $0x1b0] sm:$0xff]  }
  0x96   :  { %8172 = vmatmul.mubr.msk.bf16.gmra.mxu0 %vm1850_vm1, %v8774_v6  ;;  %8448 = vmatmul.mubr.msk.bf16.gmra.mxu1 %vm1850_vm1, %v8820_v16 }
  0x97   :  { %8175 = vmatprep.mubr.msk.bf16.mxu0 %vm1850_vm1, %v8777_v7  ;;  %8451 = vmatprep.mubr.msk.bf16.mxu1 %vm1850_vm1, %v8823_v17  ;;  %v8814_v17 = vld [vmem:[%s11524_s0 + $0x1b8] sm:$0xff]  }
  0x9e   :  { %8176 = vmatmul.mubr.msk.bf16.gmra.mxu0 %vm1850_vm1, %v8778_v10  ;;  %8452 = vmatmul.mubr.msk.bf16.gmra.mxu1 %vm1850_vm1, %v8824_v20 }
  0x9f   :  { %8179 = vmatprep.mubr.msk.bf16.mxu0 %vm1850_vm1, %v8781_v11  ;;  %8455 = vmatprep.mubr.msk.bf16.mxu1 %vm1850_vm1, %v8827_v21 }
  0xa6   :  { %8180 = vmatmul.mubr.msk.bf16.gmra.mxu0 %vm1850_vm1, %v8782_v14  ;;  %8456 = vmatmul.mubr.msk.bf16.gmra.mxu1 %vm1850_vm1, %v8828_v24 }
  0xa7   :  { %8183 = vmatprep.mubr.msk.bf16.mxu0 %vm1850_vm1, %v8785_v15  ;;  %8459 = vmatprep.mubr.msk.bf16.mxu1 %vm1850_vm1, %v8831_v25 }
  0xae   :  { %8184 = vmatmul.mubr.msk.bf16.gmra.mxu0 %vm1850_vm1, %v8786_v18  ;;  %8460 = vmatmul.mubr.msk.bf16.gmra.mxu1 %vm1850_vm1, %v8832_v28 }
  0xaf   :  { %8187 = vmatprep.mubr.msk.bf16.mxu0 %vm1850_vm1, %v8789_v19  ;;  %8463 = vmatprep.mubr.msk.bf16.mxu1 %vm1850_vm1, %v8835_v29 }
  0xb6   :  { %8188 = vmatmul.mubr.msk.bf16.gmra.mxu0 %vm1850_vm1, %v8790_v22  ;;  %8464 = vmatmul.mubr.msk.bf16.gmra.mxu1 %vm1850_vm1, %v8836_v32 }
  0xb7   :  { %8191 = vmatprep.mubr.msk.bf16.mxu0 %vm1850_vm1, %v8793_v23  ;;  %8467 = vmatprep.mubr.msk.bf16.mxu1 %vm1850_vm1, %v8839_v33 }
  0xbe   :  { %8192 = vmatmul.mubr.msk.bf16.gmra.mxu0 %vm1850_vm1, %v8794_v26  ;;  %8468 = vmatmul.mubr.msk.bf16.gmra.mxu1 %vm1850_vm1, %v8840_v36  ;;  %v8852_v26 = vld [vmem:[%s11524_s0 + $0x5e8] sm:$0xff]  }
  0xbf   :  { %8195 = vmatprep.mubr.msk.bf16.mxu0 %vm1850_vm1, %v8797_v27  ;;  %8471 = vmatprep.mubr.msk.bf16.mxu1 %vm1850_vm1, %v8843_v37 }
  0xc6   :  { %8196 = vmatmul.mubr.msk.bf16.gmra.mxu0 %vm1850_vm1, %v8798_v30  ;;  %8472 = vmatmul.mubr.msk.bf16.gmra.mxu1 %vm1850_vm1, %v8844_v45  ;;  %v8817_v30 = vld [vmem:[%s11524_s0 + $0x1c0] sm:$0xff]  }
  0xc7   :  { %8199 = vmatprep.mubr.msk.bf16.mxu0 %vm1850_vm1, %v8801_v31  ;;  %8475 = vmatprep.mubr.msk.bf16.mxu1 %vm1850_vm1, %v8847_v48  ;;  %v8855_v31 = vld [vmem:[%s11524_s0 + $0x5f0] sm:$0xff]  }
  0xce   :  { %v8105_v39 = vpop.f32.mrf.mxu0  ;;  %8200 = vmatmul.mubr.msk.bf16.gmra.mxu0 %vm1850_vm1, %v8802_v34  ;;  %v9578_v12 = vpop.f32.mrf.mxu1  ;;  %8476 = vmatmul.mubr.msk.bf16.gmra.mxu1 %vm1850_vm1, %v8848_v63  ;;  %v8873_v63 = vld [vmem:[%s11527_s3 + $0x38] sm:$0xff]  }
  0xcf   :  { %8203 = vmatprep.mubr.msk.bf16.mxu0 %vm1850_vm1, %v8805_v35  ;;  %v2666_v41 = vadd.f32 %v8105_v39, %v9535_v38  ;;  %8479 = vmatprep.mubr.msk.bf16.mxu1 %vm1850_vm1, %v8851_v4  ;;  %v11533_v4 = vmov 0.0  }
  0xd0   :  { %v2657_v40 = vpop.f32.mrf.mxu0  ;;  %v9586_v18 = vpop.f32.mrf.mxu1  ;;  %8615 = vmatprep.subr.bf16.mxu1 %v11533_v4 }
  0xd1   :  { %v2658_v42 = vadd.f32 %v9535_v38, %v2657_v40  ;;  %v4706_v50 = vmax.f32 %v2666_v41, 0.0  ;;  %8616 = vmatpush3.bf16.msra.mxu1 %v8873_v63 }
  0xd2   :  { %v8106_v44 = vpop.f32.mrf.mxu0  ;;  %v9590_v25 = vpop.f32.mrf.mxu1 }
  0xd3   :  { %v2669_v46 = vadd.f32 %v8106_v44, %v9535_v38  ;;  %v4704_v51 = vmax.f32 %v2658_v42, 0.0  ;;  %v5218_v0 = vmin.f32 %v4706_v50, 6.0 }
  0xd4   :  { %v2660_v49 = vpop.f32.mrf.mxu0  ;;  %v9601_v33 = vpop.f32.mrf.mxu1 }
  0xd5   :  { %v2661_v52 = vadd.f32 %v9535_v38, %v2660_v49  ;;  %v4707_v54 = vmax.f32 %v2669_v46, 0.0  ;;  %v5216_v58 = vmin.f32 %v4704_v51, 6.0 }
  0xd6   :  { %v8109_v53 = vpop.f32.mrf.mxu0  ;;  %8204 = vmatmul.mubr.msk.bf16.gmra.mxu0 %vm1850_vm1, %v8806_v43  ;;  %v9606_v41 = vpop.f32.mrf.mxu1  ;;  %8480 = vmatmul.mubr.msk.bf16.gmra.mxu1 %vm1850_vm1, %v8852_v26 }
  0xd7   :  { %v4705_v55 = vmax.f32 %v2661_v52, 0.0  ;;  %8207 = vmatprep.mubr.msk.bf16.mxu0 %vm1850_vm1, %v8809_v47  ;;  %v2682_v60 = vadd.f32 %v8109_v53, %v9535_v38  ;;  %v5219_v5 = vmin.f32 %v4707_v54, 6.0  ;;  %8483 = vmatprep.mubr.msk.bf16.mxu1 %vm1850_vm1, %v8855_v31  ;;  %v8818_v53 = vld [vmem:[%s11524_s0 + $0x1c8] sm:$0xff]  }
  0xd8   :  { %v2673_v56 = vpop.f32.mrf.mxu0  ;;  %v9611_v46 = vpop.f32.mrf.mxu1 }
  0xd9   :  { %v5217_v59 = vmin.f32 %v4705_v55, 6.0  ;;  %v2674_v61 = vadd.f32 %v9535_v38, %v2673_v56  ;;  %v4710_v8 = vmax.f32 %v2682_v60, 0.0  ;;  %v8856_v55 = vld [vmem:[%s11524_s0 + $0x5f8] sm:$0xff]   ;;  %v8859_v60 = vld [vmem:[%s11524_s0 + $0x600] sm:$0xff]  }
  0xda   :  { %v8110_v62 = vpop.f32.mrf.mxu0  ;;  %v9618_v54 = vpop.f32.mrf.mxu1 }
  0xdb   :  { %v5728_v1 = vadd.f32 %v5217_v59, %v5216_v58  ;;  %v4708_v2 = vmax.f32 %v2674_v61, 0.0  ;;  %v2685_v9 = vadd.f32 %v8110_v62, %v9535_v38  ;;  %v5222_v27 = vmin.f32 %v4710_v8, 6.0  ;;  %v8821_v59 = vld [vmem:[%s11524_s0 + $0x1d0] sm:$0xff]  }
  0xdc   :  { %v2676_v6 = vpop.f32.mrf.mxu0  ;;  %v9629_v62 = vpop.f32.mrf.mxu1 }
  0xdd   :  { %v5729_v7 = vadd.f32 %v5728_v1, %v5218_v0  ;;  %v2677_v10 = vadd.f32 %v9535_v38, %v2676_v6  ;;  %v5220_v13 = vmin.f32 %v4708_v2, 6.0  ;;  %v4711_v20 = vmax.f32 %v2685_v9, 0.0 }
  0xde   :  { %v8113_v11 = vpop.f32.mrf.mxu0  ;;  %8208 = vmatmul.mubr.msk.bf16.gmra.mxu0 %vm1850_vm1, %v8810_v57  ;;  %8484 = vmatmul.mubr.msk.bf16.gmra.mxu1 %vm1850_vm1, %v8856_v55 }
  0xdf   :  { %v5730_v14 = vadd.f32 %v5729_v7, %v5219_v5  ;;  %v4709_v15 = vmax.f32 %v2677_v10, 0.0  ;;  %8211 = vmatprep.mubr.msk.bf16.mxu0 %vm1850_vm1, %v8813_v3  ;;  %v2698_v23 = vadd.f32 %v8113_v11, %v9535_v38  ;;  %v5223_v34 = vmin.f32 %v4711_v20, 6.0  ;;  %v9638_v7 = vpop.f32.mrf.mxu1  ;;  %8487 = vmatprep.mubr.msk.bf16.mxu1 %vm1850_vm1, %v8859_v60 }
  0xe0   :  { %v2689_v16 = vpop.f32.mrf.mxu0  ;;  %11539 = vst [vmem:[#allocation5_spill] sm:$0xff] %v9638_v7 }
  0xe1   :  { %v5731_v19 = vadd.f32 %v5730_v14, %v5220_v13  ;;  %v5221_v21 = vmin.f32 %v4709_v15, 6.0  ;;  %v2690_v22 = vadd.f32 %v9535_v38, %v2689_v16  ;;  %v4714_v39 = vmax.f32 %v2698_v23, 0.0  ;;  %v9643_v13 = vpop.f32.mrf.mxu1 }
  0xe2   :  { %v8114_v24 = vpop.f32.mrf.mxu0  ;;  %11540 = vst [vmem:[#allocation6_spill] sm:$0xff] %v9643_v13 }
  0xe3   :  { %v5732_v28 = vadd.f32 %v5731_v19, %v5221_v21  ;;  %v4712_v29 = vmax.f32 %v2690_v22, 0.0  ;;  %v2701_v36 = vadd.f32 %v8114_v24, %v9535_v38  ;;  %v5226_v56 = vmin.f32 %v4714_v39, 6.0 }
  0xe4   :  { %v2692_v32 = vpop.f32.mrf.mxu0 }
  0xe5   :  { %v5733_v35 = vadd.f32 %v5732_v28, %v5222_v27  ;;  %v2693_v37 = vadd.f32 %v9535_v38, %v2692_v32  ;;  %v5224_v42 = vmin.f32 %v4712_v29, 6.0  ;;  %v4715_v48 = vmax.f32 %v2701_v36, 0.0 }
  0xe6   :  { %v8117_v40 = vpop.f32.mrf.mxu0  ;;  %8212 = vmatmul.mubr.msk.bf16.gmra.mxu0 %vm1850_vm1, %v8814_v17 }
  0xe7   :  { %v5734_v43 = vadd.f32 %v5733_v35, %v5223_v34  ;;  %v4713_v44 = vmax.f32 %v2693_v37, 0.0  ;;  %8215 = vmatprep.mubr.msk.bf16.mxu0 %vm1850_vm1, %v8817_v30  ;;  %v2714_v51 = vadd.f32 %v8117_v40, %v9535_v38  ;;  %v5227_v0 = vmin.f32 %v4715_v48, 6.0 }
  0xe8   :  { %v2705_v45 = vpop.f32.mrf.mxu0 }
  0xe9   :  { %v5735_v47 = vadd.f32 %v5734_v43, %v5224_v42  ;;  %v5225_v49 = vmin.f32 %v4713_v44, 6.0  ;;  %v2706_v50 = vadd.f32 %v9535_v38, %v2705_v45  ;;  %v4718_v5 = vmax.f32 %v2714_v51, 0.0 }
  0xea   :  { %v8118_v52 = vpop.f32.mrf.mxu0 }
  0xeb   :  { %v5736_v57 = vadd.f32 %v5735_v47, %v5225_v49  ;;  %v4716_v58 = vmax.f32 %v2706_v50, 0.0  ;;  %v2717_v2 = vadd.f32 %v8118_v52, %v9535_v38 }
  0xec   :  { %v2708_v61 = vpop.f32.mrf.mxu0 }
  0xed   :  { %v5737_v1 = vadd.f32 %v5736_v57, %v5226_v56  ;;  %v2709_v3 = vadd.f32 %v9535_v38, %v2708_v61  ;;  %v5228_v8 = vmin.f32 %v4716_v58, 6.0 }
  0xee   :  { %v8121_v6 = vpop.f32.mrf.mxu0  ;;  %8216 = vmatmul.mubr.msk.bf16.gmra.mxu0 %vm1850_vm1, %v8818_v53 }
  0xef   :  { %v5738_v9 = vadd.f32 %v5737_v1, %v5227_v0  ;;  %v4717_v10 = vmax.f32 %v2709_v3, 0.0  ;;  %8219 = vmatprep.mubr.msk.bf16.mxu0 %vm1850_vm1, %v8821_v59 }
  0xf0   :  { %v2721_v11 = vpop.f32.mrf.mxu0 }
  0xf1   :  { %13 = vsyncpa [#allocation3], 0  ;;  %v5739_v14 = vadd.f32 %v5738_v9, %v5228_v8  ;;  %v4719_v15 = vmax.f32 %v2717_v2, 0.0  ;;  %v5229_v16 = vmin.f32 %v4717_v10, 6.0  ;;  %v2722_v17 = vadd.f32 %v9535_v38, %v2721_v11  ;;  %8617 = vmatprep.subr.bf16.mxu1 %v11533_v4  ;;  %v8822_v20 = vld [vmem:[%s11524_s0 + $0x1d8] sm:$0xff]   ;;  %v9650_v21 = vpop.f32.mrf.mxu1  ;;  %v8860_v22 = vld [vmem:[%s11524_s0 + $0x608] sm:$0xff]  }
  0xf2   :  { %v8122_v19 = vpop.f32.mrf.mxu0  ;;  %11541 = vst [vmem:[#allocation7_spill] sm:$0xff] %v9650_v21  ;;  %v5230_v23 = vmin.f32 %v4718_v5, 6.0  ;;  %v2730_v26 = vadd.f32 %v8121_v6, %v9535_v38  ;;  %v8825_v28 = vld [vmem:[%s11524_s0 + $0x1e0] sm:$0xff]   ;;  %v8863_v29 = vld [vmem:[%s11524_s0 + $0x610] sm:$0xff]   ;;  %8488 = vmatmul.mubr.msk.bf16.gmra.mxu1 %vm1850_vm1, %v8860_v22  ;;  %v8826_v55 = vld [vmem:[%s11524_s0 + $0x1e8] sm:$0xff]   ;;  %vm6408_vm2 = vcmask 1041409  }
  0xf3   :  { %v5740_v24 = vadd.f32 %v5739_v14, %v5229_v16  ;;  %v4720_v27 = vmax.f32 %v2722_v17, 0.0  ;;  %v9662_v31 = vpop.f32.mrf.mxu1  ;;  %v5231_v32 = vmin.f32 %v4719_v15, 6.0  ;;  %v2733_v35 = vadd.f32 %v8122_v19, %v9535_v38  ;;  %8491 = vmatprep.mubr.msk.bf16.mxu1 %vm1850_vm1, %v8863_v29  ;;  %v8864_v59 = vld [vmem:[%s11524_s0 + $0x618] sm:$0xff]   ;;  %v8829_v0 = vld [vmem:[%s11524_s0 + $0x1f0] sm:$0xff]   ;;  %v8867_v1 = vld [vmem:[%s11524_s0 + $0x620] sm:$0xff]   ;;  %s9087_s23 = smov 64  }
  0xf4   :  { %v2724_v30 = vpop.f32.mrf.mxu0  ;;  %11542 = vst [vmem:[#allocation8_spill] sm:$0xff] %v9662_v31  ;;  %v4722_v40 = vmax.f32 %v2730_v26, 0.0  ;;  %vm6410_vm3 = vcmask 1042434   ;;  %vm6412_vm4 = vcmask 1043459   ;;  %vm6414_vm5 = vcmask 1044484  }
  0xf5   :  { %v5741_v34 = vadd.f32 %v5740_v24, %v5230_v23  ;;  %v2725_v36 = vadd.f32 %v9535_v38, %v2724_v30  ;;  %v8393_v39 = vpop.f32.mrf.mxu1  ;;  %v5232_v42 = vmin.f32 %v4720_v27, 6.0  ;;  %v4723_v49 = vmax.f32 %v2733_v35, 0.0 }
  0xf6   :  { %v8125_v37 = vpop.f32.mrf.mxu0  ;;  %8220 = vmatmul.mubr.msk.bf16.gmra.mxu0 %vm1850_vm1, %v8822_v20  ;;  %v3818_v56 = vadd.f32 %v8393_v39, %v9535_v38  ;;  %v5234_v60 = vmin.f32 %v4722_v40, 6.0  ;;  %vm6416_vm6 = vcmask 1045509   ;;  %vm6418_vm7 = vcmask 1046534  }
  0xf7   :  { %v5742_v43 = vadd.f32 %v5741_v34, %v5231_v32  ;;  %v4721_v44 = vmax.f32 %v2725_v36, 0.0  ;;  %8223 = vmatprep.mubr.msk.bf16.mxu0 %vm1850_vm1, %v8825_v28  ;;  %v3809_v47 = vpop.f32.mrf.mxu1  ;;  %v2746_v52 = vadd.f32 %v8125_v37, %v9535_v38  ;;  %v5235_v9 = vmin.f32 %v4723_v49, 6.0 }
  0xf8   :  { %v2737_v45 = vpop.f32.mrf.mxu0  ;;  %v3810_v57 = vadd.f32 %v9535_v38, %v3809_v47  ;;  %v4994_v16 = vmax.f32 %v3818_v56, 0.0  ;;  %vm9085_vm8 = vmmov 0   ;;  %vm6420_vm9 = vcmask 1047559  }
  0xf9   :  { %v5743_v48 = vadd.f32 %v5742_v43, %v5232_v42  ;;  %v5233_v50 = vmin.f32 %v4721_v44, 6.0  ;;  %v2738_v51 = vadd.f32 %v9535_v38, %v2737_v45  ;;  %v8394_v58 = vpop.f32.mrf.mxu1  ;;  %v4726_v14 = vmax.f32 %v2746_v52, 0.0  ;;  %v8830_v42 = vld [vmem:[%s11524_s0 + $0x1f8] sm:$0xff]  }
  0xfa   :  { %v8126_v53 = vpop.f32.mrf.mxu0  ;;  %v4992_v5 = vmax.f32 %v3810_v57, 0.0  ;;  %v3821_v6 = vadd.f32 %v8394_v58, %v9535_v38  ;;  %8492 = vmatmul.mubr.msk.bf16.gmra.mxu1 %vm1850_vm1, %v8864_v59  ;;  %v5506_v43 = vmin.f32 %v4994_v16, 6.0  ;;  %vm6536_vm10 = vcmask 261120  }
  0xfb   :  { %v5744_v61 = vadd.f32 %v5743_v48, %v5233_v50  ;;  %v4724_v63 = vmax.f32 %v2738_v51, 0.0  ;;  %v2749_v2 = vadd.f32 %v8126_v53, %v9535_v38  ;;  %v3812_v8 = vpop.f32.mrf.mxu1  ;;  %8495 = vmatprep.mubr.msk.bf16.mxu1 %vm1850_vm1, %v8867_v1  ;;  %v8868_v48 = vld [vmem:[%s11524_s0 + $0x628] sm:$0xff]   ;;  %v5238_v49 = vmin.f32 %v4726_v14, 6.0  ;;  %v8833_v53 = vld [vmem:[%s11524_s0 + $0x200] sm:$0xff]  }
  0xfc   :  { %v2740_v3 = vpop.f32.mrf.mxu0  ;;  %v3813_v17 = vadd.f32 %v9535_v38, %v3812_v8  ;;  %v5504_v28 = vmin.f32 %v4992_v5, 6.0  ;;  %v4995_v29 = vmax.f32 %v3821_v6, 0.0  ;;  %vm7240_vm11 = vcmask 9216  }
  0xfd   :  { %v5745_v10 = vadd.f32 %v5744_v61, %v5234_v60  ;;  %v2741_v11 = vadd.f32 %v9535_v38, %v2740_v3  ;;  %v8397_v19 = vpop.f32.mrf.mxu1  ;;  %v5236_v20 = vmin.f32 %v4724_v63, 6.0  ;;  %v4727_v26 = vmax.f32 %v2749_v2, 0.0 }
  0xfe   :  { %v8129_v15 = vpop.f32.mrf.mxu0  ;;  %8224 = vmatmul.mubr.msk.bf16.gmra.mxu0 %vm1850_vm1, %v8826_v55  ;;  %v4993_v30 = vmax.f32 %v3813_v17, 0.0  ;;  %v3834_v37 = vadd.f32 %v8397_v19, %v9535_v38  ;;  %v8871_v55 = vld [vmem:[%s11524_s0 + $0x630] sm:$0xff]   ;;  %v5507_v57 = vmin.f32 %v4995_v29, 6.0 }
  0xff   :  { %v5746_v22 = vadd.f32 %v5745_v10, %v5235_v9  ;;  %v4725_v23 = vmax.f32 %v2741_v11, 0.0  ;;  %v2762_v24 = vadd.f32 %v8129_v15, %v9535_v38  ;;  %8227 = vmatprep.mubr.msk.bf16.mxu0 %vm1850_vm1, %v8829_v0  ;;  %v3825_v32 = vpop.f32.mrf.mxu1  ;;  %v5239_v63 = vmin.f32 %v4727_v26, 6.0 }
 0x100   :  { %v2753_v27 = vpop.f32.mrf.mxu0  ;;  %v5505_v44 = vmin.f32 %v4993_v30, 6.0  ;;  %v3826_v45 = vadd.f32 %v9535_v38, %v3825_v32  ;;  %v4998_v2 = vmax.f32 %v3834_v37, 0.0  ;;  %v8834_v32 = vld [vmem:[%s11524_s0 + $0x208] sm:$0xff]  }
 0x101   :  { %v5747_v34 = vadd.f32 %v5746_v22, %v5236_v20  ;;  %v5237_v35 = vmin.f32 %v4725_v23, 6.0  ;;  %v2754_v36 = vadd.f32 %v9535_v38, %v2753_v27  ;;  %v4730_v39 = vmax.f32 %v2762_v24, 0.0  ;;  %v8398_v47 = vpop.f32.mrf.mxu1 }
 0x102   :  { %v8130_v40 = vpop.f32.mrf.mxu0  ;;  %v6061_v58 = vadd.f32 %v5505_v44, %v5504_v28  ;;  %v4996_v59 = vmax.f32 %v3826_v45, 0.0  ;;  %v3837_v60 = vadd.f32 %v8398_v47, %v9535_v38  ;;  %8496 = vmatmul.mubr.msk.bf16.gmra.mxu1 %vm1850_vm1, %v8868_v48  ;;  %v8837_v47 = vld [vmem:[%s11524_s0 + $0x210] sm:$0xff]   ;;  %v8876_v48 = vld [vmem:[%s11524_s0 + $0x640] sm:$0xff]  }
 0x103   :  { %v5748_v50 = vadd.f32 %v5747_v34, %v5237_v35  ;;  %v4728_v51 = vmax.f32 %v2754_v36, 0.0  ;;  %v2765_v52 = vadd.f32 %v8130_v40, %v9535_v38  ;;  %v3828_v61 = vpop.f32.mrf.mxu1  ;;  %v5242_v3 = vmin.f32 %v4730_v39, 6.0  ;;  %8499 = vmatprep.mubr.msk.bf16.mxu1 %vm1850_vm1, %v8871_v55  ;;  %v8872_v40 = vld [vmem:[%s11524_s0 + $0x638] sm:$0xff]  }
 0x104   :  { %v2756_v56 = vpop.f32.mrf.mxu0  ;;  %v6062_v6 = vadd.f32 %v6061_v58, %v5506_v43  ;;  %v5508_v8 = vmin.f32 %v4996_v59, 6.0  ;;  %v3829_v9 = vadd.f32 %v9535_v38, %v3828_v61  ;;  %v4999_v22 = vmax.f32 %v3837_v60, 0.0 }
 0x105   :  { %v5749_v0 = vadd.f32 %v5748_v50, %v5238_v49  ;;  %v2757_v1 = vadd.f32 %v9535_v38, %v2756_v56  ;;  %v8401_v10 = vpop.f32.mrf.mxu1  ;;  %v5240_v11 = vmin.f32 %v4728_v51, 6.0  ;;  %v4731_v15 = vmax.f32 %v2765_v52, 0.0 }
 0x106   :  { %v8133_v5 = vpop.f32.mrf.mxu0  ;;  %8228 = vmatmul.mubr.msk.bf16.gmra.mxu0 %vm1850_vm1, %v8830_v42  ;;  %v6063_v20 = vadd.f32 %v6062_v6, %v5507_v57  ;;  %v4997_v23 = vmax.f32 %v3829_v9, 0.0  ;;  %v3850_v29 = vadd.f32 %v8401_v10, %v9535_v38  ;;  %v5510_v34 = vmin.f32 %v4998_v2, 6.0 }
 0x107   :  { %v5750_v14 = vadd.f32 %v5749_v0, %v5239_v63  ;;  %v4729_v16 = vmax.f32 %v2757_v1, 0.0  ;;  %8231 = vmatprep.mubr.msk.bf16.mxu0 %vm1850_vm1, %v8833_v53  ;;  %v2778_v17 = vadd.f32 %v8133_v5, %v9535_v38  ;;  %v3841_v24 = vpop.f32.mrf.mxu1  ;;  %v5243_v42 = vmin.f32 %v4731_v15, 6.0 }
 0x108   :  { %v2769_v19 = vpop.f32.mrf.mxu0  ;;  %v6064_v35 = vadd.f32 %v6063_v20, %v5508_v8  ;;  %v5509_v36 = vmin.f32 %v4997_v23, 6.0  ;;  %v3842_v37 = vadd.f32 %v9535_v38, %v3841_v24  ;;  %v5511_v50 = vmin.f32 %v4999_v22, 6.0  ;;  %v8838_v23 = vld [vmem:[%s11524_s0 + $0x218] sm:$0xff]  }
 0x109   :  { %v5751_v26 = vadd.f32 %v5750_v14, %v5240_v11  ;;  %v5241_v27 = vmin.f32 %v4729_v16, 6.0  ;;  %v2770_v28 = vadd.f32 %v9535_v38, %v2769_v19  ;;  %v8402_v39 = vpop.f32.mrf.mxu1  ;;  %v4734_v57 = vmax.f32 %v2778_v17, 0.0 }
 0x10a   :  { %v8134_v30 = vpop.f32.mrf.mxu0  ;;  %v6065_v51 = vadd.f32 %v6064_v35, %v5509_v36  ;;  %v5000_v52 = vmax.f32 %v3842_v37, 0.0  ;;  %v3853_v53 = vadd.f32 %v8402_v39, %v9535_v38  ;;  %v5002_v59 = vmax.f32 %v3850_v29, 0.0  ;;  %8500 = vmatmul.mubr.msk.bf16.gmra.mxu1 %vm1850_vm1, %v8872_v40  ;;  %v8841_v36 = vld [vmem:[%s11524_s0 + $0x220] sm:$0xff]   ;;  %v8880_v39 = vld [vmem:[%s11524_s0 + $0x650] sm:$0xff]  }
 0x10b   :  { %v5752_v43 = vadd.f32 %v5751_v26, %v5241_v27  ;;  %v4732_v44 = vmax.f32 %v2770_v28, 0.0  ;;  %v2781_v45 = vadd.f32 %v8134_v30, %v9535_v38  ;;  %v3844_v55 = vpop.f32.mrf.mxu1  ;;  %8503 = vmatprep.mubr.msk.bf16.mxu1 %vm1850_vm1, %v8876_v48  ;;  %v5246_v16 = vmin.f32 %v4734_v57, 6.0  ;;  %v8877_v30 = vld [vmem:[%s11524_s0 + $0x648] sm:$0xff]  }
 0x10c   :  { %v2772_v49 = vpop.f32.mrf.mxu0  ;;  %v6066_v63 = vadd.f32 %v6065_v51, %v5510_v34  ;;  %v5512_v0 = vmin.f32 %v5000_v52, 6.0  ;;  %v3845_v1 = vadd.f32 %v9535_v38, %v3844_v55  ;;  %v5514_v24 = vmin.f32 %v5002_v59, 6.0 }
 0x10d   :  { %v5753_v56 = vadd.f32 %v5752_v43, %v5242_v3  ;;  %v2773_v58 = vadd.f32 %v9535_v38, %v2772_v49  ;;  %v5244_v60 = vmin.f32 %v4732_v44, 6.0  ;;  %v8405_v2 = vpop.f32.mrf.mxu1  ;;  %v4735_v6 = vmax.f32 %v2781_v45, 0.0 }
 0x10e   :  { %v8137_v61 = vpop.f32.mrf.mxu0  ;;  %8232 = vmatmul.mubr.msk.bf16.gmra.mxu0 %vm1850_vm1, %v8834_v32  ;;  %v5003_v3 = vmax.f32 %v3853_v53, 0.0  ;;  %v6067_v10 = vadd.f32 %v6066_v63, %v5511_v50  ;;  %v5001_v11 = vmax.f32 %v3845_v1, 0.0  ;;  %v3866_v14 = vadd.f32 %v8405_v2, %v9535_v38 }
 0x10f   :  { %v5754_v5 = vadd.f32 %v5753_v56, %v5243_v42  ;;  %v4733_v8 = vmax.f32 %v2773_v58, 0.0  ;;  %8235 = vmatprep.mubr.msk.bf16.mxu0 %vm1850_vm1, %v8837_v47  ;;  %v3857_v15 = vpop.f32.mrf.mxu1  ;;  %v5247_v32 = vmin.f32 %v4735_v6, 6.0  ;;  %v2794_v35 = vadd.f32 %v8137_v61, %v9535_v38 }
 0x110   :  { %v2785_v9 = vpop.f32.mrf.mxu0  ;;  %v6068_v26 = vadd.f32 %v6067_v10, %v5512_v0  ;;  %v5513_v27 = vmin.f32 %v5001_v11, 6.0  ;;  %v3858_v28 = vadd.f32 %v9535_v38, %v3857_v15  ;;  %v5515_v37 = vmin.f32 %v5003_v3, 6.0 }
 0x111   :  { %v5755_v17 = vadd.f32 %v5754_v5, %v5244_v60  ;;  %v5245_v19 = vmin.f32 %v4733_v8, 6.0  ;;  %v2786_v20 = vadd.f32 %v9535_v38, %v2785_v9  ;;  %v8406_v29 = vpop.f32.mrf.mxu1  ;;  %v5006_v43 = vmax.f32 %v3866_v14, 0.0  ;;  %v8842_v14 = vld [vmem:[%s11524_s0 + $0x228] sm:$0xff]  }
 0x112   :  { %v8138_v22 = vpop.f32.mrf.mxu0  ;;  %v6069_v42 = vadd.f32 %v6068_v26, %v5513_v27  ;;  %v5004_v44 = vmax.f32 %v3858_v28, 0.0  ;;  %v3869_v45 = vadd.f32 %v8406_v29, %v9535_v38  ;;  %8504 = vmatmul.mubr.msk.bf16.gmra.mxu1 %vm1850_vm1, %v8877_v30  ;;  %v4738_v59 = vmax.f32 %v2794_v35, 0.0  ;;  %v8845_v26 = vld [vmem:[%s11524_s0 + $0x230] sm:$0xff]   ;;  %v8884_v28 = vld [vmem:[%s11524_s0 + $0x660] sm:$0xff]  }
 0x113   :  { %v5756_v34 = vadd.f32 %v5755_v17, %v5245_v19  ;;  %v3860_v47 = vpop.f32.mrf.mxu1  ;;  %v4736_v49 = vmax.f32 %v2786_v20, 0.0  ;;  %v2797_v50 = vadd.f32 %v8138_v22, %v9535_v38  ;;  %8507 = vmatprep.mubr.msk.bf16.mxu1 %vm1850_vm1, %v8880_v39  ;;  %v5518_v63 = vmin.f32 %v5006_v43, 6.0  ;;  %v8881_v20 = vld [vmem:[%s11524_s0 + $0x658] sm:$0xff]  }
 0x114   :  { %v2788_v40 = vpop.f32.mrf.mxu0  ;;  %v6070_v53 = vadd.f32 %v6069_v42, %v5514_v24  ;;  %v5516_v55 = vmin.f32 %v5004_v44, 6.0  ;;  %v3861_v56 = vadd.f32 %v9535_v38, %v3860_v47  ;;  %v5007_v1 = vmax.f32 %v3869_v45, 0.0 }
 0x115   :  { %v5757_v48 = vadd.f32 %v5756_v34, %v5246_v16  ;;  %v2789_v51 = vadd.f32 %v9535_v38, %v2788_v40  ;;  %v8409_v57 = vpop.f32.mrf.mxu1  ;;  %v5248_v6 = vmin.f32 %v4736_v49, 6.0  ;;  %v4739_v8 = vmax.f32 %v2797_v50, 0.0 }
 0x116   :  { %v8141_v52 = vpop.f32.mrf.mxu0  ;;  %8236 = vmatmul.mubr.msk.bf16.gmra.mxu0 %vm1850_vm1, %v8838_v23  ;;  %v6071_v0 = vadd.f32 %v6070_v53, %v5515_v37  ;;  %v5005_v2 = vmax.f32 %v3861_v56, 0.0  ;;  %v5250_v22 = vmin.f32 %v4738_v59, 6.0  ;;  %v3882_v27 = vadd.f32 %v8409_v57, %v9535_v38 }
 0x117   :  { %v9764_v58 = vadd.f32 %v5757_v48, %v5247_v32  ;;  %v4737_v60 = vmax.f32 %v2789_v51, 0.0  ;;  %8239 = vmatprep.mubr.msk.bf16.mxu0 %vm1850_vm1, %v8841_v36  ;;  %v3873_v5 = vpop.f32.mrf.mxu1  ;;  %v2810_v10 = vadd.f32 %v8141_v52, %v9535_v38  ;;  %v5519_v30 = vmin.f32 %v5007_v1, 6.0 }
 0x118   :  { %v2801_v61 = vpop.f32.mrf.mxu0  ;;  %v6072_v15 = vadd.f32 %v6071_v0, %v5516_v55  ;;  %v5517_v16 = vmin.f32 %v5005_v2, 6.0  ;;  %v3874_v17 = vadd.f32 %v9535_v38, %v3873_v5  ;;  %v5251_v36 = vmin.f32 %v4739_v8, 6.0  ;;  %v8846_v2 = vld [vmem:[%s11524_s0 + $0x238] sm:$0xff]  }
 0x119   :  { %v5249_v3 = vmin.f32 %v4737_v60, 6.0  ;;  %v2802_v9 = vadd.f32 %v9535_v38, %v2801_v61  ;;  %v8410_v19 = vpop.f32.mrf.mxu1  ;;  %v4742_v42 = vmax.f32 %v2810_v10, 0.0  ;;  %v5010_v52 = vmax.f32 %v3882_v27, 0.0 }
 0x11a   :  { %v8142_v11 = vpop.f32.mrf.mxu0  ;;  %v6073_v32 = vadd.f32 %v6072_v15, %v5517_v16  ;;  %v5008_v34 = vmax.f32 %v3874_v17, 0.0  ;;  %v3885_v47 = vadd.f32 %v8410_v19, %v9535_v38  ;;  %8508 = vmatmul.mubr.msk.bf16.gmra.mxu1 %vm1850_vm1, %v8881_v20  ;;  %v5759_v59 = vrot.slane %v9764_v58, 4  ;;  %v8849_v15 = vld [vmem:[%s11524_s0 + $0x240] sm:$0xff]   ;;  %v8888_v17 = vld [vmem:[%s11524_s0 + $0x670] sm:$0xff]  }
 0x11b   :  { %v5765_v23 = vadd.f32 %v5249_v3, %v5248_v6  ;;  %v4740_v24 = vmax.f32 %v2802_v9, 0.0  ;;  %v3876_v35 = vpop.f32.mrf.mxu1  ;;  %v2813_v39 = vadd.f32 %v8142_v11, %v9535_v38  ;;  %8511 = vmatprep.mubr.msk.bf16.mxu1 %vm1850_vm1, %v8884_v28  ;;  %v8885_v9 = vld [vmem:[%s11524_s0 + $0x668] sm:$0xff]   ;;  %v5254_v10 = vmin.f32 %v4742_v42, 6.0 }
 0x11c   :  { %v2804_v29 = vpop.f32.mrf.mxu0  ;;  %v6074_v44 = vadd.f32 %v6073_v32, %v5518_v63  ;;  %v5520_v45 = vmin.f32 %v5008_v34, 6.0  ;;  %v3877_v56 = vadd.f32 %v9535_v38, %v3876_v35  ;;  %v5011_v6 = vmax.f32 %v3885_v47, 0.0 }
 0x11d   :  { %v5766_v37 = vadd.f32 %v5765_v23, %v5250_v22  ;;  %v2805_v40 = vadd.f32 %v9535_v38, %v2804_v29  ;;  %v8413_v48 = vpop.f32.mrf.mxu1  ;;  %v5252_v49 = vmin.f32 %v4740_v24, 6.0  ;;  %v4743_v61 = vmax.f32 %v2813_v39, 0.0 }
 0x11e   :  { %v8145_v43 = vpop.f32.mrf.mxu0  ;;  %8240 = vmatmul.mubr.msk.bf16.gmra.mxu0 %vm1850_vm1, %v8842_v14  ;;  %v6075_v55 = vadd.f32 %v6074_v44, %v5519_v30  ;;  %v5009_v8 = vmax.f32 %v3877_v56, 0.0  ;;  %v5522_v16 = vmin.f32 %v5010_v52, 6.0  ;;  %v3898_v30 = vadd.f32 %v8413_v48, %v9535_v38 }
 0x11f   :  { %v5767_v50 = vadd.f32 %v5766_v37, %v5251_v36  ;;  %v4741_v51 = vmax.f32 %v2805_v40, 0.0  ;;  %8243 = vmatprep.mubr.msk.bf16.mxu0 %vm1850_vm1, %v8845_v26  ;;  %v3889_v57 = vpop.f32.mrf.mxu1  ;;  %v2826_v14 = vadd.f32 %v8145_v43, %v9535_v38  ;;  %v5255_v27 = vmin.f32 %v4743_v61, 6.0 }
 0x120   :  { %v2817_v53 = vpop.f32.mrf.mxu0  ;;  %v6076_v5 = vadd.f32 %v6075_v55, %v5520_v45  ;;  %v5521_v23 = vmin.f32 %v5009_v8, 6.0  ;;  %v3890_v24 = vadd.f32 %v9535_v38, %v3889_v57  ;;  %v5523_v34 = vmin.f32 %v5011_v6, 6.0  ;;  %v9831_v6 = vld [vmem:[%s11526_s2] ss:$0 sm:$0xff] }
 0x121   :  { %v5768_v60 = vadd.f32 %v5767_v50, %v5252_v49  ;;  %v5253_v63 = vmin.f32 %v4741_v51, 6.0  ;;  %v2818_v0 = vadd.f32 %v9535_v38, %v2817_v53  ;;  %v8414_v3 = vpop.f32.mrf.mxu1  ;;  %v4746_v39 = vmax.f32 %v2826_v14, 0.0 }
 0x122   :  { %v8146_v1 = vpop.f32.mrf.mxu0  ;;  %v6077_v35 = vadd.f32 %v6076_v5, %v5521_v23  ;;  %v5012_v36 = vmax.f32 %v3890_v24, 0.0  ;;  %8512 = vmatmul.mubr.msk.bf16.gmra.mxu1 %vm1850_vm1, %v8885_v9  ;;  %v9816_v44 = vadd.f32 %v5759_v59, %v9764_v58  ;;  %v5014_v55 = vmax.f32 %v3898_v30, 0.0  ;;  %v8904_v9 = vld [vmem:[%s11527_s3 + $0x30] sm:$0xff]  }
 0x123   :  { %v5769_v11 = vadd.f32 %v5768_v60, %v5253_v63  ;;  %v4744_v19 = vmax.f32 %v2818_v0, 0.0  ;;  %v2829_v20 = vadd.f32 %v8146_v1, %v9535_v38  ;;  %v3892_v26 = vpop.f32.mrf.mxu1  ;;  %8515 = vmatprep.mubr.msk.bf16.mxu1 %vm1850_vm1, %v8888_v17  ;;  %v8850_v60 = vld [vmem:[%s11524_s0 + $0x248] sm:$0xff]   ;;  %v3901_v58 = vadd.f32 %v8414_v3, %v9535_v38  ;;  %v8889_v0 = vld [vmem:[%s11524_s0 + $0x678] sm:$0xff]   ;;  %v8853_v3 = vld [vmem:[%s11524_s0 + $0x250] sm:$0xff]   ;;  %8618 = vmatpush3.bf16.msra.mxu1 %v8904_v9 }
 0x124   :  { %v2820_v22 = vpop.f32.mrf.mxu0  ;;  %v6078_v48 = vadd.f32 %v6077_v35, %v5522_v16  ;;  %v5524_v49 = vmin.f32 %v5012_v36, 6.0  ;;  %v3893_v59 = vadd.f32 %v9535_v38, %v3892_v26  ;;  %v5258_v1 = vmin.f32 %v4746_v39, 6.0  ;;  %8619 = vmatprep.subr.bf16.mxu1 %v11533_v4 }
 0x125   :  { %v5770_v28 = vadd.f32 %v5769_v11, %v5254_v10  ;;  %v2821_v29 = vadd.f32 %v9535_v38, %v2820_v22  ;;  %v8417_v37 = vpop.f32.mrf.mxu1  ;;  %v5256_v40 = vmin.f32 %v4744_v19, 6.0  ;;  %v4747_v45 = vmax.f32 %v2829_v20, 0.0 }
 0x126   :  { %v8149_v32 = vpop.f32.mrf.mxu0  ;;  %8244 = vmatmul.mubr.msk.bf16.gmra.mxu0 %vm1850_vm1, %v8846_v2  ;;  %v6079_v61 = vadd.f32 %v6078_v48, %v5523_v34  ;;  %v5761_v10 = vrot.slane %v9816_v44, 2  ;;  %v5013_v16 = vmax.f32 %v3893_v59, 0.0  ;;  %v3914_v23 = vadd.f32 %v9831_v6, %v8417_v37 }
 0x127   :  { %v5771_v42 = vadd.f32 %v5770_v28, %v5255_v27  ;;  %v4745_v43 = vmax.f32 %v2821_v29, 0.0  ;;  %8247 = vmatprep.mubr.msk.bf16.mxu0 %vm1850_vm1, %v8849_v15  ;;  %v3905_v50 = vpop.f32.mrf.mxu1  ;;  %v2842_v56 = vadd.f32 %v8149_v32, %v9535_v38  ;;  %v5015_v15 = vmax.f32 %v3901_v58, 0.0 }
 0x128   :  { %v2833_v47 = vpop.f32.mrf.mxu0  ;;  %v6080_v14 = vadd.f32 %v6079_v61, %v5524_v49  ;;  %v5259_v19 = vmin.f32 %v4747_v45, 6.0  ;;  %v5526_v27 = vmin.f32 %v5014_v55, 6.0  ;;  %v5525_v28 = vmin.f32 %v5013_v16, 6.0  ;;  %v8893_v61 = vld [vmem:[%s11524_s0 + $0x688] sm:$0xff]  }
 0x129   :  { %v5772_v51 = vadd.f32 %v5771_v42, %v5256_v40  ;;  %v5257_v52 = vmin.f32 %v4745_v43, 6.0  ;;  %v2834_v53 = vadd.f32 %v9535_v38, %v2833_v47  ;;  %v8418_v63 = vpop.f32.mrf.mxu1  ;;  %v8892_v38 = vld [vmem:[%s11524_s0 + $0x680] sm:$0xff]   ;;  %v4750_v24 = vmax.f32 %v2842_v56, 0.0 }
 0x12a   :  { %v8150_v57 = vpop.f32.mrf.mxu0  ;;  %v3906_v29 = vadd.f32 %v9831_v6, %v3905_v50  ;;  %8516 = vmatmul.mubr.msk.bf16.gmra.mxu1 %vm1850_vm1, %v8889_v0  ;;  %v5527_v39 = vmin.f32 %v5015_v15, 6.0  ;;  %v6081_v40 = vadd.f32 %v6080_v14, %v5525_v28  ;;  %v3917_v43 = vadd.f32 %v9831_v6, %v8418_v63  ;;  %v8857_v0 = vld [vmem:[%s11524_s0 + $0x260] sm:$0xff]  }
 0x12b   :  { %v5773_v2 = vadd.f32 %v5772_v51, %v5257_v52  ;;  %v4748_v5 = vmax.f32 %v2834_v53, 0.0  ;;  %v2845_v8 = vadd.f32 %v9831_v6, %v8150_v57  ;;  %v3908_v17 = vpop.f32.mrf.mxu1  ;;  %8519 = vmatprep.mubr.msk.bf16.mxu1 %vm1850_vm1, %v8892_v38  ;;  %v5018_v50 = vmax.f32 %v3914_v23, 0.0  ;;  %v8854_v53 = vld [vmem:[%s11524_s0 + $0x258] sm:$0xff]  }
 0x12c   :  { %v2836_v11 = vpop.f32.mrf.mxu0  ;;  %v5016_v42 = vmax.f32 %v3906_v29, 0.0  ;;  %v6082_v55 = vadd.f32 %v6081_v40, %v5526_v27  ;;  %v3909_v57 = vadd.f32 %v9831_v6, %v3908_v17  ;;  %v5262_v58 = vmin.f32 %v4750_v24, 6.0 }
 0x12d   :  { %v5774_v20 = vadd.f32 %v5773_v2, %v5258_v1  ;;  %v2837_v22 = vadd.f32 %v9831_v6, %v2836_v11  ;;  %v8421_v30 = vpop.f32.mrf.mxu1  ;;  %v5260_v32 = vmin.f32 %v4748_v5, 6.0  ;;  %v4751_v35 = vmax.f32 %v2845_v8, 0.0  ;;  %v8896_v2 = vld [vmem:[%s11524_s0 + $0x690] sm:$0xff]  }
 0x12e   :  { %v8153_v26 = vpop.f32.mrf.mxu0  ;;  %8248 = vmatmul.mubr.msk.bf16.gmra.mxu0 %vm1850_vm1, %v8850_v60  ;;  %v5528_v56 = vmin.f32 %v5016_v42, 6.0  ;;  %v5019_v1 = vmax.f32 %v3917_v43, 0.0  ;;  %v6083_v38 = vadd.f32 %v6082_v55, %v5527_v39  ;;  %v5017_v9 = vmax.f32 %v3909_v57, 0.0  ;;  %v8897_v55 = vld [vmem:[%s11524_s0 + $0x698] sm:$0xff]  }
 0x12f   :  { %v5775_v34 = vadd.f32 %v5774_v20, %v5259_v19  ;;  %v4749_v36 = vmax.f32 %v2837_v22, 0.0  ;;  %8251 = vmatprep.mubr.msk.bf16.mxu0 %vm1850_vm1, %v8853_v3  ;;  %v3921_v45 = vpop.f32.mrf.mxu1  ;;  %v2858_v51 = vadd.f32 %v9831_v6, %v8153_v26  ;;  %v5263_v5 = vmin.f32 %v4751_v35, 6.0 }
 0x130   :  { %v2849_v37 = vpop.f32.mrf.mxu0  ;;  %v5530_v16 = vmin.f32 %v5018_v50, 6.0  ;;  %v3930_v17 = vadd.f32 %v9831_v6, %v8421_v30  ;;  %v6084_v22 = vadd.f32 %v6083_v38, %v5528_v56  ;;  %v5529_v23 = vmin.f32 %v5017_v9, 6.0 }
 0x131   :  { %v5776_v47 = vadd.f32 %v5775_v34, %v5260_v32  ;;  %v5261_v48 = vmin.f32 %v4749_v36, 6.0  ;;  %v2850_v49 = vadd.f32 %v9831_v6, %v2849_v37  ;;  %v8422_v60 = vpop.f32.mrf.mxu1  ;;  %v4754_v19 = vmax.f32 %v2858_v51, 0.0 }
 0x132   :  { %v8154_v52 = vpop.f32.mrf.mxu0  ;;  %v3922_v24 = vadd.f32 %v9831_v6, %v3921_v45  ;;  %8520 = vmatmul.mubr.msk.bf16.gmra.mxu1 %vm1850_vm1, %v8893_v61  ;;  %v5531_v32 = vmin.f32 %v5019_v1, 6.0  ;;  %v6085_v35 = vadd.f32 %v6084_v22, %v5529_v23  ;;  %v3933_v37 = vadd.f32 %v9831_v6, %v8422_v60  ;;  %v8900_v61 = vld [vmem:[%s11524_s0 + $0x6a0] sm:$0xff]  }
 0x133   :  { %v5777_v59 = vadd.f32 %v5776_v47, %v5261_v48  ;;  %v4752_v63 = vmax.f32 %v2850_v49, 0.0  ;;  %v2861_v8 = vadd.f32 %v9831_v6, %v8154_v52  ;;  %v3924_v11 = vpop.f32.mrf.mxu1  ;;  %8523 = vmatprep.mubr.msk.bf16.mxu1 %vm1850_vm1, %v8896_v2  ;;  %v5022_v45 = vmax.f32 %v3930_v17, 0.0  ;;  %v8858_v49 = vld [vmem:[%s11524_s0 + $0x268] sm:$0xff]  }
 0x134   :  { %v2852_v3 = vpop.f32.mrf.mxu0  ;;  %v5020_v36 = vmax.f32 %v3922_v24, 0.0  ;;  %v9881_v47 = vadd.f32 %v5761_v10, %v9816_v44  ;;  %v6086_v50 = vadd.f32 %v6085_v35, %v5530_v16  ;;  %v3925_v52 = vadd.f32 %v9831_v6, %v3924_v11  ;;  %v8861_v10 = vld [vmem:[%s11524_s0 + $0x270] sm:$0xff]  }
 0x135   :  { %v5778_v14 = vadd.f32 %v5777_v59, %v5262_v58  ;;  %v2853_v15 = vadd.f32 %v9831_v6, %v2852_v3  ;;  %v8425_v26 = vpop.f32.mrf.mxu1  ;;  %v5264_v27 = vmin.f32 %v4752_v63, 6.0  ;;  %v4755_v30 = vmax.f32 %v2861_v8, 0.0 }
 0x136   :  { %v8157_v20 = vpop.f32.mrf.mxu0  ;;  %8252 = vmatmul.mubr.msk.bf16.gmra.mxu0 %vm1850_vm1, %v8854_v53  ;;  %v5532_v51 = vmin.f32 %v5020_v36, 6.0  ;;  %v5266_v56 = vmin.f32 %v4754_v19, 6.0  ;;  %v6087_v63 = vadd.f32 %v6086_v50, %v5531_v32  ;;  %v5021_v1 = vmax.f32 %v3925_v52, 0.0 }
 0x137   :  { %v5779_v28 = vadd.f32 %v5778_v14, %v5263_v5  ;;  %v4753_v29 = vmax.f32 %v2853_v15, 0.0  ;;  %8255 = vmatprep.mubr.msk.bf16.mxu0 %vm1850_vm1, %v8857_v0  ;;  %v3937_v39 = vpop.f32.mrf.mxu1  ;;  %v2874_v60 = vadd.f32 %v9831_v6, %v8157_v20  ;;  %v5267_v58 = vmin.f32 %v4755_v30, 6.0 }
 0x138   :  { %v2865_v34 = vpop.f32.mrf.mxu0  ;;  %v5023_v0 = vmax.f32 %v3933_v37, 0.0  ;;  %v5534_v38 = vmin.f32 %v5022_v45, 6.0  ;;  %v6088_v11 = vadd.f32 %v6087_v63, %v5532_v51  ;;  %v5533_v14 = vmin.f32 %v5021_v1, 6.0 }
 0x139   :  { %v5780_v40 = vadd.f32 %v5779_v28, %v5264_v27  ;;  %v5265_v42 = vmin.f32 %v4753_v29, 6.0  ;;  %v2866_v43 = vadd.f32 %v9831_v6, %v2865_v34  ;;  %v8426_v53 = vpop.f32.mrf.mxu1  ;;  %v3946_v15 = vadd.f32 %v9831_v6, %v8425_v26 }
 0x13a   :  { %v8158_v48 = vpop.f32.mrf.mxu0  ;;  %v3938_v16 = vadd.f32 %v9831_v6, %v3937_v39  ;;  %8524 = vmatmul.mubr.msk.bf16.gmra.mxu1 %vm1850_vm1, %v8897_v55  ;;  %v4758_v19 = vmax.f32 %v2874_v60, 0.0  ;;  %v5535_v27 = vmin.f32 %v5023_v0, 6.0  ;;  %v6089_v28 = vadd.f32 %v6088_v11, %v5533_v14  ;;  %v8865_v55 = vld [vmem:[%s11524_s0 + $0x280] sm:$0xff]  }
 0x13b   :  { %v5781_v57 = vadd.f32 %v5780_v40, %v5265_v42  ;;  %v4756_v44 = vmax.f32 %v2866_v43, 0.0  ;;  %v3940_v2 = vpop.f32.mrf.mxu1  ;;  %v2877_v8 = vadd.f32 %v9831_v6, %v8158_v48  ;;  %8527 = vmatprep.mubr.msk.bf16.mxu1 %vm1850_vm1, %v8900_v61  ;;  %v3949_v32 = vadd.f32 %v9831_v6, %v8426_v53  ;;  %v8862_v40 = vld [vmem:[%s11524_s0 + $0x278] sm:$0xff]  }
 0x13c   :  { %v2868_v59 = vpop.f32.mrf.mxu0  ;;  %v5024_v29 = vmax.f32 %v3938_v16, 0.0  ;;  %v5763_v37 = vrot.slane %v9881_v47, 1  ;;  %v6090_v42 = vadd.f32 %v6089_v28, %v5534_v38  ;;  %v5026_v43 = vmax.f32 %v3946_v15, 0.0 }
 0x13d   :  { %v5782_v5 = vadd.f32 %v5781_v57, %v5266_v56  ;;  %v2869_v3 = vadd.f32 %v9831_v6, %v2868_v59  ;;  %v8429_v17 = vpop.f32.mrf.mxu1  ;;  %v5268_v20 = vmin.f32 %v4756_v44, 6.0  ;;  %v4759_v34 = vmax.f32 %v2877_v8, 0.0  ;;  %v8905_v56 = vld [vmem:[%s11524_s0 + $0x6b0] sm:$0xff]  }
 0x13e   :  { %v8161_v9 = vpop.f32.mrf.mxu0  ;;  %8256 = vmatmul.mubr.msk.bf16.gmra.mxu0 %vm1850_vm1, %v8858_v49  ;;  %v3941_v45 = vadd.f32 %v9831_v6, %v3940_v2  ;;  %v8901_v49 = vld [vmem:[%s11524_s0 + $0x6a8] sm:$0xff]   ;;  %v5270_v50 = vmin.f32 %v4758_v19, 6.0  ;;  %v9922_v60 = vadd.f32 %v6090_v42, %v5535_v27  ;;  %v5536_v44 = vmin.f32 %v5024_v29, 6.0 }
 0x13f   :  { %v5783_v22 = vadd.f32 %v5782_v5, %v5267_v58  ;;  %v4757_v23 = vmax.f32 %v2869_v3, 0.0  ;;  %8259 = vmatprep.mubr.msk.bf16.mxu0 %vm1850_vm1, %v8861_v10  ;;  %v3953_v26 = vpop.f32.mrf.mxu1  ;;  %v2890_v52 = vadd.f32 %v9831_v6, %v8161_v9  ;;  %v5027_v10 = vmax.f32 %v3949_v32, 0.0 }
 0x140   :  { %v2881_v24 = vpop.f32.mrf.mxu0  ;;  %11543 = vst [vmem:[#allocation9_spill] sm:$0xff] %v9922_v60  ;;  %v5025_v61 = vmax.f32 %v3941_v45, 0.0  ;;  %v5271_v59 = vmin.f32 %v4759_v34, 6.0  ;;  %v5764_v2 = vadd.f32 %v5763_v37, %v9881_v47  ;;  %v5538_v8 = vmin.f32 %v5026_v43, 6.0  ;;  %v8866_v34 = vld [vmem:[%s11524_s0 + $0x288] sm:$0xff]   ;;  %v8869_v45 = vld [vmem:[%s11524_s0 + $0x290] sm:$0xff]  }
 0x141   :  { %v5784_v30 = vadd.f32 %v5783_v22, %v5268_v20  ;;  %v5269_v35 = vmin.f32 %v4757_v23, 6.0  ;;  %v2882_v36 = vadd.f32 %v9831_v6, %v2881_v24  ;;  %v8430_v48 = vpop.f32.mrf.mxu1  ;;  %v3954_v38 = vadd.f32 %v9831_v6, %v3953_v26 }
 0x142   :  { %v8162_v39 = vpop.f32.mrf.mxu0  ;;  %v5537_v3 = vmin.f32 %v5025_v61, 6.0  ;;  %8528 = vmatmul.mubr.msk.bf16.gmra.mxu1 %vm1850_vm1, %v8901_v49  ;;  %v4762_v11 = vmax.f32 %v2890_v52, 0.0  ;;  %v5539_v19 = vmin.f32 %v5027_v10, 6.0  ;;  %v3962_v22 = vadd.f32 %v9831_v6, %v8429_v17  ;;  %v8906_v17 = vld [vmem:[%s11524_s0 + $0x6b8] sm:$0xff]   ;;  %v8909_v49 = vld [vmem:[%s11524_s0 + $0x6c0] sm:$0xff]  }
 0x143   :  { %v5785_v51 = vadd.f32 %v5784_v30, %v5269_v35  ;;  %v4760_v53 = vmax.f32 %v2882_v36, 0.0  ;;  %v3956_v58 = vpop.f32.mrf.mxu1  ;;  %v2893_v0 = vadd.f32 %v9831_v6, %v8162_v39  ;;  %8531 = vmatprep.mubr.msk.bf16.mxu1 %vm1850_vm1, %v8905_v56  ;;  %v5028_v23 = vmax.f32 %v3954_v38, 0.0 }
 0x144   :  { %v2884_v57 = vpop.f32.mrf.mxu0  ;;  %v6098_v20 = vadd.f32 %v5537_v3, %v5536_v44  ;;  %v6321_v39 = vmul.f32 0.00390625, %v5764_v2 }
 0x145   :  { %v5786_v63 = vadd.f32 %v5785_v51, %v5270_v50  ;;  %v2885_v1 = vadd.f32 %v9831_v6, %v2884_v57  ;;  %v9929_v9 = vpop.f32.mrf.mxu1  ;;  %v5272_v14 = vmin.f32 %v4760_v53, 6.0  ;;  %v4763_v28 = vmax.f32 %v2893_v0, 0.0 }
 0x146   :  { %v8165_v5 = vpop.f32.mrf.mxu0  ;;  %8260 = vmatmul.mubr.msk.bf16.gmra.mxu0 %vm1850_vm1, %v8862_v40  ;;  %v6099_v35 = vadd.f32 %v6098_v20, %v5538_v8  ;;  %v5540_v36 = vmin.f32 %v5028_v23, 6.0  ;;  %v5274_v40 = vmin.f32 %v4762_v11, 6.0  ;;  %v5030_v51 = vmax.f32 %v3962_v22, 0.0 }
 0x147   :  { %v5787_v15 = vadd.f32 %v5786_v63, %v5271_v59  ;;  %v4761_v16 = vmax.f32 %v2885_v1, 0.0  ;;  %8263 = vmatprep.mubr.msk.bf16.mxu0 %vm1850_vm1, %v8865_v55  ;;  %v3969_v24 = vpop.f32.mrf.mxu1  ;;  %v2906_v26 = vadd.f32 %v9831_v6, %v8165_v5  ;;  %v3965_v53 = vadd.f32 %v9831_v6, %v8430_v48 }
 0x148   :  { %v2897_v47 = vpop.f32.mrf.mxu0  ;;  %v6100_v52 = vadd.f32 %v6099_v35, %v5539_v19  ;;  %v3957_v55 = vadd.f32 %v9831_v6, %v3956_v58  ;;  %v5275_v57 = vmin.f32 %v4763_v28, 6.0  ;;  %v6337_v38 = vpack.c.bf16 %v6321_v39, %v6321_v39 }
 0x149   :  { %v5788_v27 = vadd.f32 %v5787_v15, %v5272_v14  ;;  %v5273_v29 = vmin.f32 %v4761_v16, 6.0  ;;  %v2898_v32 = vadd.f32 %v9831_v6, %v2897_v47  ;;  %v9940_v37 = vpop.f32.mrf.mxu1  ;;  %v4766_v59 = vmax.f32 %v2906_v26, 0.0 }
 0x14a   :  { %v8166_v30 = vpop.f32.mrf.mxu0  ;;  %v6101_v0 = vadd.f32 %v6100_v52, %v5540_v36  ;;  %v5031_v1 = vmax.f32 %v3965_v53, 0.0  ;;  %v5029_v2 = vmax.f32 %v3957_v55, 0.0  ;;  %8532 = vmatmul.mubr.msk.bf16.gmra.mxu1 %vm1850_vm1, %v8906_v17  ;;  %v5542_v14 = vmin.f32 %v5030_v51, 6.0 }
 0x14b   :  { %v5789_v42 = vadd.f32 %v5788_v27, %v5273_v29  ;;  %v4764_v43 = vmax.f32 %v2898_v32, 0.0  ;;  %v9953_v56 = vpop.f32.mrf.mxu1  ;;  %v2909_v10 = vadd.f32 %v9831_v6, %v8166_v30  ;;  %8535 = vmatprep.mubr.msk.bf16.mxu1 %vm1850_vm1, %v8909_v49  ;;  %v8870_v27 = vld [vmem:[%s11524_s0 + $0x298] sm:$0xff]   ;;  %v3978_v32 = vadd.f32 %v9831_v6, %v9929_v9  ;;  %v8913_v9 = vld [vmem:[%s11524_s0 + $0x6d0] sm:$0xff]  }
 0x14c   :  { %v2900_v50 = vpop.f32.mrf.mxu0  ;;  %v5541_v15 = vmin.f32 %v5029_v2, 6.0  ;;  %v5543_v28 = vmin.f32 %v5031_v1, 6.0  ;;  %v3970_v26 = vadd.f32 %v9831_v6, %v3969_v24  ;;  %v5278_v35 = vmin.f32 %v4766_v59, 6.0 }
 0x14d   :  { %v5790_v44 = vadd.f32 %v5789_v42, %v5274_v40  ;;  %v2901_v61 = vadd.f32 %v9831_v6, %v2900_v50  ;;  %v9958_v5 = vpop.f32.mrf.mxu1  ;;  %v5276_v48 = vmin.f32 %v4764_v43, 6.0  ;;  %v4767_v19 = vmax.f32 %v2909_v10, 0.0  ;;  %v8874_v40 = vld [vmem:[%s11524_s0 + $0x2a0] sm:$0xff]  }
 0x14e   :  { %v8169_v63 = vpop.f32.mrf.mxu0  ;;  %8264 = vmatmul.mubr.msk.bf16.gmra.mxu0 %vm1850_vm1, %v8866_v34  ;;  %v6102_v29 = vadd.f32 %v6101_v0, %v5541_v15  ;;  %v8910_v34 = vld [vmem:[%s11524_s0 + $0x6c8] sm:$0xff]   ;;  %v9985_v50 = vunpack.c.l.b16 %v6337_v38 }
 0x14f   :  { %v5791_v58 = vadd.f32 %v5790_v44, %v5275_v57  ;;  %v4765_v8 = vmax.f32 %v2901_v61, 0.0  ;;  %v2922_v3 = vadd.f32 %v9831_v6, %v8169_v63  ;;  %8267 = vmatprep.mubr.msk.bf16.mxu0 %vm1850_vm1, %v8869_v45  ;;  %v3985_v16 = vpop.f32.mrf.mxu1  ;;  %v5032_v45 = vmax.f32 %v3970_v26, 0.0 }
 0x150   :  { %v2913_v11 = vpop.f32.mrf.mxu0  ;;  %v6103_v43 = vadd.f32 %v6102_v29, %v5542_v14  ;;  %v5279_v51 = vmin.f32 %v4767_v19, 6.0  ;;  %v5034_v57 = vmax.f32 %v3978_v32, 0.0  ;;  %v3981_v61 = vadd.f32 %v9831_v6, %v9940_v37  ;;  %v8914_v29 = vld [vmem:[%s11524_s0 + $0x6d8] sm:$0xff]  }
 0x151   :  { %v5792_v47 = vadd.f32 %v5791_v58, %v5276_v48  ;;  %v5277_v20 = vmin.f32 %v4765_v8, 6.0  ;;  %v2914_v22 = vadd.f32 %v9831_v6, %v2913_v11  ;;  %v9971_v30 = vpop.f32.mrf.mxu1  ;;  %v4770_v17 = vmax.f32 %v2922_v3, 0.0 }
 0x152   :  { %v8170_v23 = vpop.f32.mrf.mxu0  ;;  %v5544_v44 = vmin.f32 %v5032_v45, 6.0  ;;  %v6104_v10 = vadd.f32 %v6103_v43, %v5543_v28  ;;  %8536 = vmatmul.mubr.msk.bf16.gmra.mxu1 %vm1850_vm1, %v8910_v34  ;;  %v3973_v37 = vadd.f32 %v9831_v6, %v9953_v56  ;;  %v3986_v28 = vadd.f32 %v9831_v6, %v3985_v16 }
 0x153   :  { %v5793_v36 = vadd.f32 %v5792_v47, %v5277_v20  ;;  %v2925_v39 = vadd.f32 %v9831_v6, %v8170_v23  ;;  %v4768_v24 = vmax.f32 %v2914_v22, 0.0  ;;  %v9983_v49 = vpop.f32.mrf.mxu1  ;;  %v5282_v0 = vmin.f32 %v4770_v17, 6.0  ;;  %8539 = vmatprep.mubr.msk.bf16.mxu1 %vm1850_vm1, %v8913_v9  ;;  %v8875_v20 = vld [vmem:[%s11524_s0 + $0x2a8] sm:$0xff]  }
 0x154   :  { %v2916_v42 = vpop.f32.mrf.mxu0  ;;  %v6105_v3 = vadd.f32 %v6104_v10, %v5544_v44  ;;  %v5035_v47 = vmax.f32 %v3981_v61, 0.0  ;;  %v5546_v22 = vmin.f32 %v5034_v57, 6.0  ;;  %v5033_v23 = vmax.f32 %v3973_v37, 0.0 }
 0x155   :  { %v5794_v52 = vadd.f32 %v5793_v36, %v5278_v35  ;;  %v2917_v53 = vadd.f32 %v9831_v6, %v2916_v42  ;;  %v9991_v59 = vpop.f32.mrf.mxu1  ;;  %v4771_v1 = vmax.f32 %v2925_v39, 0.0  ;;  %v5280_v48 = vmin.f32 %v4768_v24, 6.0  ;;  %v8878_v36 = vld [vmem:[%s11524_s0 + $0x2b0] sm:$0xff]  }
 0x156   :  { %v8173_v55 = vpop.f32.mrf.mxu0  ;;  %8268 = vmatmul.mubr.msk.bf16.gmra.mxu0 %vm1850_vm1, %v8870_v27  ;;  %v3994_v27 = vadd.f32 %v9831_v6, %v9958_v5  ;;  %v8917_v5 = vld [vmem:[%s11524_s0 + $0x6e0] sm:$0xff]   ;;  %v5036_v9 = vmax.f32 %v3986_v28, 0.0  ;;  %v3997_v44 = vadd.f32 %v9831_v6, %v9971_v30  ;;  %v3989_v30 = vadd.f32 %v9831_v6, %v9983_v49  ;;  %v8918_v49 = vld [vmem:[%s11524_s0 + $0x6e8] sm:$0xff]  }
 0x157   :  { %v5795_v63 = vadd.f32 %v5794_v52, %v5279_v51  ;;  %v4769_v2 = vmax.f32 %v2917_v53, 0.0  ;;  %8271 = vmatprep.mubr.msk.bf16.mxu0 %vm1850_vm1, %v8874_v40  ;;  %v2938_v58 = vadd.f32 %v9831_v6, %v8173_v55  ;;  %v9999_v38 = vpop.f32.mrf.mxu1  ;;  %v5283_v26 = vmin.f32 %v4771_v1, 6.0 }
 0x158   :  { %v2929_v8 = vpop.f32.mrf.mxu0  ;;  %v5545_v40 = vmin.f32 %v5033_v23, 6.0  ;;  %v5547_v51 = vmin.f32 %v5035_v47, 6.0  ;;  %v5038_v57 = vmax.f32 %v3994_v27, 0.0  ;;  %v5037_v27 = vmax.f32 %v3989_v30, 0.0 }
 0x159   :  { %v5796_v11 = vrot.slane %v5795_v63, 4  ;;  %v5281_v14 = vmin.f32 %v4769_v2, 6.0  ;;  %v2930_v15 = vadd.f32 %v9831_v6, %v2929_v8  ;;  %v10008_v56 = vpop.f32.mrf.mxu1  ;;  %v4774_v17 = vmax.f32 %v2938_v58, 0.0 }
 0x15a   :  { %v8174_v19 = vpop.f32.mrf.mxu0  ;;  %v6106_v55 = vadd.f32 %v6105_v3, %v5545_v40  ;;  %8540 = vmatmul.mubr.msk.bf16.gmra.mxu1 %vm1850_vm1, %v8914_v29  ;;  %v5548_v8 = vmin.f32 %v5036_v9, 6.0  ;;  %v5549_v40 = vmin.f32 %v5037_v27, 6.0  ;;  %v4013_v27 = vadd.f32 %v9831_v6, %v10008_v56  ;;  %v8925_v56 = vld [vmem:[%s11524_s0 + $0x700] sm:$0xff]  }
 0x15b   :  { %v5797_v32 = vadd.f32 %v5796_v11, %v5795_v63  ;;  %v5802_v34 = vadd.f32 %v5281_v14, %v5280_v48  ;;  %v4772_v35 = vmax.f32 %v2930_v15, 0.0  ;;  %v2941_v16 = vadd.f32 %v9831_v6, %v8174_v19  ;;  %v10020_v24 = vpop.f32.mrf.mxu1  ;;  %8543 = vmatprep.mubr.msk.bf16.mxu1 %vm1850_vm1, %v8917_v5 }
 0x15c   :  { %v2932_v39 = vpop.f32.mrf.mxu0  ;;  %v5286_v2 = vmin.f32 %v4774_v17, 6.0  ;;  %v6107_v58 = vadd.f32 %v6106_v55, %v5546_v22  ;;  %v5039_v22 = vmax.f32 %v3997_v44, 0.0  ;;  %v4002_v44 = vadd.f32 %v9831_v6, %v9999_v38 }
 0x15d   :  { %v5798_v42 = vrot.slane %v5797_v32, 2  ;;  %v5803_v43 = vadd.f32 %v5802_v34, %v5282_v0  ;;  %v2933_v45 = vadd.f32 %v9831_v6, %v2932_v39  ;;  %v5284_v52 = vmin.f32 %v4772_v35, 6.0  ;;  %v10026_v10 = vpop.f32.mrf.mxu1  ;;  %v8882_v34 = vld [vmem:[%s11524_s0 + $0x2c0] sm:$0xff]  }
 0x15e   :  { %v8177_v53 = vpop.f32.mrf.mxu0  ;;  %8272 = vmatmul.mubr.msk.bf16.gmra.mxu0 %vm1850_vm1, %v8875_v20  ;;  %v4775_v1 = vmax.f32 %v2941_v16, 0.0  ;;  %v8879_v20 = vld [vmem:[%s11524_s0 + $0x2b8] sm:$0xff]   ;;  %v6108_v23 = vadd.f32 %v6107_v58, %v5547_v51  ;;  %v5550_v35 = vmin.f32 %v5038_v57, 6.0  ;;  %v4010_v57 = vadd.f32 %v9831_v6, %v9991_v59 }
 0x15f   :  { %v5799_v61 = vadd.f32 %v5798_v42, %v5797_v32  ;;  %v5804_v63 = vadd.f32 %v5803_v43, %v5283_v26  ;;  %v4773_v0 = vmax.f32 %v2933_v45, 0.0  ;;  %8275 = vmatprep.mubr.msk.bf16.mxu0 %vm1850_vm1, %v8878_v36  ;;  %v10033_v3 = vpop.f32.mrf.mxu1  ;;  %v2954_v15 = vadd.f32 %v9831_v6, %v8177_v53  ;;  %v8921_v36 = vld [vmem:[%s11524_s0 + $0x6f0] sm:$0xff]  }
 0x160   :  { %v2945_v48 = vpop.f32.mrf.mxu0  ;;  %v5287_v32 = vmin.f32 %v4775_v1, 6.0  ;;  %v6109_v39 = vadd.f32 %v6108_v23, %v5548_v8  ;;  %v5551_v53 = vmin.f32 %v5039_v22, 6.0  ;;  %v5040_v30 = vmax.f32 %v4002_v44, 0.0 }
 0x161   :  { %v5800_v37 = vrot.slane %v5799_v61, 1  ;;  %v5805_v11 = vadd.f32 %v5804_v63, %v5284_v52  ;;  %v5285_v14 = vmin.f32 %v4773_v0, 6.0  ;;  %v2946_v47 = vadd.f32 %v9831_v6, %v2945_v48  ;;  %v10040_v28 = vpop.f32.mrf.mxu1 }
 0x162   :  { %v8178_v19 = vpop.f32.mrf.mxu0  ;;  %v4778_v45 = vmax.f32 %v2954_v15, 0.0  ;;  %v6110_v55 = vadd.f32 %v6109_v39, %v5549_v40  ;;  %8544 = vmatmul.mubr.msk.bf16.gmra.mxu1 %vm1850_vm1, %v8918_v49  ;;  %v5552_v23 = vmin.f32 %v5040_v30, 6.0  ;;  %v4005_v39 = vadd.f32 %v9831_v6, %v10020_v24 }
 0x163   :  { %v5801_v29 = vadd.f32 %v5800_v37, %v5799_v61  ;;  %v5806_v26 = vadd.f32 %v5805_v11, %v5285_v14  ;;  %v4776_v5 = vmax.f32 %v2946_v47, 0.0  ;;  %v2957_v17 = vadd.f32 %v9831_v6, %v8178_v19  ;;  %v10052_v9 = vpop.f32.mrf.mxu1  ;;  %8547 = vmatprep.mubr.msk.bf16.mxu1 %vm1850_vm1, %v8921_v36  ;;  %v8886_v36 = vld [vmem:[%s11524_s0 + $0x2d0] sm:$0xff]  }
 0x164   :  { %v2948_v16 = vpop.f32.mrf.mxu0  ;;  %v6111_v59 = vadd.f32 %v6110_v55, %v5550_v35  ;;  %v5290_v47 = vmin.f32 %v4778_v45, 6.0  ;;  %v5041_v55 = vmax.f32 %v4005_v39, 0.0  ;;  %v4018_v44 = vadd.f32 %v9831_v6, %v10033_v3 }
 0x165   :  { %v6322_v42 = vmul.f32 0.00390625, %v5801_v29  ;;  %v5807_v43 = vadd.f32 %v5806_v26, %v5286_v2  ;;  %v2949_v51 = vadd.f32 %v9831_v6, %v2948_v16  ;;  %v10060_v61 = vpop.f32.mrf.mxu1  ;;  %v5288_v1 = vmin.f32 %v4776_v5, 6.0  ;;  %v8922_v29 = vld [vmem:[%s11524_s0 + $0x6f8] sm:$0xff]   ;;  %v8933_v5 = vld [vmem:[%s11527_s3 + $0x28] sm:$0xff]  }
 0x166   :  { %v8181_v52 = vpop.f32.mrf.mxu0  ;;  %8276 = vmatmul.mubr.msk.bf16.gmra.mxu0 %vm1850_vm1, %v8879_v20  ;;  %v4779_v48 = vmax.f32 %v2957_v17, 0.0  ;;  %v8883_v20 = vld [vmem:[%s11524_s0 + $0x2c8] sm:$0xff]   ;;  %v6112_v22 = vadd.f32 %v6111_v59, %v5551_v53  ;;  %v5042_v16 = vmax.f32 %v4010_v57, 0.0  ;;  %8620 = vmatpush3.bf16.msra.mxu1 %v8933_v5  ;;  %v5043_v53 = vmax.f32 %v4013_v27, 0.0 }
 0x167   :  { %v6338_v63 = vpack.c.bf16 %v6322_v42, %v6322_v42  ;;  %v5808_v0 = vadd.f32 %v5807_v43, %v5287_v32  ;;  %v4777_v2 = vmax.f32 %v2949_v51, 0.0  ;;  %8279 = vmatprep.mubr.msk.bf16.mxu0 %vm1850_vm1, %v8882_v34  ;;  %v2970_v58 = vadd.f32 %v9831_v6, %v8181_v52  ;;  %v10066_v37 = vpop.f32.mrf.mxu1  ;;  %8621 = vmatprep.subr.bf16.mxu1 %v11533_v4  ;;  %v8926_v27 = vld [vmem:[%s11524_s0 + $0x708] sm:$0xff]  }
 0x168   :  { %v2961_v8 = vpop.f32.mrf.mxu0  ;;  %v5291_v42 = vmin.f32 %v4779_v48, 6.0  ;;  %v4026_v57 = vadd.f32 %v9831_v6, %v10026_v10  ;;  %v5044_v59 = vmax.f32 %v4018_v44, 0.0  ;;  %v4029_v10 = vadd.f32 %v9831_v6, %v10040_v28 }
 0x169   :  { %v6393_v38 = vunpack.c.l.b16 %v6338_v63  ;;  %v5809_v11 = vadd.f32 %v5808_v0, %v5288_v1  ;;  %v5289_v14 = vmin.f32 %v4777_v2, 6.0  ;;  %v2962_v15 = vadd.f32 %v9831_v6, %v2961_v8  ;;  %v10074_v49 = vpop.f32.mrf.mxu1 }
 0x16a   :  { %v8182_v19 = vpop.f32.mrf.mxu0  ;;  %v4782_v45 = vmax.f32 %v2970_v58, 0.0  ;;  %8548 = vmatmul.mubr.msk.bf16.gmra.mxu1 %vm1850_vm1, %v8922_v29  ;;  %v5554_v58 = vmin.f32 %v5042_v16, 6.0  ;;  %v5553_v8 = vmin.f32 %v5041_v55, 6.0  ;;  %v4021_v39 = vadd.f32 %v9831_v6, %v10052_v9 }
 0x16b   :  { %v10081_v32 = vsel %vm6408_vm2, %v6393_v38, %v9985_v50  ;;  %v5810_v26 = vadd.f32 %v5809_v11, %v5289_v14  ;;  %v4780_v34 = vmax.f32 %v2962_v15, 0.0  ;;  %v2973_v35 = vadd.f32 %v9831_v6, %v8182_v19  ;;  %v10095_v40 = vpop.f32.mrf.mxu1  ;;  %8551 = vmatprep.mubr.msk.bf16.mxu1 %vm1850_vm1, %v8925_v56  ;;  %v8887_v19 = vld [vmem:[%s11524_s0 + $0x2d8] sm:$0xff]   ;;  %v8929_v56 = vld [vmem:[%s11524_s0 + $0x710] sm:$0xff]  }
 0x16c   :  { %v2964_v17 = vpop.f32.mrf.mxu0  ;;  %v6113_v50 = vadd.f32 %v6112_v22, %v5552_v23  ;;  %v5294_v15 = vmin.f32 %v4782_v45, 6.0  ;;  %v5046_v22 = vmax.f32 %v4026_v57, 0.0  ;;  %v5045_v44 = vmax.f32 %v4021_v39, 0.0 }
 0x16d   :  { %v5811_v43 = vadd.f32 %v5810_v26, %v5290_v47  ;;  %v2965_v51 = vadd.f32 %v9831_v6, %v2964_v17  ;;  %v10103_v24 = vpop.f32.mrf.mxu1  ;;  %v5292_v63 = vmin.f32 %v4780_v34, 6.0  ;;  %v4783_v0 = vmax.f32 %v2973_v35, 0.0  ;;  %v8890_v35 = vld [vmem:[%s11524_s0 + $0x2e0] sm:$0xff]  }
 0x16e   :  { %v8185_v52 = vpop.f32.mrf.mxu0  ;;  %8280 = vmatmul.mubr.msk.bf16.gmra.mxu0 %vm1850_vm1, %v8883_v20  ;;  %v5555_v20 = vmin.f32 %v5043_v53, 6.0  ;;  %v6114_v23 = vadd.f32 %v6113_v50, %v5553_v8  ;;  %v5556_v50 = vmin.f32 %v5044_v59, 6.0  ;;  %v5558_v55 = vmin.f32 %v5046_v22, 6.0 }
 0x16f   :  { %v5812_v1 = vadd.f32 %v5811_v43, %v5291_v42  ;;  %v4781_v2 = vmax.f32 %v2965_v51, 0.0  ;;  %8283 = vmatprep.mubr.msk.bf16.mxu0 %vm1850_vm1, %v8886_v36  ;;  %v10110_v3 = vpop.f32.mrf.mxu1  ;;  %v2986_v11 = vadd.f32 %v9831_v6, %v8185_v52  ;;  %v5295_v29 = vmin.f32 %v4783_v0, 6.0 }
 0x170   :  { %v2977_v48 = vpop.f32.mrf.mxu0  ;;  %v5047_v36 = vmax.f32 %v4029_v10, 0.0  ;;  %v6115_v16 = vadd.f32 %v6114_v23, %v5554_v58  ;;  %v4042_v52 = vadd.f32 %v9831_v6, %v10060_v61  ;;  %v5557_v59 = vmin.f32 %v5045_v44, 6.0 }
 0x171   :  { %v5813_v30 = vadd.f32 %v5812_v1, %v5292_v63  ;;  %v5293_v38 = vmin.f32 %v4781_v2, 6.0  ;;  %v2978_v14 = vadd.f32 %v9831_v6, %v2977_v48  ;;  %v10118_v28 = vpop.f32.mrf.mxu1  ;;  %v4786_v45 = vmax.f32 %v2986_v11, 0.0 }
 0x172   :  { %v8186_v47 = vpop.f32.mrf.mxu0  ;;  %v6116_v57 = vadd.f32 %v6115_v16, %v5555_v20  ;;  %v4034_v63 = vadd.f32 %v9831_v6, %v10066_v37  ;;  %8552 = vmatmul.mubr.msk.bf16.gmra.mxu1 %vm1850_vm1, %v8926_v27  ;;  %v5559_v48 = vmin.f32 %v5047_v36, 6.0  ;;  %v4045_v23 = vadd.f32 %v9831_v6, %v10074_v49  ;;  %v8894_v36 = vld [vmem:[%s11524_s0 + $0x2f0] sm:$0xff]   ;;  %v8934_v49 = vld [vmem:[%s11524_s0 + $0x720] sm:$0xff]  }
 0x173   :  { %v5814_v26 = vadd.f32 %v5813_v30, %v5293_v38  ;;  %v4784_v34 = vmax.f32 %v2978_v14, 0.0  ;;  %v2989_v5 = vadd.f32 %v9831_v6, %v8186_v47  ;;  %v10132_v42 = vpop.f32.mrf.mxu1  ;;  %8555 = vmatprep.mubr.msk.bf16.mxu1 %vm1850_vm1, %v8929_v56  ;;  %v5050_v14 = vmax.f32 %v4042_v52, 0.0 }
 0x174   :  { %v2980_v17 = vpop.f32.mrf.mxu0  ;;  %v6117_v8 = vadd.f32 %v6116_v57, %v5556_v50  ;;  %v5048_v10 = vmax.f32 %v4034_v63, 0.0  ;;  %v4037_v22 = vadd.f32 %v9831_v6, %v10095_v40  ;;  %v5051_v16 = vmax.f32 %v4045_v23, 0.0 }
 0x175   :  { %v5815_v43 = vadd.f32 %v5814_v26, %v5294_v15  ;;  %v2981_v51 = vadd.f32 %v9831_v6, %v2980_v17  ;;  %v10140_v1 = vpop.f32.mrf.mxu1  ;;  %v5296_v9 = vmin.f32 %v4784_v34, 6.0  ;;  %v4787_v61 = vmax.f32 %v2989_v5, 0.0 }
 0x176   :  { %v8189_v53 = vpop.f32.mrf.mxu0  ;;  %8284 = vmatmul.mubr.msk.bf16.gmra.mxu0 %vm1850_vm1, %v8887_v19  ;;  %v8891_v19 = vld [vmem:[%s11524_s0 + $0x2e8] sm:$0xff]   ;;  %v6118_v20 = vadd.f32 %v6117_v8, %v5557_v59  ;;  %v5298_v26 = vmin.f32 %v4786_v45, 6.0  ;;  %v5560_v56 = vmin.f32 %v5048_v10, 6.0  ;;  %v5049_v50 = vmax.f32 %v4037_v22, 0.0 }
 0x177   :  { %v5816_v0 = vadd.f32 %v5815_v43, %v5295_v29  ;;  %v4785_v2 = vmax.f32 %v2981_v51, 0.0  ;;  %8287 = vmatprep.mubr.msk.bf16.mxu0 %vm1850_vm1, %v8890_v35  ;;  %v10145_v30 = vpop.f32.mrf.mxu1  ;;  %v3002_v15 = vadd.f32 %v9831_v6, %v8189_v53  ;;  %v8930_v29 = vld [vmem:[%s11524_s0 + $0x718] sm:$0xff]   ;;  %v5299_v43 = vmin.f32 %v4787_v61, 6.0 }
 0x178   :  { %v2993_v58 = vpop.f32.mrf.mxu0  ;;  %v6119_v17 = vadd.f32 %v6118_v20, %v5558_v55  ;;  %v5562_v57 = vmin.f32 %v5050_v14, 6.0  ;;  %v5561_v63 = vmin.f32 %v5049_v50, 6.0  ;;  %v4058_v61 = vadd.f32 %v9831_v6, %v10103_v24 }
 0x179   :  { %v5817_v37 = vadd.f32 %v5816_v0, %v5296_v9  ;;  %v5297_v38 = vmin.f32 %v4785_v2, 6.0  ;;  %v2994_v11 = vadd.f32 %v9831_v6, %v2993_v58  ;;  %v10156_v27 = vpop.f32.mrf.mxu1  ;;  %v4790_v52 = vmax.f32 %v3002_v15, 0.0 }
 0x17a   :  { %v8190_v47 = vpop.f32.mrf.mxu0  ;;  %v6120_v44 = vadd.f32 %v6119_v17, %v5559_v48  ;;  %8556 = vmatmul.mubr.msk.bf16.gmra.mxu1 %vm1850_vm1, %v8930_v29  ;;  %v5563_v10 = vmin.f32 %v5051_v16, 6.0  ;;  %v10182_v48 = vld [vmem:[%s11526_s2] ss:$0 sm:$0xff]  ;;  %v8935_v29 = vld [vmem:[%s11524_s0 + $0x728] sm:$0xff]  }
 0x17b   :  { %v5818_v34 = vadd.f32 %v5817_v37, %v5297_v38  ;;  %v4788_v35 = vmax.f32 %v2994_v11, 0.0  ;;  %v3005_v40 = vadd.f32 %v9831_v6, %v8190_v47  ;;  %v10168_v39 = vpop.f32.mrf.mxu1  ;;  %8559 = vmatprep.mubr.msk.bf16.mxu1 %vm1850_vm1, %v8934_v49  ;;  %v4050_v37 = vadd.f32 %v10182_v48, %v10110_v3  ;;  %v8895_v47 = vld [vmem:[%s11524_s0 + $0x2f8] sm:$0xff]  }
 0x17c   :  { %v2996_v5 = vpop.f32.mrf.mxu0  ;;  %v6121_v59 = vadd.f32 %v6120_v44, %v5560_v56  ;;  %v4061_v23 = vadd.f32 %v10182_v48, %v10118_v28  ;;  %v4053_v3 = vadd.f32 %v10182_v48, %v10132_v42  ;;  %v8898_v56 = vld [vmem:[%s11524_s0 + $0x300] sm:$0xff]   ;;  %v8938_v28 = vld [vmem:[%s11524_s0 + $0x730] sm:$0xff]  }
 0x17d   :  { %v5819_v45 = vadd.f32 %v5818_v34, %v5298_v26  ;;  %v2997_v51 = vadd.f32 %v9831_v6, %v2996_v5  ;;  %v10172_v9 = vpop.f32.mrf.mxu1  ;;  %v5300_v55 = vmin.f32 %v4788_v35, 6.0  ;;  %v4791_v58 = vmax.f32 %v3005_v40, 0.0 }
 0x17e   :  { %v8193_v53 = vpop.f32.mrf.mxu0  ;;  %8288 = vmatmul.mubr.msk.bf16.gmra.mxu0 %vm1850_vm1, %v8891_v19  ;;  %v6122_v19 = vadd.f32 %v6121_v59, %v5561_v63  ;;  %v5052_v20 = vmax.f32 %v4050_v37, 0.0  ;;  %v5302_v26 = vmin.f32 %v4790_v52, 6.0  ;;  %v5054_v40 = vmax.f32 %v4058_v61, 0.0 }
 0x17f   :  { %v5820_v0 = vadd.f32 %v5819_v45, %v5299_v43  ;;  %v4789_v2 = vmax.f32 %v2997_v51, 0.0  ;;  %8291 = vmatprep.mubr.msk.bf16.mxu0 %vm1850_vm1, %v8894_v36  ;;  %v10186_v38 = vpop.f32.mrf.mxu1  ;;  %v3018_v6 = vadd.f32 %v10182_v48, %v8193_v53  ;;  %v5053_v17 = vmax.f32 %v4053_v3, 0.0 }
 0x180   :  { %v3009_v8 = vpop.f32.mrf.mxu0  ;;  %v6123_v49 = vadd.f32 %v6122_v19, %v5562_v57  ;;  %v5564_v5 = vmin.f32 %v5052_v20, 6.0  ;;  %v5303_v50 = vmin.f32 %v4791_v58, 6.0  ;;  %v5055_v44 = vmax.f32 %v4061_v23, 0.0  ;;  %v8899_v19 = vld [vmem:[%s11524_s0 + $0x308] sm:$0xff]  }
 0x181   :  { %v5821_v11 = vadd.f32 %v5820_v0, %v5300_v55  ;;  %v5301_v14 = vmin.f32 %v4789_v2, 6.0  ;;  %v3010_v24 = vadd.f32 %v10182_v48, %v3009_v8  ;;  %v10197_v22 = vpop.f32.mrf.mxu1  ;;  %v4794_v45 = vmax.f32 %v3018_v6, 0.0 }
 0x182   :  { %v8194_v15 = vpop.f32.mrf.mxu0  ;;  %v6124_v53 = vadd.f32 %v6123_v49, %v5563_v10  ;;  %v5565_v63 = vmin.f32 %v5053_v17, 6.0  ;;  %v4066_v55 = vadd.f32 %v10182_v48, %v10145_v30  ;;  %8560 = vmatmul.mubr.msk.bf16.gmra.mxu1 %vm1850_vm1, %v8935_v29  ;;  %v5566_v10 = vmin.f32 %v5054_v40, 6.0 }
 0x183   :  { %v5822_v34 = vadd.f32 %v5821_v11, %v5301_v14  ;;  %v4792_v35 = vmax.f32 %v3010_v24, 0.0  ;;  %v3021_v36 = vadd.f32 %v10182_v48, %v8194_v15  ;;  %v10209_v16 = vpop.f32.mrf.mxu1  ;;  %8563 = vmatprep.mubr.msk.bf16.mxu1 %vm1850_vm1, %v8938_v28  ;;  %v4074_v30 = vadd.f32 %v10182_v48, %v10140_v1  ;;  %v8939_v1 = vld [vmem:[%s11524_s0 + $0x738] sm:$0xff]   ;;  %v8942_v28 = vld [vmem:[%s11524_s0 + $0x740] sm:$0xff]  }
 0x184   :  { %v3012_v42 = vpop.f32.mrf.mxu0  ;;  %v6125_v37 = vadd.f32 %v6124_v53, %v5564_v5  ;;  %v5056_v15 = vmax.f32 %v4066_v55, 0.0  ;;  %v5567_v20 = vmin.f32 %v5055_v44, 6.0  ;;  %v4077_v3 = vadd.f32 %v10182_v48, %v10156_v27 }
 0x185   :  { %v5823_v43 = vadd.f32 %v5822_v34, %v5302_v26  ;;  %v3013_v51 = vadd.f32 %v10182_v48, %v3012_v42  ;;  %v10215_v57 = vpop.f32.mrf.mxu1  ;;  %v5304_v0 = vmin.f32 %v4792_v35, 6.0  ;;  %v4795_v61 = vmax.f32 %v3021_v36, 0.0 }
 0x186   :  { %v8197_v52 = vpop.f32.mrf.mxu0  ;;  %8292 = vmatmul.mubr.msk.bf16.gmra.mxu0 %vm1850_vm1, %v8895_v47  ;;  %v6126_v23 = vadd.f32 %v6125_v37, %v5565_v63  ;;  %v5306_v26 = vmin.f32 %v4794_v45, 6.0  ;;  %v5058_v40 = vmax.f32 %v4074_v30, 0.0  ;;  %v4069_v5 = vadd.f32 %v10182_v48, %v10168_v39 }
 0x187   :  { %v5824_v2 = vadd.f32 %v5823_v43, %v5303_v50  ;;  %v4793_v58 = vmax.f32 %v3013_v51, 0.0  ;;  %8295 = vmatprep.mubr.msk.bf16.mxu0 %vm1850_vm1, %v8898_v56  ;;  %v3034_v8 = vadd.f32 %v10182_v48, %v8197_v52  ;;  %v10223_v11 = vpop.f32.mrf.mxu1  ;;  %v5307_v34 = vmin.f32 %v4795_v61, 6.0  ;;  %v8902_v56 = vld [vmem:[%s11524_s0 + $0x310] sm:$0xff]  }
 0x188   :  { %v3025_v59 = vpop.f32.mrf.mxu0  ;;  %v6127_v49 = vadd.f32 %v6126_v23, %v5566_v10  ;;  %v5568_v51 = vmin.f32 %v5056_v15, 6.0  ;;  %v5059_v44 = vmax.f32 %v4077_v3, 0.0  ;;  %v5057_v63 = vmax.f32 %v4069_v5, 0.0  ;;  %v8943_v3 = vld [vmem:[%s11524_s0 + $0x748] sm:$0xff]  }
 0x189   :  { %v5825_v14 = vadd.f32 %v5824_v2, %v5304_v0  ;;  %v5305_v6 = vmin.f32 %v4793_v58, 6.0  ;;  %v3026_v24 = vadd.f32 %v10182_v48, %v3025_v59  ;;  %v10231_v29 = vpop.f32.mrf.mxu1  ;;  %v4798_v42 = vmax.f32 %v3034_v8, 0.0 }
 0x18a   :  { %v8198_v47 = vpop.f32.mrf.mxu0  ;;  %v10249_v53 = vadd.f32 %v6127_v49, %v5567_v20  ;;  %v4082_v55 = vadd.f32 %v10182_v48, %v10186_v38  ;;  %8564 = vmatmul.mubr.msk.bf16.gmra.mxu1 %vm1850_vm1, %v8939_v1  ;;  %v4090_v58 = vadd.f32 %v10182_v48, %v10172_v9  ;;  %v5570_v59 = vmin.f32 %v5058_v40, 6.0 }
 0x18b   :  { %v5826_v35 = vadd.f32 %v5825_v14, %v5305_v6  ;;  %v4796_v36 = vmax.f32 %v3026_v24, 0.0  ;;  %v10244_v17 = vpop.f32.mrf.mxu1  ;;  %v3037_v43 = vadd.f32 %v10182_v48, %v8198_v47  ;;  %8567 = vmatprep.mubr.msk.bf16.mxu1 %vm1850_vm1, %v8942_v28  ;;  %v5569_v10 = vmin.f32 %v5057_v63, 6.0 }
 0x18c   :  { %v3028_v27 = vpop.f32.mrf.mxu0  ;;  %11544 = vst [vmem:[#allocation10_spill] sm:$0xff] %v10249_v53  ;;  %v5060_v37 = vmax.f32 %v4082_v55, 0.0  ;;  %v5310_v15 = vmin.f32 %v4798_v42, 6.0  ;;  %v5571_v9 = vmin.f32 %v5059_v44, 6.0  ;;  %v4093_v49 = vadd.f32 %v10182_v48, %v10197_v22 }
 0x18d   :  { %v5827_v50 = vadd.f32 %v5826_v35, %v5306_v26  ;;  %v3029_v45 = vadd.f32 %v10182_v48, %v3028_v27  ;;  %v10253_v0 = vpop.f32.mrf.mxu1  ;;  %v5308_v39 = vmin.f32 %v4796_v36, 6.0  ;;  %v4799_v14 = vmax.f32 %v3037_v43, 0.0 }
 0x18e   :  { %v8201_v52 = vpop.f32.mrf.mxu0  ;;  %8296 = vmatmul.mubr.msk.bf16.gmra.mxu0 %vm1850_vm1, %v8899_v19  ;;  %v8903_v19 = vld [vmem:[%s11524_s0 + $0x318] sm:$0xff]   ;;  %v6135_v20 = vadd.f32 %v5569_v10, %v5568_v51  ;;  %v5062_v35 = vmax.f32 %v4090_v58, 0.0  ;;  %v5572_v36 = vmin.f32 %v5060_v37, 6.0  ;;  %v4085_v40 = vadd.f32 %v10182_v48, %v10209_v16 }
 0x18f   :  { %v5828_v2 = vadd.f32 %v5827_v50, %v5307_v34  ;;  %v4797_v61 = vmax.f32 %v3029_v45, 0.0  ;;  %8299 = vmatprep.mubr.msk.bf16.mxu0 %vm1850_vm1, %v8902_v56  ;;  %v10260_v30 = vpop.f32.mrf.mxu1  ;;  %v3050_v26 = vadd.f32 %v10182_v48, %v8201_v52  ;;  %v8907_v34 = vld [vmem:[%s11524_s0 + $0x320] sm:$0xff]   ;;  %v8946_v56 = vld [vmem:[%s11524_s0 + $0x750] sm:$0xff]   ;;  %v5311_v50 = vmin.f32 %v4799_v14, 6.0 }
 0x190   :  { %v3041_v8 = vpop.f32.mrf.mxu0  ;;  %v6136_v27 = vadd.f32 %v6135_v20, %v5570_v59  ;;  %v5061_v63 = vmax.f32 %v4085_v40, 0.0  ;;  %v5063_v59 = vmax.f32 %v4093_v49, 0.0  ;;  %v4098_v20 = vadd.f32 %v10182_v48, %v10223_v11 }
 0x191   :  { %v5829_v38 = vadd.f32 %v5828_v2, %v5308_v39  ;;  %v5309_v6 = vmin.f32 %v4797_v61, 6.0  ;;  %v3042_v24 = vadd.f32 %v10182_v48, %v3041_v8  ;;  %v10266_v23 = vpop.f32.mrf.mxu1  ;;  %v4802_v39 = vmax.f32 %v3050_v26, 0.0 }
 0x192   :  { %v8202_v47 = vpop.f32.mrf.mxu0  ;;  %v6137_v44 = vadd.f32 %v6136_v27, %v5571_v9  ;;  %8568 = vmatmul.mubr.msk.bf16.gmra.mxu1 %vm1850_vm1, %v8943_v3  ;;  %v5574_v2 = vmin.f32 %v5062_v35, 6.0  ;;  %v5573_v10 = vmin.f32 %v5061_v63, 6.0  ;;  %v5575_v27 = vmin.f32 %v5063_v59, 6.0 }
 0x193   :  { %v5830_v1 = vadd.f32 %v5829_v38, %v5309_v6  ;;  %v4800_v28 = vmax.f32 %v3042_v24, 0.0  ;;  %v10282_v5 = vpop.f32.mrf.mxu1  ;;  %v3053_v45 = vadd.f32 %v10182_v48, %v8202_v47  ;;  %8571 = vmatprep.mubr.msk.bf16.mxu1 %vm1850_vm1, %v8946_v56  ;;  %v8911_v56 = vld [vmem:[%s11524_s0 + $0x330] sm:$0xff]   ;;  %v4106_v40 = vadd.f32 %v10182_v48, %v10215_v57 }
 0x194   :  { %v3044_v42 = vpop.f32.mrf.mxu0  ;;  %v6138_v8 = vadd.f32 %v6137_v44, %v5572_v36 }
 0x195   :  { %v5831_v43 = vadd.f32 %v5830_v1, %v5310_v15  ;;  %v3045_v51 = vadd.f32 %v10182_v48, %v3044_v42  ;;  %v10287_v55 = vpop.f32.mrf.mxu1  ;;  %v5312_v61 = vmin.f32 %v4800_v28, 6.0  ;;  %v4803_v14 = vmax.f32 %v3053_v45, 0.0  ;;  %v8947_v1 = vld [vmem:[%s11524_s0 + $0x758] sm:$0xff]   ;;  %v8950_v28 = vld [vmem:[%s11524_s0 + $0x760] sm:$0xff]  }
 0x196   :  { %v8205_v52 = vpop.f32.mrf.mxu0  ;;  %8300 = vmatmul.mubr.msk.bf16.gmra.mxu0 %vm1850_vm1, %v8903_v19  ;;  %v8908_v19 = vld [vmem:[%s11524_s0 + $0x328] sm:$0xff]   ;;  %v6139_v9 = vadd.f32 %v6138_v8, %v5573_v10  ;;  %v5066_v10 = vmax.f32 %v4106_v40, 0.0 }
 0x197   :  { %v5832_v22 = vadd.f32 %v5831_v43, %v5311_v50  ;;  %v4801_v16 = vmax.f32 %v3045_v51, 0.0  ;;  %8303 = vmatprep.mubr.msk.bf16.mxu0 %vm1850_vm1, %v8907_v34  ;;  %v10292_v37 = vpop.f32.mrf.mxu1  ;;  %v3066_v15 = vadd.f32 %v10182_v48, %v8205_v52  ;;  %v5314_v34 = vmin.f32 %v4802_v39, 6.0 }
 0x198   :  { %v3057_v58 = vpop.f32.mrf.mxu0  ;;  %v6140_v49 = vadd.f32 %v6139_v9, %v5574_v2  ;;  %v5315_v45 = vmin.f32 %v4803_v14, 6.0  ;;  %v5064_v39 = vmax.f32 %v4098_v20, 0.0 }
 0x199   :  { %v5833_v38 = vrot.slane %v5832_v22, 4  ;;  %v5313_v6 = vmin.f32 %v4801_v16, 6.0  ;;  %v3058_v24 = vadd.f32 %v10182_v48, %v3057_v58  ;;  %v10301_v3 = vpop.f32.mrf.mxu1  ;;  %v4806_v44 = vmax.f32 %v3066_v15, 0.0 }
 0x19a   :  { %v8206_v47 = vpop.f32.mrf.mxu0  ;;  %8572 = vmatmul.mubr.msk.bf16.gmra.mxu1 %vm1850_vm1, %v8947_v1  ;;  %v6141_v14 = vadd.f32 %v6140_v49, %v5575_v27  ;;  %v8912_v1 = vld [vmem:[%s11524_s0 + $0x338] sm:$0xff]   ;;  %v8915_v27 = vld [vmem:[%s11524_s0 + $0x340] sm:$0xff]  }
 0x19b   :  { %v5834_v26 = vadd.f32 %v5833_v38, %v5832_v22  ;;  %v5839_v35 = vadd.f32 %v5313_v6, %v5312_v61  ;;  %v4804_v36 = vmax.f32 %v3058_v24, 0.0  ;;  %v3069_v11 = vadd.f32 %v10182_v48, %v8206_v47  ;;  %v10315_v50 = vpop.f32.mrf.mxu1  ;;  %8575 = vmatprep.mubr.msk.bf16.mxu1 %vm1850_vm1, %v8950_v28 }
 0x19c   :  { %v3060_v42 = vpop.f32.mrf.mxu0  ;;  %v5576_v38 = vmin.f32 %v5064_v39, 6.0 }
 0x19d   :  { %v5835_v43 = vrot.slane %v5834_v26, 2  ;;  %v5840_v51 = vadd.f32 %v5839_v35, %v5314_v34  ;;  %v3061_v52 = vadd.f32 %v10182_v48, %v3060_v42  ;;  %v5316_v63 = vmin.f32 %v4804_v36, 6.0  ;;  %v10319_v16 = vpop.f32.mrf.mxu1 }
 0x19e   :  { %v8209_v22 = vpop.f32.mrf.mxu0  ;;  %8304 = vmatmul.mubr.msk.bf16.gmra.mxu0 %vm1850_vm1, %v8908_v19  ;;  %v4807_v8 = vmax.f32 %v3069_v11, 0.0  ;;  %v4109_v34 = vadd.f32 %v10182_v48, %v10231_v29  ;;  %v4101_v35 = vadd.f32 %v10182_v48, %v10244_v17  ;;  %v5318_v11 = vmin.f32 %v4806_v44, 6.0  ;;  %v8954_v29 = vld [vmem:[%s11524_s0 + $0x770] sm:$0xff]  }
 0x19f   :  { %v5836_v2 = vadd.f32 %v5835_v43, %v5834_v26  ;;  %v5841_v61 = vadd.f32 %v5840_v51, %v5315_v45  ;;  %v4805_v57 = vmax.f32 %v3061_v52, 0.0  ;;  %v3082_v58 = vadd.f32 %v10182_v48, %v8209_v22  ;;  %8307 = vmatprep.mubr.msk.bf16.mxu0 %vm1850_vm1, %v8911_v56  ;;  %v10325_v6 = vpop.f32.mrf.mxu1  ;;  %v8951_v56 = vld [vmem:[%s11524_s0 + $0x768] sm:$0xff]  }
 0x1a0   :  { %v3073_v59 = vpop.f32.mrf.mxu0  ;;  %v6142_v26 = vadd.f32 %v6141_v14, %v5576_v38  ;;  %v5067_v43 = vmax.f32 %v4109_v34, 0.0  ;;  %v5065_v45 = vmax.f32 %v4101_v35, 0.0 }
 0x1a1   :  { %v5837_v24 = vrot.slane %v5836_v2, 1  ;;  %v5842_v15 = vadd.f32 %v5841_v61, %v5316_v63  ;;  %v5317_v47 = vmin.f32 %v4805_v57, 6.0  ;;  %v4810_v19 = vmax.f32 %v3082_v58, 0.0  ;;  %v10335_v36 = vpop.f32.mrf.mxu1 }
 0x1a2   :  { %v3074_v9 = vadd.f32 %v10182_v48, %v3073_v59  ;;  %v8210_v20 = vpop.f32.mrf.mxu0  ;;  %v5319_v63 = vmin.f32 %v4807_v8, 6.0  ;;  %v5578_v61 = vmin.f32 %v5066_v10, 6.0  ;;  %v5577_v57 = vmin.f32 %v5065_v45, 6.0  ;;  %8576 = vmatmul.mubr.msk.bf16.gmra.mxu1 %vm1850_vm1, %v8951_v56  ;;  %v8919_v45 = vld [vmem:[%s11524_s0 + $0x350] sm:$0xff]  }
 0x1a3   :  { %v5838_v28 = vadd.f32 %v5837_v24, %v5836_v2  ;;  %v5843_v42 = vadd.f32 %v5842_v15, %v5317_v47  ;;  %v3085_v17 = vadd.f32 %v10182_v48, %v8210_v20  ;;  %v10347_v51 = vpop.f32.mrf.mxu1  ;;  %v5322_v39 = vmin.f32 %v4810_v19, 6.0  ;;  %8579 = vmatprep.mubr.msk.bf16.mxu1 %vm1850_vm1, %v8954_v29  ;;  %v8955_v29 = vld [vmem:[%s11524_s0 + $0x778] sm:$0xff]  }
 0x1a4   :  { %v4808_v49 = vmax.f32 %v3074_v9, 0.0  ;;  %v3076_v40 = vpop.f32.mrf.mxu0  ;;  %v4122_v58 = vadd.f32 %v10182_v48, %v10253_v0  ;;  %v5579_v19 = vmin.f32 %v5067_v43, 6.0  ;;  %v6143_v10 = vadd.f32 %v6142_v26, %v5577_v57 }
 0x1a5   :  { %v6323_v52 = vmul.f32 0.00390625, %v5838_v28  ;;  %v5844_v44 = vadd.f32 %v5843_v42, %v5318_v11  ;;  %v3077_v22 = vadd.f32 %v10182_v48, %v3076_v40  ;;  %v10353_v59 = vpop.f32.mrf.mxu1  ;;  %v4811_v15 = vmax.f32 %v3085_v17, 0.0  ;;  %v8916_v11 = vld [vmem:[%s11524_s0 + $0x348] sm:$0xff]  }
 0x1a6   :  { %v8213_v2 = vpop.f32.mrf.mxu0  ;;  %8308 = vmatmul.mubr.msk.bf16.gmra.mxu0 %vm1850_vm1, %v8912_v1  ;;  %v5320_v14 = vmin.f32 %v4808_v49, 6.0  ;;  %v4114_v9 = vadd.f32 %v10182_v48, %v10260_v30  ;;  %v6144_v42 = vadd.f32 %v6143_v10, %v5578_v61  ;;  %v4125_v26 = vadd.f32 %v10182_v48, %v10266_v23  ;;  %v8958_v23 = vld [vmem:[%s11524_s0 + $0x780] sm:$0xff]  }
 0x1a7   :  { %v6339_v38 = vpack.c.bf16 %v6323_v52, %v6323_v52  ;;  %v5845_v24 = vadd.f32 %v5844_v44, %v5319_v63  ;;  %v4809_v8 = vmax.f32 %v3077_v22, 0.0  ;;  %8311 = vmatprep.mubr.msk.bf16.mxu0 %vm1850_vm1, %v8915_v27  ;;  %v10360_v0 = vpop.f32.mrf.mxu1  ;;  %v3098_v56 = vadd.f32 %v10182_v48, %v8213_v2  ;;  %v8965_v52 = vld [vmem:[%s11527_s3 + $0x20] sm:$0xff]  }
 0x1a8   :  { %v3089_v47 = vpop.f32.mrf.mxu0  ;;  %v5068_v27 = vmax.f32 %v4114_v9, 0.0  ;;  %v5070_v44 = vmax.f32 %v4122_v58, 0.0  ;;  %v6145_v22 = vadd.f32 %v6144_v42, %v5579_v19  ;;  %v5323_v61 = vmin.f32 %v4811_v15, 6.0  ;;  %8622 = vmatpush3.bf16.msra.mxu1 %v8965_v52 }
 0x1a9   :  { %v6394_v20 = vunpack.c.l.b16 %v6339_v38  ;;  %v5846_v1 = vadd.f32 %v5845_v24, %v5320_v14  ;;  %v5321_v34 = vmin.f32 %v4809_v8, 6.0  ;;  %v3090_v35 = vadd.f32 %v10182_v48, %v3089_v47  ;;  %v10369_v30 = vpop.f32.mrf.mxu1  ;;  %8623 = vmatprep.subr.bf16.mxu1 %v11533_v4 }
 0x1aa   :  { %v8214_v28 = vpop.f32.mrf.mxu0  ;;  %v4814_v14 = vmax.f32 %v3098_v56, 0.0  ;;  %v5071_v47 = vmax.f32 %v4125_v26, 0.0  ;;  %v4117_v10 = vadd.f32 %v10182_v48, %v10282_v5  ;;  %8580 = vmatmul.mubr.msk.bf16.gmra.mxu1 %vm1850_vm1, %v8955_v29  ;;  %v4130_v5 = vadd.f32 %v10182_v48, %v10292_v37 }
 0x1ab   :  { %v10376_v49 = vsel %vm6410_vm3, %v6394_v20, %v10081_v32  ;;  %v5847_v17 = vadd.f32 %v5846_v1, %v5321_v34  ;;  %v4812_v40 = vmax.f32 %v3090_v35, 0.0  ;;  %v3101_v43 = vadd.f32 %v10182_v48, %v8214_v28  ;;  %v10388_v2 = vpop.f32.mrf.mxu1  ;;  %8583 = vmatprep.mubr.msk.bf16.mxu1 %vm1850_vm1, %v8958_v23 }
 0x1ac   :  { %v3092_v63 = vpop.f32.mrf.mxu0  ;;  %v5580_v32 = vmin.f32 %v5068_v27, 6.0  ;;  %v5582_v1 = vmin.f32 %v5070_v44, 6.0  ;;  %v5069_v34 = vmax.f32 %v4117_v10, 0.0  ;;  %v4138_v35 = vadd.f32 %v10182_v48, %v10287_v55  ;;  %v8923_v44 = vld [vmem:[%s11524_s0 + $0x360] sm:$0xff]  }
 0x1ad   :  { %v5848_v57 = vadd.f32 %v5847_v17, %v5322_v39  ;;  %v3093_v38 = vadd.f32 %v10182_v48, %v3092_v63  ;;  %v10394_v9 = vpop.f32.mrf.mxu1  ;;  %v5324_v58 = vmin.f32 %v4812_v40, 6.0  ;;  %v4815_v15 = vmax.f32 %v3101_v43, 0.0  ;;  %v8920_v17 = vld [vmem:[%s11524_s0 + $0x358] sm:$0xff]  }
 0x1ae   :  { %v8217_v24 = vpop.f32.mrf.mxu0  ;;  %8312 = vmatmul.mubr.msk.bf16.gmra.mxu0 %vm1850_vm1, %v8916_v11  ;;  %v6146_v8 = vadd.f32 %v6145_v22, %v5580_v32  ;;  %v5326_v26 = vmin.f32 %v4814_v14, 6.0  ;;  %v5583_v55 = vmin.f32 %v5071_v47, 6.0  ;;  %v5581_v40 = vmin.f32 %v5069_v34, 6.0  ;;  %v8962_v22 = vld [vmem:[%s11524_s0 + $0x790] sm:$0xff]  }
 0x1af   :  { %v5849_v19 = vadd.f32 %v5848_v57, %v5323_v61  ;;  %v4813_v39 = vmax.f32 %v3093_v38, 0.0  ;;  %8315 = vmatprep.mubr.msk.bf16.mxu0 %vm1850_vm1, %v8919_v45  ;;  %v10403_v56 = vpop.f32.mrf.mxu1  ;;  %v3114_v42 = vadd.f32 %v10182_v48, %v8217_v24  ;;  %v5072_v43 = vmax.f32 %v4130_v5, 0.0  ;;  %v8959_v45 = vld [vmem:[%s11524_s0 + $0x788] sm:$0xff]  }
 0x1b0   :  { %v3105_v20 = vpop.f32.mrf.mxu0  ;;  %v5327_v23 = vmin.f32 %v4815_v15, 6.0  ;;  %v4141_v32 = vadd.f32 %v10182_v48, %v10301_v3  ;;  %v6147_v38 = vadd.f32 %v6146_v8, %v5581_v40  ;;  %v5074_v14 = vmax.f32 %v4138_v35, 0.0 }
 0x1b1   :  { %v5850_v28 = vadd.f32 %v5849_v19, %v5324_v58  ;;  %v5325_v11 = vmin.f32 %v4813_v39, 6.0  ;;  %v3106_v27 = vadd.f32 %v10182_v48, %v3105_v20  ;;  %v10411_v37 = vpop.f32.mrf.mxu1  ;;  %v4133_v24 = vadd.f32 %v10182_v48, %v10315_v50 }
 0x1b2   :  { %v8218_v29 = vpop.f32.mrf.mxu0  ;;  %v4818_v58 = vmax.f32 %v3114_v42, 0.0  ;;  %v5584_v15 = vmin.f32 %v5072_v43, 6.0  ;;  %v6148_v39 = vadd.f32 %v6147_v38, %v5582_v1  ;;  %v4154_v34 = vadd.f32 %v10182_v48, %v10319_v16  ;;  %8584 = vmatmul.mubr.msk.bf16.gmra.mxu1 %vm1850_vm1, %v8959_v45 }
 0x1b3   :  { %v5851_v52 = vadd.f32 %v5850_v28, %v5325_v11  ;;  %v4816_v63 = vmax.f32 %v3106_v27, 0.0  ;;  %v3117_v61 = vadd.f32 %v10182_v48, %v8218_v29  ;;  %v10427_v47 = vpop.f32.mrf.mxu1  ;;  %v5073_v20 = vmax.f32 %v4133_v24, 0.0  ;;  %8587 = vmatprep.mubr.msk.bf16.mxu1 %vm1850_vm1, %v8962_v22  ;;  %v8963_v22 = vld [vmem:[%s11524_s0 + $0x798] sm:$0xff]   ;;  %v8927_v24 = vld [vmem:[%s11524_s0 + $0x370] sm:$0xff]  }
 0x1b4   :  { %v3108_v57 = vpop.f32.mrf.mxu0  ;;  %v4146_v8 = vadd.f32 %v10182_v48, %v10325_v6  ;;  %v5075_v11 = vmax.f32 %v4141_v32, 0.0  ;;  %v6149_v27 = vadd.f32 %v6148_v39, %v5583_v55  ;;  %v5078_v43 = vmax.f32 %v4154_v34, 0.0 }
 0x1b5   :  { %v5852_v10 = vadd.f32 %v5851_v52, %v5326_v26  ;;  %v3109_v19 = vadd.f32 %v10182_v48, %v3108_v57  ;;  %v10435_v35 = vpop.f32.mrf.mxu1  ;;  %v5328_v50 = vmin.f32 %v4816_v63, 6.0  ;;  %v4819_v1 = vmax.f32 %v3117_v61, 0.0 }
 0x1b6   :  { %v8221_v3 = vpop.f32.mrf.mxu0  ;;  %8316 = vmatmul.mubr.msk.bf16.gmra.mxu0 %vm1850_vm1, %v8920_v17  ;;  %v5585_v26 = vmin.f32 %v5073_v20, 6.0  ;;  %v5586_v52 = vmin.f32 %v5074_v14, 6.0  ;;  %v6150_v63 = vadd.f32 %v6149_v27, %v5584_v15  ;;  %v4157_v32 = vadd.f32 %v10182_v48, %v10335_v36  ;;  %v8967_v14 = vld [vmem:[%s11524_s0 + $0x7a0] sm:$0xff]  }
 0x1b7   :  { %v5853_v5 = vadd.f32 %v5852_v10, %v5327_v23  ;;  %v4817_v28 = vmax.f32 %v3109_v19, 0.0  ;;  %8319 = vmatprep.mubr.msk.bf16.mxu0 %vm1850_vm1, %v8923_v44  ;;  %v10441_v42 = vadd.f32 %v10182_v48, %v8221_v3  ;;  %v10443_v6 = vpop.f32.mrf.mxu1  ;;  %v8924_v23 = vld [vmem:[%s11524_s0 + $0x368] sm:$0xff]   ;;  %v5076_v44 = vmax.f32 %v4146_v8, 0.0 }
 0x1b8   :  { %v3121_v16 = vpop.f32.mrf.mxu0  ;;  %v5330_v61 = vmin.f32 %v4818_v58, 6.0  ;;  %v5587_v10 = vmin.f32 %v5075_v11, 6.0  ;;  %v5331_v19 = vmin.f32 %v4819_v1, 6.0  ;;  %v6151_v3 = vadd.f32 %v6150_v63, %v5585_v26 }
 0x1b9   :  { %v5854_v29 = vadd.f32 %v5853_v5, %v5328_v50  ;;  %v5329_v17 = vmin.f32 %v4817_v28, 6.0  ;;  %v3122_v40 = vadd.f32 %v10182_v48, %v3121_v16  ;;  %v10451_v55 = vpop.f32.mrf.mxu1  ;;  %v4149_v39 = vadd.f32 %v10182_v48, %v10347_v51 }
 0x1ba   :  { %v8222_v45 = vpop.f32.mrf.mxu0  ;;  %v4822_v34 = vmax.f32 %v10441_v42, 0.0  ;;  %v5590_v50 = vmin.f32 %v5078_v43, 6.0  ;;  %v6152_v28 = vadd.f32 %v6151_v3, %v5586_v52  ;;  %v5588_v11 = vmin.f32 %v5076_v44, 6.0  ;;  %8588 = vmatmul.mubr.msk.bf16.gmra.mxu1 %vm1850_vm1, %v8963_v22 }
 0x1bb   :  { %v5855_v57 = vadd.f32 %v5854_v29, %v5329_v17  ;;  %v4820_v38 = vmax.f32 %v3122_v40, 0.0  ;;  %v3133_v36 = vadd.f32 %v10182_v48, %v8222_v45  ;;  %v10465_v58 = vpop.f32.mrf.mxu1  ;;  %v5079_v1 = vmax.f32 %v4157_v32, 0.0  ;;  %8591 = vmatprep.mubr.msk.bf16.mxu1 %vm1850_vm1, %v8967_v14  ;;  %v8968_v14 = vld [vmem:[%s11524_s0 + $0x7a8] sm:$0xff]  }
 0x1bc   :  { %v3124_v15 = vpop.f32.mrf.mxu0  ;;  %v5077_v16 = vmax.f32 %v4149_v39, 0.0  ;;  %v4170_v42 = vadd.f32 %v10182_v48, %v10353_v59  ;;  %v6153_v43 = vadd.f32 %v6152_v28, %v5587_v10  ;;  %v8928_v59 = vld [vmem:[%s11524_s0 + $0x378] sm:$0xff]   ;;  %v8931_v39 = vld [vmem:[%s11524_s0 + $0x380] sm:$0xff]  }
 0x1bd   :  { %v5856_v20 = vadd.f32 %v5855_v57, %v5330_v61  ;;  %v3125_v8 = vadd.f32 %v10182_v48, %v3124_v15  ;;  %v10470_v27 = vpop.f32.mrf.mxu1  ;;  %v5332_v51 = vmin.f32 %v4820_v38, 6.0  ;;  %v4823_v17 = vmax.f32 %v3133_v36, 0.0 }
 0x1be   :  { %v8225_v5 = vpop.f32.mrf.mxu0  ;;  %8320 = vmatmul.mubr.msk.bf16.gmra.mxu0 %vm1850_vm1, %v8924_v23  ;;  %v5589_v45 = vmin.f32 %v5077_v16, 6.0  ;;  %v4162_v23 = vadd.f32 %v10182_v48, %v10360_v0  ;;  %v6154_v57 = vadd.f32 %v6153_v43, %v5588_v11  ;;  %v4165_v0 = vadd.f32 %v10182_v48, %v10388_v2 }
 0x1bf   :  { %v5857_v26 = vadd.f32 %v5856_v20, %v5331_v19  ;;  %v4821_v29 = vmax.f32 %v3125_v8, 0.0  ;;  %8323 = vmatprep.mubr.msk.bf16.mxu0 %vm1850_vm1, %v8927_v24  ;;  %v10479_v52 = vpop.f32.mrf.mxu1  ;;  %v3146_v32 = vadd.f32 %v10182_v48, %v8225_v5  ;;  %v4173_v24 = vadd.f32 %v10182_v48, %v10369_v30  ;;  %v8971_v30 = vld [vmem:[%s11524_s0 + $0x7b0] sm:$0xff]  }
 0x1c0   :  { %v3137_v40 = vpop.f32.mrf.mxu0  ;;  %v5080_v38 = vmax.f32 %v4162_v23, 0.0  ;;  %v5334_v19 = vmin.f32 %v4822_v34, 6.0  ;;  %v5591_v20 = vmin.f32 %v5079_v1, 6.0  ;;  %v6155_v8 = vadd.f32 %v6154_v57, %v5589_v45 }
 0x1c1   :  { %v5858_v63 = vadd.f32 %v5857_v26, %v5332_v51  ;;  %v5333_v44 = vmin.f32 %v4821_v29, 6.0  ;;  %v3138_v22 = vadd.f32 %v10182_v48, %v3137_v40  ;;  %v10490_v10 = vpop.f32.mrf.mxu1  ;;  %v5081_v5 = vmax.f32 %v4165_v0, 0.0 }
 0x1c2   :  { %v8226_v61 = vpop.f32.mrf.mxu0  ;;  %v5335_v11 = vmin.f32 %v4823_v17, 6.0  ;;  %v5082_v51 = vmax.f32 %v4170_v42, 0.0  ;;  %v4826_v26 = vmax.f32 %v3146_v32, 0.0  ;;  %v6156_v40 = vadd.f32 %v6155_v8, %v5590_v50  ;;  %8592 = vmatmul.mubr.msk.bf16.gmra.mxu1 %vm1850_vm1, %v8968_v14  ;;  %v8936_v8 = vld [vmem:[%s11524_s0 + $0x390] sm:$0xff]  }
 0x1c3   :  { %v5859_v36 = vadd.f32 %v5858_v63, %v5333_v44  ;;  %v4824_v15 = vmax.f32 %v3138_v22, 0.0  ;;  %v3149_v3 = vadd.f32 %v10182_v48, %v8226_v61  ;;  %v10502_v28 = vpop.f32.mrf.mxu1  ;;  %v5592_v43 = vmin.f32 %v5080_v38, 6.0  ;;  %8595 = vmatprep.mubr.msk.bf16.mxu1 %vm1850_vm1, %v8971_v30 }
 0x1c4   :  { %v3140_v2 = vpop.f32.mrf.mxu0  ;;  %v5083_v23 = vmax.f32 %v4173_v24, 0.0  ;;  %v6157_v17 = vadd.f32 %v6156_v40, %v5591_v20  ;;  %v5593_v32 = vmin.f32 %v5081_v5, 6.0  ;;  %v4186_v50 = vadd.f32 %v10182_v48, %v10394_v9 }
 0x1c5   :  { %v5860_v34 = vadd.f32 %v5859_v36, %v5334_v19  ;;  %v3141_v16 = vadd.f32 %v10182_v48, %v3140_v2  ;;  %v10506_v63 = vpop.f32.mrf.mxu1  ;;  %v5336_v1 = vmin.f32 %v4824_v15, 6.0  ;;  %v4827_v44 = vmax.f32 %v3149_v3, 0.0  ;;  %v8932_v36 = vld [vmem:[%s11524_s0 + $0x388] sm:$0xff]  }
 0x1c6   :  { %v8229_v29 = vpop.f32.mrf.mxu0  ;;  %8324 = vmatmul.mubr.msk.bf16.gmra.mxu0 %vm1850_vm1, %v8928_v59  ;;  %v4178_v61 = vadd.f32 %v10182_v48, %v10403_v56  ;;  %v5338_v14 = vmin.f32 %v4826_v26, 6.0  ;;  %v5594_v15 = vmin.f32 %v5082_v51, 6.0  ;;  %v6158_v3 = vadd.f32 %v6157_v17, %v5592_v43  ;;  %v8972_v56 = vld [vmem:[%s11524_s0 + $0x7b8] sm:$0xff]  }
 0x1c7   :  { %v5861_v45 = vadd.f32 %v5860_v34, %v5335_v11  ;;  %v4825_v22 = vmax.f32 %v3141_v16, 0.0  ;;  %8327 = vmatprep.mubr.msk.bf16.mxu0 %vm1850_vm1, %v8931_v39  ;;  %v10515_v59 = vpop.f32.mrf.mxu1  ;;  %v3162_v24 = vadd.f32 %v10182_v48, %v8229_v29  ;;  %v5339_v30 = vmin.f32 %v4827_v44, 6.0  ;;  %v8975_v11 = vld [vmem:[%s11524_s0 + $0x7c0] sm:$0xff]  }
 0x1c8   :  { %v3153_v42 = vpop.f32.mrf.mxu0  ;;  %v5084_v9 = vmax.f32 %v4178_v61, 0.0  ;;  %v5595_v5 = vmin.f32 %v5083_v23, 6.0  ;;  %v6159_v16 = vadd.f32 %v6158_v3, %v5593_v32  ;;  %v5086_v51 = vmax.f32 %v4186_v50, 0.0 }
 0x1c9   :  { %v5862_v57 = vadd.f32 %v5861_v45, %v5336_v1  ;;  %v5337_v38 = vmin.f32 %v4825_v22, 6.0  ;;  %v3154_v0 = vadd.f32 %v10182_v48, %v3153_v42  ;;  %v10522_v39 = vpop.f32.mrf.mxu1  ;;  %v4189_v26 = vadd.f32 %v10182_v48, %v10411_v37 }
 0x1ca   :  { %v8230_v19 = vpop.f32.mrf.mxu0  ;;  %v4181_v29 = vadd.f32 %v10182_v48, %v10427_v47  ;;  %v4830_v1 = vmax.f32 %v3162_v24, 0.0  ;;  %v6160_v22 = vadd.f32 %v6159_v16, %v5594_v15  ;;  %v5596_v42 = vmin.f32 %v5084_v9, 6.0  ;;  %8596 = vmatmul.mubr.msk.bf16.gmra.mxu1 %vm1850_vm1, %v8972_v56  ;;  %v8987_v9 = vld [vmem:[%s11527_s3 + $0x18] sm:$0xff]  }
 0x1cb   :  { %v5863_v2 = vadd.f32 %v5862_v57, %v5337_v38  ;;  %v4828_v20 = vmax.f32 %v3154_v0, 0.0  ;;  %v10537_v40 = vpop.f32.mrf.mxu1  ;;  %v3165_v45 = vadd.f32 %v10182_v48, %v8230_v19  ;;  %v4194_v37 = vadd.f32 %v10182_v48, %v10443_v6  ;;  %8599 = vmatprep.mubr.msk.bf16.mxu1 %vm1850_vm1, %v8975_v11  ;;  %v8976_v11 = vld [vmem:[%s11524_s0 + $0x7c8] sm:$0xff]   ;;  %8624 = vmatpush3.bf16.msra.mxu1 %v8987_v9 }
 0x1cc   :  { %v3156_v34 = vpop.f32.mrf.mxu0  ;;  %v5085_v17 = vmax.f32 %v4181_v29, 0.0  ;;  %v4202_v57 = vadd.f32 %v10182_v48, %v10435_v35  ;;  %v6161_v24 = vadd.f32 %v6160_v22, %v5595_v5  ;;  %v5087_v0 = vmax.f32 %v4189_v26, 0.0  ;;  %v8937_v35 = vld [vmem:[%s11524_s0 + $0x398] sm:$0xff]   ;;  %v8940_v29 = vld [vmem:[%s11524_s0 + $0x3a0] sm:$0xff]   ;;  %8625 = vmatprep.subr.bf16.mxu1 %v11533_v4 }
 0x1cd   :  { %v5864_v43 = vadd.f32 %v5863_v2, %v5338_v14  ;;  %v3157_v23 = vadd.f32 %v10182_v48, %v3156_v34  ;;  %v10544_v32 = vpop.f32.mrf.mxu1  ;;  %v5340_v47 = vmin.f32 %v4828_v20, 6.0  ;;  %v5088_v20 = vmax.f32 %v4194_v37, 0.0 }
 0x1ce   :  { %v8233_v44 = vpop.f32.mrf.mxu0  ;;  %8328 = vmatmul.mubr.msk.bf16.gmra.mxu0 %vm1850_vm1, %v8932_v36  ;;  %v5597_v14 = vmin.f32 %v5085_v17, 6.0  ;;  %v4831_v36 = vmax.f32 %v3165_v45, 0.0  ;;  %v6162_v2 = vadd.f32 %v6161_v24, %v5596_v42  ;;  %v5342_v34 = vmin.f32 %v4830_v1, 6.0 }
 0x1cf   :  { %v5865_v50 = vadd.f32 %v5864_v43, %v5339_v30  ;;  %v4829_v61 = vmax.f32 %v3157_v23, 0.0  ;;  %8331 = vmatprep.mubr.msk.bf16.mxu0 %vm1850_vm1, %v8936_v8  ;;  %v10551_v19 = vpop.f32.mrf.mxu1  ;;  %v5598_v30 = vmin.f32 %v5086_v51, 6.0  ;;  %v4205_v8 = vadd.f32 %v10182_v48, %v10451_v55  ;;  %v8979_v43 = vld [vmem:[%s11524_s0 + $0x7d0] sm:$0xff]  }
 0x1d0   :  { %v3169_v38 = vpop.f32.mrf.mxu0  ;;  %v3178_v26 = vadd.f32 %v10182_v48, %v8233_v44  ;;  %v5090_v51 = vmax.f32 %v4202_v57, 0.0  ;;  %v5599_v23 = vmin.f32 %v5087_v0, 6.0  ;;  %v6163_v22 = vadd.f32 %v6162_v2, %v5597_v14 }
 0x1d1   :  { %v5866_v6 = vadd.f32 %v5865_v50, %v5340_v47  ;;  %v5341_v15 = vmin.f32 %v4829_v61, 6.0  ;;  %v3170_v3 = vadd.f32 %v10182_v48, %v3169_v38  ;;  %v10562_v5 = vpop.f32.mrf.mxu1  ;;  %v4197_v1 = vadd.f32 %v10182_v48, %v10465_v58 }
 0x1d2   :  { %v8234_v56 = vpop.f32.mrf.mxu0  ;;  %v5343_v44 = vmin.f32 %v4831_v36, 6.0  ;;  %v6164_v61 = vadd.f32 %v6163_v22, %v5598_v30  ;;  %v5600_v57 = vmin.f32 %v5088_v20, 6.0  ;;  %v5091_v38 = vmax.f32 %v4205_v8, 0.0  ;;  %8600 = vmatmul.mubr.msk.bf16.gmra.mxu1 %vm1850_vm1, %v8976_v11 }
 0x1d3   :  { %v5867_v16 = vadd.f32 %v5866_v6, %v5341_v15  ;;  %v3181_v55 = vadd.f32 %v10182_v48, %v8234_v56  ;;  %v10577_v42 = vpop.f32.mrf.mxu1  ;;  %v4832_v37 = vmax.f32 %v3170_v3, 0.0  ;;  %v5089_v24 = vmax.f32 %v4197_v1, 0.0  ;;  %8603 = vmatprep.mubr.msk.bf16.mxu1 %vm1850_vm1, %v8979_v43  ;;  %v10592_v56 = vld [vmem:[%s11526_s2] ss:$0 sm:$0xff] }
 0x1d4   :  { %v3172_v45 = vpop.f32.mrf.mxu0  ;;  %v4834_v14 = vmax.f32 %v3178_v26, 0.0  ;;  %v5602_v36 = vmin.f32 %v5090_v51, 6.0  ;;  %v10587_v3 = vadd.f32 %v6164_v61, %v5599_v23  ;;  %v8941_v26 = vld [vmem:[%s11524_s0 + $0x3a8] sm:$0xff]  }
 0x1d5   :  { %v5868_v17 = vadd.f32 %v5867_v16, %v5342_v34  ;;  %v3173_v47 = vadd.f32 %v10182_v48, %v3172_v45  ;;  %v10582_v0 = vpop.f32.mrf.mxu1  ;;  %v4835_v48 = vmax.f32 %v3181_v55, 0.0  ;;  %v5601_v9 = vmin.f32 %v5089_v24, 6.0 }
 0x1d6   :  { %v8237_v50 = vpop.f32.mrf.mxu0  ;;  %8332 = vmatmul.mubr.msk.bf16.gmra.mxu0 %vm1850_vm1, %v8937_v35  ;;  %11545 = vst [vmem:[#allocation11_spill] sm:$0xff] %v10587_v3  ;;  %v4210_v35 = vadd.f32 %v10592_v56, %v10479_v52  ;;  %v5344_v20 = vmin.f32 %v4832_v37, 6.0  ;;  %v8980_v52 = vld [vmem:[%s11524_s0 + $0x7d8] sm:$0xff]   ;;  %v5346_v23 = vmin.f32 %v4834_v14, 6.0 }
 0x1d7   :  { %v5869_v58 = vadd.f32 %v5868_v17, %v5343_v44  ;;  %v4833_v6 = vmax.f32 %v3173_v47, 0.0  ;;  %8335 = vmatprep.mubr.msk.bf16.mxu0 %vm1850_vm1, %v8940_v29  ;;  %v10596_v30 = vpop.f32.mrf.mxu1  ;;  %v3194_v34 = vadd.f32 %v10592_v56, %v8237_v50  ;;  %v5603_v29 = vmin.f32 %v5091_v38, 6.0  ;;  %v8944_v44 = vld [vmem:[%s11524_s0 + $0x3b0] sm:$0xff]   ;;  %v8983_v17 = vld [vmem:[%s11524_s0 + $0x7e0] sm:$0xff]  }
 0x1d8   :  { %v3185_v15 = vpop.f32.mrf.mxu0  ;;  %v6172_v51 = vadd.f32 %v5601_v9, %v5600_v57  ;;  %v5092_v43 = vmax.f32 %v4210_v35, 0.0  ;;  %v5347_v37 = vmin.f32 %v4835_v48, 6.0  ;;  %v4218_v9 = vadd.f32 %v10592_v56, %v10470_v27 }
 0x1d9   :  { %v5870_v2 = vrot.slane %v5869_v58, 4  ;;  %v5345_v8 = vmin.f32 %v4833_v6, 6.0  ;;  %v3186_v11 = vadd.f32 %v10592_v56, %v3185_v15  ;;  %v10603_v55 = vpop.f32.mrf.mxu1  ;;  %v4838_v6 = vmax.f32 %v3194_v34, 0.0 }
 0x1da   :  { %v8238_v16 = vpop.f32.mrf.mxu0  ;;  %v6173_v50 = vadd.f32 %v6172_v51, %v5602_v36  ;;  %v5604_v61 = vmin.f32 %v5092_v43, 6.0  ;;  %8604 = vmatmul.mubr.msk.bf16.gmra.mxu1 %vm1850_vm1, %v8980_v52 }
 0x1db   :  { %v5871_v45 = vadd.f32 %v5870_v2, %v5869_v58  ;;  %v5876_v22 = vadd.f32 %v5345_v8, %v5344_v20  ;;  %v4836_v1 = vmax.f32 %v3186_v11, 0.0  ;;  %v10614_v57 = vpop.f32.mrf.mxu1  ;;  %v3197_v58 = vadd.f32 %v10592_v56, %v8238_v16  ;;  %8607 = vmatprep.mubr.msk.bf16.mxu1 %vm1850_vm1, %v8983_v17  ;;  %v8984_v17 = vld [vmem:[%s11524_s0 + $0x7e8] sm:$0xff]  }
 0x1dc   :  { %v3188_v47 = vpop.f32.mrf.mxu0  ;;  %v6174_v35 = vadd.f32 %v6173_v50, %v5603_v29  ;;  %v4221_v16 = vadd.f32 %v10592_v56, %v10490_v10 }
 0x1dd   :  { %v5872_v38 = vrot.slane %v5871_v45, 2  ;;  %v5877_v24 = vadd.f32 %v5876_v22, %v5346_v23  ;;  %v3189_v14 = vadd.f32 %v10592_v56, %v3188_v47  ;;  %v10621_v48 = vpop.f32.mrf.mxu1  ;;  %v5348_v2 = vmin.f32 %v4836_v1, 6.0  ;;  %v8945_v22 = vld [vmem:[%s11524_s0 + $0x3b8] sm:$0xff]  }
 0x1de   :  { %v8241_v15 = vpop.f32.mrf.mxu0  ;;  %8336 = vmatmul.mubr.msk.bf16.gmra.mxu0 %vm1850_vm1, %v8941_v26  ;;  %v6175_v34 = vadd.f32 %v6174_v35, %v5604_v61  ;;  %v4839_v51 = vmax.f32 %v3197_v58, 0.0  ;;  %v5094_v1 = vmax.f32 %v4218_v9, 0.0  ;;  %v5350_v47 = vmin.f32 %v4838_v6, 6.0  ;;  %v8948_v61 = vld [vmem:[%s11524_s0 + $0x3c0] sm:$0xff]  }
 0x1df   :  { %v5873_v36 = vadd.f32 %v5872_v38, %v5871_v45  ;;  %v5878_v20 = vadd.f32 %v5877_v24, %v5347_v37  ;;  %v4837_v8 = vmax.f32 %v3189_v14, 0.0  ;;  %8339 = vmatprep.mubr.msk.bf16.mxu0 %vm1850_vm1, %v8944_v44  ;;  %v10628_v26 = vpop.f32.mrf.mxu1  ;;  %v3210_v52 = vadd.f32 %v10592_v56, %v8241_v15  ;;  %v8985_v38 = vld [vmem:[%s11524_s0 + $0x7f0] sm:$0xff]  }
 0x1e0   :  { %v3201_v11 = vpop.f32.mrf.mxu0  ;;  %v4213_v44 = vadd.f32 %v10592_v56, %v10502_v28  ;;  %v5095_v14 = vmax.f32 %v4221_v16, 0.0 }
 0x1e1   :  { %v5874_v27 = vrot.slane %v5873_v36, 1  ;;  %v5879_v29 = vadd.f32 %v5878_v20, %v5348_v2  ;;  %v5349_v43 = vmin.f32 %v4837_v8, 6.0  ;;  %v3202_v45 = vadd.f32 %v10592_v56, %v3201_v11  ;;  %v10637_v10 = vpop.f32.mrf.mxu1 }
 0x1e2   :  { %v8242_v23 = vpop.f32.mrf.mxu0  ;;  %v5093_v15 = vmax.f32 %v4213_v44, 0.0  ;;  %v4842_v20 = vmax.f32 %v3210_v52, 0.0  ;;  %v5606_v11 = vmin.f32 %v5094_v1, 6.0  ;;  %8608 = vmatmul.mubr.msk.bf16.gmra.mxu1 %vm1850_vm1, %v8984_v17  ;;  %v5607_v44 = vmin.f32 %v5095_v14, 6.0 }
 0x1e3   :  { %v5875_v37 = vadd.f32 %v5874_v27, %v5873_v36  ;;  %v5880_v50 = vadd.f32 %v5879_v29, %v5349_v43  ;;  %v4840_v24 = vmax.f32 %v3202_v45, 0.0  ;;  %v3213_v28 = vadd.f32 %v10592_v56, %v8242_v23  ;;  %v10649_v9 = vpop.f32.mrf.mxu1  ;;  %8611 = vmatprep.mubr.msk.bf16.mxu1 %vm1850_vm1, %v8985_v38 }
 0x1e4   :  { %v3204_v58 = vpop.f32.mrf.mxu0  ;;  %v5351_v36 = vmin.f32 %v4839_v51, 6.0  ;;  %v5605_v27 = vmin.f32 %v5093_v15, 6.0  ;;  %v4234_v29 = vadd.f32 %v10592_v56, %v10506_v63 }
 0x1e5   :  { %v6324_v35 = vmul.f32 0.00390625, %v5875_v37  ;;  %v5881_v6 = vadd.f32 %v5880_v50, %v5350_v47  ;;  %v3205_v2 = vadd.f32 %v10592_v56, %v3204_v58  ;;  %v10655_v43 = vpop.f32.mrf.mxu1  ;;  %v5352_v45 = vmin.f32 %v4840_v24, 6.0 }
 0x1e6   :  { %v8245_v8 = vpop.f32.mrf.mxu0  ;;  %8340 = vmatmul.mubr.msk.bf16.gmra.mxu0 %vm1850_vm1, %v8945_v22  ;;  %v4843_v52 = vmax.f32 %v3213_v28, 0.0  ;;  %v6176_v37 = vadd.f32 %v6175_v34, %v5605_v27  ;;  %v5354_v24 = vmin.f32 %v4842_v20, 6.0  ;;  %v5098_v28 = vmax.f32 %v4234_v29, 0.0  ;;  %v8986_v34 = vld [vmem:[%s11524_s0 + $0x7f8] sm:$0xff]  }
 0x1e7   :  { %v6340_v16 = vpack.c.bf16 %v6324_v35, %v6324_v35  ;;  %v5882_v23 = vadd.f32 %v5881_v6, %v5351_v36  ;;  %v4841_v51 = vmax.f32 %v3205_v2, 0.0  ;;  %8343 = vmatprep.mubr.msk.bf16.mxu0 %vm1850_vm1, %v8948_v61  ;;  %v3226_v22 = vadd.f32 %v10592_v56, %v8245_v8  ;;  %v10661_v47 = vpop.f32.mrf.mxu1  ;;  %v8949_v61 = vld [vmem:[%s11524_s0 + $0x3c8] sm:$0xff]   ;;  %v8952_v8 = vld [vmem:[%s11524_s0 + $0x3d0] sm:$0xff]  }
 0x1e8   :  { %v3217_v1 = vpop.f32.mrf.mxu0  ;;  %v6177_v38 = vadd.f32 %v6176_v37, %v5606_v11  ;;  %v4226_v35 = vadd.f32 %v10592_v56, %v10515_v59 }
 0x1e9   :  { %v6395_v63 = vunpack.c.l.b16 %v6340_v16  ;;  %v5883_v50 = vadd.f32 %v5882_v23, %v5352_v45  ;;  %v5353_v58 = vmin.f32 %v4841_v51, 6.0  ;;  %v3218_v17 = vadd.f32 %v10592_v56, %v3217_v1  ;;  %v10669_v14 = vpop.f32.mrf.mxu1 }
 0x1ea   :  { %v8246_v15 = vpop.f32.mrf.mxu0  ;;  %v4846_v11 = vmax.f32 %v3226_v22, 0.0  ;;  %v5096_v27 = vmax.f32 %v4226_v35, 0.0  ;;  %v6178_v29 = vadd.f32 %v6177_v38, %v5607_v44  ;;  %v4237_v16 = vadd.f32 %v10592_v56, %v10522_v39  ;;  %8612 = vmatmul.mubr.msk.bf16.gmra.mxu1 %vm1850_vm1, %v8986_v34 }
 0x1eb   :  { %v10676_v36 = vsel %vm6412_vm4, %v6395_v63, %v10376_v49  ;;  %v5884_v6 = vadd.f32 %v5883_v50, %v5353_v58  ;;  %v4844_v2 = vmax.f32 %v3218_v17, 0.0  ;;  %v3229_v20 = vadd.f32 %v10592_v56, %v8246_v15  ;;  %v10684_v45 = vpop.f32.mrf.mxu1 }
 0x1ec   :  { %v3220_v59 = vpop.f32.mrf.mxu0  ;;  %v5355_v23 = vmin.f32 %v4843_v52, 6.0  ;;  %v5610_v63 = vmin.f32 %v5098_v28, 6.0  ;;  %v5608_v50 = vmin.f32 %v5096_v27, 6.0  ;;  %v4229_v22 = vadd.f32 %v10592_v56, %v10537_v40 }
 0x1ed   :  { %v5885_v49 = vadd.f32 %v5884_v6, %v5354_v24  ;;  %v3221_v51 = vadd.f32 %v10592_v56, %v3220_v59  ;;  %v4847_v1 = vmax.f32 %v3229_v20, 0.0  ;;  %v10690_v58 = vpop.f32.mrf.mxu1  ;;  %v5356_v39 = vmin.f32 %v4844_v2, 6.0 }
 0x1ee   :  { %v8249_v37 = vpop.f32.mrf.mxu0  ;;  %8344 = vmatmul.mubr.msk.bf16.gmra.mxu0 %vm1850_vm1, %v8949_v61  ;;  %v5099_v52 = vmax.f32 %v4237_v16, 0.0  ;;  %v5358_v24 = vmin.f32 %v4846_v11, 6.0  ;;  %v6179_v38 = vadd.f32 %v6178_v29, %v5608_v50  ;;  %v5097_v35 = vmax.f32 %v4229_v22, 0.0 }
 0x1ef   :  { %v5886_v44 = vadd.f32 %v5885_v49, %v5355_v23  ;;  %v4845_v17 = vmax.f32 %v3221_v51, 0.0  ;;  %8347 = vmatprep.mubr.msk.bf16.mxu0 %vm1850_vm1, %v8952_v8  ;;  %v4250_v61 = vadd.f32 %v10592_v56, %v10544_v32  ;;  %v10696_v28 = vpop.f32.mrf.mxu1  ;;  %v3242_v20 = vadd.f32 %v10592_v56, %v8249_v37  ;;  %v8953_v8 = vld [vmem:[%s11524_s0 + $0x3d8] sm:$0xff]   ;;  %v8956_v51 = vld [vmem:[%s11524_s0 + $0x3e0] sm:$0xff]  }
 0x1f0   :  { %v3233_v15 = vpop.f32.mrf.mxu0  ;;  %v5359_v2 = vmin.f32 %v4847_v1, 6.0  ;;  %v5609_v11 = vmin.f32 %v5097_v35, 6.0  ;;  %v4242_v27 = vadd.f32 %v10592_v56, %v10551_v19  ;;  %v4253_v32 = vadd.f32 %v10592_v56, %v10562_v5 }
 0x1f1   :  { %v5887_v40 = vadd.f32 %v5886_v44, %v5356_v39  ;;  %v5357_v6 = vmin.f32 %v4845_v17, 6.0  ;;  %v3234_v34 = vadd.f32 %v10592_v56, %v3233_v15  ;;  %v10707_v29 = vpop.f32.mrf.mxu1  ;;  %v5611_v1 = vmin.f32 %v5099_v52, 6.0 }
 0x1f2   :  { %v8250_v59 = vpop.f32.mrf.mxu0  ;;  %v6180_v50 = vadd.f32 %v6179_v38, %v5609_v11  ;;  %v5102_v22 = vmax.f32 %v4250_v61, 0.0  ;;  %v5100_v39 = vmax.f32 %v4242_v27, 0.0  ;;  %v4245_v19 = vadd.f32 %v10592_v56, %v10577_v42 }
 0x1f3   :  { %v5888_v16 = vadd.f32 %v5887_v40, %v5357_v6  ;;  %v4848_v23 = vmax.f32 %v3234_v34, 0.0  ;;  %v3245_v49 = vadd.f32 %v10592_v56, %v8250_v59  ;;  %v10715_v44 = vpop.f32.mrf.mxu1  ;;  %v4850_v17 = vmax.f32 %v3242_v20, 0.0 }
 0x1f4   :  { %v3236_v37 = vpop.f32.mrf.mxu0  ;;  %v5103_v35 = vmax.f32 %v4253_v32, 0.0  ;;  %v6181_v34 = vadd.f32 %v6180_v50, %v5610_v63  ;;  %v5612_v52 = vmin.f32 %v5100_v39, 6.0  ;;  %v5101_v59 = vmax.f32 %v4245_v19, 0.0 }
 0x1f5   :  { %v5889_v5 = vadd.f32 %v5888_v16, %v5358_v24  ;;  %v3237_v15 = vadd.f32 %v10592_v56, %v3236_v37  ;;  %v5360_v40 = vmin.f32 %v4848_v23, 6.0  ;;  %v10719_v38 = vpop.f32.mrf.mxu1  ;;  %v4851_v11 = vmax.f32 %v3245_v49, 0.0 }
 0x1f6   :  { %v8253_v6 = vpop.f32.mrf.mxu0  ;;  %8348 = vmatmul.mubr.msk.bf16.gmra.mxu0 %vm1850_vm1, %v8953_v8  ;;  %v6182_v20 = vadd.f32 %v6181_v34, %v5611_v1  ;;  %v5613_v16 = vmin.f32 %v5101_v59, 6.0  ;;  %v4266_v32 = vadd.f32 %v10592_v56, %v10582_v0  ;;  %v4258_v63 = vadd.f32 %v10592_v56, %v10596_v30  ;;  %v8960_v34 = vld [vmem:[%s11524_s0 + $0x3f0] sm:$0xff]  }
 0x1f7   :  { %v5890_v61 = vadd.f32 %v5889_v5, %v5359_v2  ;;  %v4849_v27 = vmax.f32 %v3237_v15, 0.0  ;;  %v3258_v42 = vadd.f32 %v10592_v56, %v8253_v6  ;;  %8351 = vmatprep.mubr.msk.bf16.mxu0 %vm1850_vm1, %v8956_v51  ;;  %v10727_v8 = vpop.f32.mrf.mxu1  ;;  %v8957_v51 = vld [vmem:[%s11524_s0 + $0x3e8] sm:$0xff]   ;;  %v5614_v1 = vmin.f32 %v5102_v22, 6.0 }
 0x1f8   :  { %v3249_v24 = vpop.f32.mrf.mxu0  ;;  %v6183_v39 = vadd.f32 %v6182_v20, %v5612_v52  ;;  %v5104_v19 = vmax.f32 %v4258_v63, 0.0  ;;  %v4269_v0 = vadd.f32 %v10592_v56, %v10603_v55  ;;  %v5362_v30 = vmin.f32 %v4850_v17, 6.0 }
 0x1f9   :  { %v5891_v23 = vadd.f32 %v5890_v61, %v5360_v40  ;;  %v5361_v37 = vmin.f32 %v4849_v27, 6.0  ;;  %v4854_v2 = vmax.f32 %v3258_v42, 0.0  ;;  %v3250_v49 = vadd.f32 %v10592_v56, %v3249_v24  ;;  %v10735_v5 = vpop.f32.mrf.mxu1 }
 0x1fa   :  { %v8254_v50 = vpop.f32.mrf.mxu0  ;;  %v5363_v59 = vmin.f32 %v4851_v11, 6.0  ;;  %v5615_v27 = vmin.f32 %v5103_v35, 6.0  ;;  %v6184_v22 = vadd.f32 %v6183_v39, %v5613_v16  ;;  %v5106_v20 = vmax.f32 %v4266_v32, 0.0 }
 0x1fb   :  { %v5892_v15 = vadd.f32 %v5891_v23, %v5361_v37  ;;  %v4852_v40 = vmax.f32 %v3250_v49, 0.0  ;;  %v3261_v6 = vadd.f32 %v10592_v56, %v8254_v50  ;;  %v10741_v52 = vpop.f32.mrf.mxu1  ;;  %v5366_v24 = vmin.f32 %v4854_v2, 6.0 }
 0x1fc   :  { %v3252_v61 = vpop.f32.mrf.mxu0  ;;  %v6185_v63 = vadd.f32 %v6184_v22, %v5614_v1  ;;  %v5616_v23 = vmin.f32 %v5104_v19, 6.0  ;;  %v5107_v37 = vmax.f32 %v4269_v0, 0.0  ;;  %v4261_v49 = vadd.f32 %v10592_v56, %v10614_v57 }
 0x1fd   :  { %v5893_v42 = vadd.f32 %v5892_v15, %v5362_v30  ;;  %v3253_v55 = vadd.f32 %v10592_v56, %v3252_v61  ;;  %v10747_v11 = vpop.f32.mrf.mxu1  ;;  %v5364_v35 = vmin.f32 %v4852_v40, 6.0  ;;  %v4855_v50 = vmax.f32 %v3261_v6, 0.0 }
 0x1fe   :  { %v8257_v17 = vpop.f32.mrf.mxu0  ;;  %8352 = vmatmul.mubr.msk.bf16.gmra.mxu0 %vm1850_vm1, %v8957_v51  ;;  %v6186_v30 = vadd.f32 %v6185_v63, %v5615_v27  ;;  %v5105_v32 = vmax.f32 %v4261_v49, 0.0  ;;  %v4282_v51 = vadd.f32 %v10592_v56, %v10621_v48  ;;  %v4274_v1 = vadd.f32 %v10592_v56, %v10628_v26 }
 0x1ff   :  { %v5894_v16 = vadd.f32 %v5893_v42, %v5363_v59  ;;  %v4853_v39 = vmax.f32 %v3253_v55, 0.0  ;;  %8355 = vmatprep.mubr.msk.bf16.mxu0 %vm1850_vm1, %v8960_v34  ;;  %v10754_v19 = vpop.f32.mrf.mxu1  ;;  %v3274_v15 = vadd.f32 %v10592_v56, %v8257_v17  ;;  %v8961_v34 = vld [vmem:[%s11524_s0 + $0x3f8] sm:$0xff]   ;;  %v5618_v59 = vmin.f32 %v5106_v20, 6.0  ;;  %v8964_v17 = vld [vmem:[%s11524_s0 + $0x400] sm:$0xff]  }
 0x200   :  { %v3265_v2 = vpop.f32.mrf.mxu0  ;;  %v6187_v61 = vadd.f32 %v6186_v30, %v5616_v23  ;;  %v5617_v27 = vmin.f32 %v5105_v32, 6.0  ;;  %v5108_v48 = vmax.f32 %v4274_v1, 0.0  ;;  %v5619_v63 = vmin.f32 %v5107_v37, 6.0 }
 0x201   :  { %v5895_v57 = vadd.f32 %v5894_v16, %v5364_v35  ;;  %v5365_v0 = vmin.f32 %v4853_v39, 6.0  ;;  %v3266_v40 = vadd.f32 %v10592_v56, %v3265_v2  ;;  %v10761_v22 = vpop.f32.mrf.mxu1  ;;  %v5110_v16 = vmax.f32 %v4282_v51, 0.0 }
 0x202   :  { %v8258_v6 = vpop.f32.mrf.mxu0  ;;  %v6188_v35 = vadd.f32 %v6187_v61, %v5617_v27  ;;  %v4285_v20 = vadd.f32 %v10592_v56, %v10637_v10  ;;  %v4277_v23 = vadd.f32 %v10592_v56, %v10649_v9  ;;  %v5367_v2 = vmin.f32 %v4855_v50, 6.0 }
 0x203   :  { %v5896_v26 = vadd.f32 %v5895_v57, %v5365_v0  ;;  %v4856_v42 = vmax.f32 %v3266_v40, 0.0  ;;  %v3277_v55 = vadd.f32 %v10592_v56, %v8258_v6  ;;  %v10771_v39 = vpop.f32.mrf.mxu1  ;;  %v4858_v32 = vmax.f32 %v3274_v15, 0.0 }
 0x204   :  { %v3268_v49 = vpop.f32.mrf.mxu0  ;;  %v6189_v37 = vadd.f32 %v6188_v35, %v5618_v59  ;;  %v5620_v40 = vmin.f32 %v5108_v48, 6.0  ;;  %v5109_v51 = vmax.f32 %v4277_v23, 0.0  ;;  %v5111_v9 = vmax.f32 %v4285_v20, 0.0 }
 0x205   :  { %v5897_v30 = vadd.f32 %v5896_v26, %v5366_v24  ;;  %v3269_v1 = vadd.f32 %v10592_v56, %v3268_v49  ;;  %v5368_v57 = vmin.f32 %v4856_v42, 6.0  ;;  %v10775_v6 = vpop.f32.mrf.mxu1  ;;  %v4859_v61 = vmax.f32 %v3277_v55, 0.0  ;;  %v8988_v55 = vld [vmem:[%s11527_s3 + $0x10] sm:$0xff]  }
 0x206   :  { %v8261_v0 = vpop.f32.mrf.mxu0  ;;  %8356 = vmatmul.mubr.msk.bf16.gmra.mxu0 %vm1850_vm1, %v8961_v34  ;;  %v5622_v24 = vmin.f32 %v5110_v16, 6.0  ;;  %v6190_v15 = vadd.f32 %v6189_v37, %v5619_v63  ;;  %v5621_v26 = vmin.f32 %v5109_v51, 6.0  ;;  %v4298_v42 = vadd.f32 %v10592_v56, %v10655_v43  ;;  %v8966_v63 = vld [vmem:[%s11524_s0 + $0x408] sm:$0xff]   ;;  %8626 = vmatpush3.bf16.msra.mxu1 %v8988_v55 }
 0x207   :  { %v5898_v10 = vadd.f32 %v5897_v30, %v5367_v2  ;;  %v4857_v27 = vmax.f32 %v3269_v1, 0.0  ;;  %8359 = vmatprep.mubr.msk.bf16.mxu0 %vm1850_vm1, %v8964_v17  ;;  %v10780_v49 = vpop.f32.mrf.mxu1  ;;  %v3290_v48 = vadd.f32 %v10592_v56, %v8261_v0  ;;  %v5370_v17 = vmin.f32 %v4858_v32, 6.0  ;;  %v8969_v32 = vld [vmem:[%s11524_s0 + $0x410] sm:$0xff]   ;;  %8627 = vmatprep.subr.bf16.mxu1 %v11533_v4 }
 0x208   :  { %v3281_v50 = vpop.f32.mrf.mxu0  ;;  %v6191_v16 = vadd.f32 %v6190_v15, %v5620_v40  ;;  %v4290_v43 = vadd.f32 %v10592_v56, %v10661_v47  ;;  %v4301_v23 = vadd.f32 %v10592_v56, %v10669_v14  ;;  %v5371_v30 = vmin.f32 %v4859_v61, 6.0 }
 0x209   :  { %v5899_v34 = vadd.f32 %v5898_v10, %v5368_v57  ;;  %v5369_v59 = vmin.f32 %v4857_v27, 6.0  ;;  %v3282_v35 = vadd.f32 %v10592_v56, %v3281_v50  ;;  %v10794_v2 = vpop.f32.mrf.mxu1  ;;  %v5623_v0 = vmin.f32 %v5111_v9, 6.0 }
 0x20a   :  { %v8262_v20 = vpop.f32.mrf.mxu0  ;;  %v6192_v51 = vadd.f32 %v6191_v16, %v5621_v26  ;;  %v5112_v10 = vmax.f32 %v4290_v43, 0.0  ;;  %v4293_v47 = vadd.f32 %v10592_v56, %v10684_v45  ;;  %v4862_v27 = vmax.f32 %v3290_v48, 0.0 }
 0x20b   :  { %v5900_v1 = vadd.f32 %v5899_v34, %v5369_v59  ;;  %v4860_v57 = vmax.f32 %v3282_v35, 0.0  ;;  %v3293_v37 = vadd.f32 %v10592_v56, %v8262_v20  ;;  %v10802_v14 = vpop.f32.mrf.mxu1  ;;  %v5114_v15 = vmax.f32 %v4298_v42, 0.0 }
 0x20c   :  { %v3284_v40 = vpop.f32.mrf.mxu0  ;;  %v6193_v9 = vadd.f32 %v6192_v51, %v5622_v24  ;;  %v5624_v59 = vmin.f32 %v5112_v10, 6.0  ;;  %v5115_v35 = vmax.f32 %v4301_v23, 0.0  ;;  %v5113_v26 = vmax.f32 %v4293_v47, 0.0 }
 0x20d   :  { %v5901_v61 = vadd.f32 %v5900_v1, %v5370_v17  ;;  %v3285_v50 = vadd.f32 %v10592_v56, %v3284_v40  ;;  %v10807_v55 = vpop.f32.mrf.mxu1  ;;  %v5372_v20 = vmin.f32 %v4860_v57, 6.0  ;;  %v4863_v48 = vmax.f32 %v3293_v37, 0.0 }
 0x20e   :  { %v8265_v34 = vpop.f32.mrf.mxu0  ;;  %8360 = vmatmul.mubr.msk.bf16.gmra.mxu0 %vm1850_vm1, %v8966_v63  ;;  %v6194_v1 = vadd.f32 %v6193_v9, %v5623_v0  ;;  %v5625_v42 = vmin.f32 %v5113_v26, 6.0  ;;  %v4306_v63 = vadd.f32 %v10592_v56, %v10696_v28  ;;  %v5626_v0 = vmin.f32 %v5114_v15, 6.0  ;;  %v8973_v9 = vld [vmem:[%s11524_s0 + $0x420] sm:$0xff]  }
 0x20f   :  { %v5902_v45 = vadd.f32 %v5901_v61, %v5371_v30  ;;  %v4861_v16 = vmax.f32 %v3285_v50, 0.0  ;;  %v3306_v43 = vadd.f32 %v10592_v56, %v8265_v34  ;;  %8363 = vmatprep.mubr.msk.bf16.mxu0 %vm1850_vm1, %v8969_v32  ;;  %v10813_v24 = vpop.f32.mrf.mxu1  ;;  %v4314_v30 = vadd.f32 %v10592_v56, %v10690_v58  ;;  %v8970_v32 = vld [vmem:[%s11524_s0 + $0x418] sm:$0xff]  }
 0x210   :  { %v3297_v17 = vpop.f32.mrf.mxu0  ;;  %v6195_v37 = vadd.f32 %v6194_v1, %v5624_v59  ;;  %v5116_v47 = vmax.f32 %v4306_v63, 0.0  ;;  %v5374_v28 = vmin.f32 %v4862_v27, 6.0  ;;  %v4317_v58 = vadd.f32 %v10592_v56, %v10707_v29 }
 0x211   :  { %v5903_v23 = vadd.f32 %v5902_v45, %v5372_v20  ;;  %v5373_v40 = vmin.f32 %v4861_v16, 6.0  ;;  %v3298_v51 = vadd.f32 %v10592_v56, %v3297_v17  ;;  %v4866_v57 = vmax.f32 %v3306_v43, 0.0  ;;  %v10821_v61 = vpop.f32.mrf.mxu1 }
 0x212   :  { %v8266_v10 = vpop.f32.mrf.mxu0  ;;  %v5375_v26 = vmin.f32 %v4863_v48, 6.0  ;;  %v5627_v45 = vmin.f32 %v5115_v35, 6.0  ;;  %v6196_v16 = vadd.f32 %v6195_v37, %v5625_v42  ;;  %v5118_v17 = vmax.f32 %v4314_v30, 0.0 }
 0x213   :  { %v5904_v50 = vadd.f32 %v5903_v23, %v5373_v40  ;;  %v3309_v34 = vadd.f32 %v10592_v56, %v8266_v10  ;;  %v10829_v15 = vpop.f32.mrf.mxu1  ;;  %v4864_v43 = vmax.f32 %v3298_v51, 0.0  ;;  %v5378_v1 = vmin.f32 %v4866_v57, 6.0 }
 0x214   :  { %v3300_v20 = vpop.f32.mrf.mxu0  ;;  %v6197_v23 = vadd.f32 %v6196_v16, %v5626_v0  ;;  %v5628_v40 = vmin.f32 %v5116_v47, 6.0  ;;  %v4309_v29 = vadd.f32 %v10592_v56, %v10715_v44  ;;  %v5119_v51 = vmax.f32 %v4317_v58, 0.0  ;;  %v8974_v58 = vld [vmem:[%s11524_s0 + $0x428] sm:$0xff]  }
 0x215   :  { %v5905_v59 = vadd.f32 %v5904_v50, %v5374_v28  ;;  %v3301_v27 = vadd.f32 %v10592_v56, %v3300_v20  ;;  %v10835_v48 = vpop.f32.mrf.mxu1  ;;  %v4867_v42 = vmax.f32 %v3309_v34, 0.0  ;;  %v4330_v57 = vadd.f32 %v10592_v56, %v10719_v38 }
 0x216   :  { %v8269_v63 = vpop.f32.mrf.mxu0  ;;  %8364 = vmatmul.mubr.msk.bf16.gmra.mxu0 %vm1850_vm1, %v8970_v32  ;;  %v6198_v28 = vadd.f32 %v6197_v23, %v5627_v45  ;;  %v5117_v30 = vmax.f32 %v4309_v29, 0.0  ;;  %v4322_v32 = vadd.f32 %v10592_v56, %v10727_v8  ;;  %v5376_v47 = vmin.f32 %v4864_v43, 6.0  ;;  %v8977_v43 = vld [vmem:[%s11524_s0 + $0x430] sm:$0xff]  }
 0x217   :  { %v5906_v35 = vadd.f32 %v5905_v59, %v5375_v26  ;;  %v4865_v10 = vmax.f32 %v3301_v27, 0.0  ;;  %8367 = vmatprep.mubr.msk.bf16.mxu0 %vm1850_vm1, %v8973_v9  ;;  %v10842_v0 = vpop.f32.mrf.mxu1  ;;  %v3322_v26 = vadd.f32 %v10592_v56, %v8269_v63  ;;  %v5630_v20 = vmin.f32 %v5118_v17, 6.0 }
 0x218   :  { %v3313_v37 = vpop.f32.mrf.mxu0  ;;  %v6199_v45 = vadd.f32 %v6198_v28, %v5628_v40  ;;  %v5629_v38 = vmin.f32 %v5117_v30, 6.0  ;;  %v5631_v23 = vmin.f32 %v5119_v51, 6.0  ;;  %v5379_v29 = vmin.f32 %v4867_v42, 6.0 }
 0x219   :  { %v5907_v44 = vrot.slane %v5906_v35, 4  ;;  %v5377_v50 = vmin.f32 %v4865_v10, 6.0  ;;  %v3314_v34 = vadd.f32 %v10592_v56, %v3313_v37  ;;  %v10849_v16 = vpop.f32.mrf.mxu1  ;;  %v5122_v37 = vmax.f32 %v4330_v57, 0.0 }
 0x21a   :  { %v8270_v9 = vpop.f32.mrf.mxu0  ;;  %v6200_v10 = vadd.f32 %v6199_v45, %v5629_v38  ;;  %v5120_v4 = vmax.f32 %v4322_v32, 0.0  ;;  %v4870_v30 = vmax.f32 %v3322_v26, 0.0  ;;  %v4333_v42 = vadd.f32 %v10592_v56, %v10735_v5 }
 0x21b   :  { %v5908_v8 = vadd.f32 %v5907_v44, %v5906_v35  ;;  %v5913_v59 = vadd.f32 %v5377_v50, %v5376_v47  ;;  %v4868_v27 = vmax.f32 %v3314_v34, 0.0  ;;  %v10854_v21 = vpop.f32.mrf.mxu1  ;;  %v3325_v28 = vadd.f32 %v10592_v56, %v8270_v9 }
 0x21c   :  { %v3316_v63 = vpop.f32.mrf.mxu0  ;;  %v6201_v47 = vadd.f32 %v6200_v10, %v5630_v20  ;;  %v4325_v51 = vadd.f32 %v10592_v56, %v10741_v52  ;;  %v5634_v45 = vmin.f32 %v5122_v37, 6.0 }
 0x21d   :  { %v5909_v17 = vrot.slane %v5908_v8, 2  ;;  %v5914_v40 = vadd.f32 %v5913_v59, %v5378_v1  ;;  %v3317_v35 = vadd.f32 %v10592_v56, %v3316_v63  ;;  %v10863_v57 = vpop.f32.mrf.mxu1  ;;  %v5380_v50 = vmin.f32 %v4868_v27, 6.0 }
 0x21e   :  { %v8273_v44 = vpop.f32.mrf.mxu0  ;;  %8368 = vmatmul.mubr.msk.bf16.gmra.mxu0 %vm1850_vm1, %v8974_v58  ;;  %v10866_v26 = vadd.f32 %v6201_v47, %v5631_v23  ;;  %v5632_v58 = vmin.f32 %v5120_v4, 6.0  ;;  %v5121_v20 = vmax.f32 %v4325_v51, 0.0  ;;  %v4871_v63 = vmax.f32 %v3325_v28, 0.0  ;;  %v8981_v28 = vld [vmem:[%s11524_s0 + $0x440] sm:$0xff]  }
 0x21f   :  { %v5910_v32 = vadd.f32 %v5909_v17, %v5908_v8  ;;  %v5915_v1 = vadd.f32 %v5914_v40, %v5379_v29  ;;  %v4869_v34 = vmax.f32 %v3317_v35, 0.0  ;;  %8371 = vmatprep.mubr.msk.bf16.mxu0 %vm1850_vm1, %v8977_v43  ;;  %v10868_v38 = vpop.f32.mrf.mxu1  ;;  %v3338_v10 = vadd.f32 %v10592_v56, %v8273_v44  ;;  %v8978_v43 = vld [vmem:[%s11524_s0 + $0x438] sm:$0xff]  }
 0x220   :  { %v3329_v9 = vpop.f32.mrf.mxu0  ;;  %11546 = vst [vmem:[#allocation12_spill] sm:$0xff] %v10866_v26  ;;  %v5123_v23 = vmax.f32 %v4333_v42, 0.0  ;;  %v5633_v29 = vmin.f32 %v5121_v20, 6.0  ;;  %v5382_v17 = vmin.f32 %v4870_v30, 6.0 }
 0x221   :  { %v5911_v5 = vrot.slane %v5910_v32, 1  ;;  %v5916_v59 = vadd.f32 %v5915_v1, %v5380_v50  ;;  %v5381_v52 = vmin.f32 %v4869_v34, 6.0  ;;  %v3330_v8 = vadd.f32 %v10592_v56, %v3329_v9  ;;  %v10875_v37 = vpop.f32.mrf.mxu1 }
 0x222   :  { %v8274_v27 = vpop.f32.mrf.mxu0  ;;  %v6209_v51 = vadd.f32 %v5633_v29, %v5632_v58  ;;  %v5383_v34 = vmin.f32 %v4871_v63, 6.0  ;;  %v4874_v20 = vmax.f32 %v3338_v10, 0.0  ;;  %v5635_v30 = vmin.f32 %v5123_v23, 6.0 }
 0x223   :  { %v5912_v4 = vadd.f32 %v5911_v5, %v5910_v32  ;;  %v5917_v40 = vadd.f32 %v5916_v59, %v5381_v52  ;;  %v4872_v35 = vmax.f32 %v3330_v8, 0.0  ;;  %v3341_v44 = vadd.f32 %v10592_v56, %v8274_v27  ;;  %v10881_v50 = vpop.f32.mrf.mxu1 }
 0x224   :  { %v3332_v47 = vpop.f32.mrf.mxu0  ;;  %v6210_v5 = vadd.f32 %v6209_v51, %v5634_v45  ;;  %v4346_v29 = vadd.f32 %v10592_v56, %v10747_v11  ;;  %v4338_v10 = vadd.f32 %v10592_v56, %v10754_v19 }
 0x225   :  { %v6325_v1 = vmul.f32 0.00390625, %v5912_v4  ;;  %v5918_v42 = vadd.f32 %v5917_v40, %v5382_v17  ;;  %v3333_v9 = vadd.f32 %v10592_v56, %v3332_v47  ;;  %v10885_v59 = vpop.f32.mrf.mxu1  ;;  %v5384_v8 = vmin.f32 %v4872_v35, 6.0 }
 0x226   :  { %v8277_v32 = vpop.f32.mrf.mxu0  ;;  %8372 = vmatmul.mubr.msk.bf16.gmra.mxu0 %vm1850_vm1, %v8978_v43  ;;  %v4875_v58 = vmax.f32 %v3341_v44, 0.0  ;;  %v5386_v40 = vmin.f32 %v4874_v20, 6.0  ;;  %v8982_v44 = vld [vmem:[%s11524_s0 + $0x448] sm:$0xff]   ;;  %v5124_v47 = vmax.f32 %v4338_v10, 0.0  ;;  %v6211_v11 = vadd.f32 %v6210_v5, %v5635_v30 }
 0x227   :  { %v6341_v52 = vpack.c.bf16 %v6325_v1, %v6325_v1  ;;  %v5919_v27 = vadd.f32 %v5918_v42, %v5383_v34  ;;  %v4873_v26 = vmax.f32 %v3333_v9, 0.0  ;;  %8375 = vmatprep.mubr.msk.bf16.mxu0 %vm1850_vm1, %v8981_v28  ;;  %v10892_v43 = vpop.f32.mrf.mxu1  ;;  %v3354_v35 = vadd.f32 %v10592_v56, %v8277_v32 }
 0x228   :  { %v3345_v63 = vpop.f32.mrf.mxu0  ;;  %v5636_v9 = vmin.f32 %v5124_v47, 6.0  ;;  %v4349_v20 = vadd.f32 %v10592_v56, %v10761_v22  ;;  %v5126_v5 = vmax.f32 %v4346_v29, 0.0  ;;  %v4362_v29 = vadd.f32 %v10592_v56, %v10775_v6 }
 0x229   :  { %v6396_v45 = vunpack.c.l.b16 %v6341_v52  ;;  %v5920_v23 = vadd.f32 %v5919_v27, %v5384_v8  ;;  %v5385_v4 = vmin.f32 %v4873_v26, 6.0  ;;  %v3346_v17 = vadd.f32 %v10592_v56, %v3345_v63  ;;  %v10899_v51 = vpop.f32.mrf.mxu1 }
 0x22a   :  { %v8278_v28 = vpop.f32.mrf.mxu0  ;;  %v5387_v52 = vmin.f32 %v4875_v58, 6.0  ;;  %v4878_v27 = vmax.f32 %v3354_v35, 0.0  ;;  %v6212_v10 = vadd.f32 %v6211_v11, %v5636_v9  ;;  %v5638_v9 = vmin.f32 %v5126_v5, 6.0 }
 0x22b   :  { %v10903_v19 = vsel %vm6414_vm5, %v6396_v45, %v10676_v36  ;;  %v5921_v1 = vadd.f32 %v5920_v23, %v5385_v4  ;;  %v4876_v26 = vmax.f32 %v3346_v17, 0.0  ;;  %v3357_v34 = vadd.f32 %v10592_v56, %v8278_v28  ;;  %v10908_v32 = vpop.f32.mrf.mxu1 }
 0x22c   :  { %v3348_v42 = vpop.f32.mrf.mxu0  ;;  %v4341_v45 = vadd.f32 %v10592_v56, %v10771_v39  ;;  %v5127_v28 = vmax.f32 %v4349_v20, 0.0 }
 0x22d   :  { %v5922_v8 = vadd.f32 %v5921_v1, %v5386_v40  ;;  %v3349_v30 = vadd.f32 %v10592_v56, %v3348_v42  ;;  %v5388_v63 = vmin.f32 %v4876_v26, 6.0  ;;  %v10914_v23 = vpop.f32.mrf.mxu1  ;;  %v4879_v22 = vmax.f32 %v3357_v34, 0.0 }
 0x22e   :  { %v8281_v36 = vpop.f32.mrf.mxu0  ;;  %8376 = vmatmul.mubr.msk.bf16.gmra.mxu0 %vm1850_vm1, %v8982_v44  ;;  %v5125_v47 = vmax.f32 %v4341_v45, 0.0  ;;  %v5390_v26 = vmin.f32 %v4878_v27, 6.0  ;;  %v4365_v27 = vadd.f32 %v10592_v56, %v10794_v2 }
 0x22f   :  { %v5923_v4 = vadd.f32 %v5922_v8, %v5387_v52  ;;  %v4877_v17 = vmax.f32 %v3349_v30, 0.0  ;;  %v3370_v58 = vadd.f32 %v10592_v56, %v8281_v36  ;;  %v10919_v35 = vpop.f32.mrf.mxu1  ;;  %v4354_v52 = vadd.f32 %v10592_v56, %v10780_v49 }
 0x230   :  { %v3361_v40 = vpop.f32.mrf.mxu0  ;;  %v5637_v34 = vmin.f32 %v5125_v47, 6.0  ;;  %v5391_v20 = vmin.f32 %v4879_v22, 6.0  ;;  %v5130_v47 = vmax.f32 %v4362_v29, 0.0 }
 0x231   :  { %v5924_v44 = vadd.f32 %v5923_v4, %v5388_v63  ;;  %v5389_v11 = vmin.f32 %v4877_v17, 6.0  ;;  %v4882_v1 = vmax.f32 %v3370_v58, 0.0  ;;  %v3362_v39 = vadd.f32 %v10592_v56, %v3361_v40  ;;  %v10924_v8 = vpop.f32.mrf.mxu1 }
 0x232   :  { %v8282_v42 = vpop.f32.mrf.mxu0  ;;  %v5639_v63 = vmin.f32 %v5127_v28, 6.0  ;;  %v6213_v4 = vadd.f32 %v6212_v10, %v5637_v34  ;;  %v5128_v17 = vmax.f32 %v4354_v52, 0.0  ;;  %v10935_v28 = vld [vmem:[%s11526_s2] ss:$0 sm:$0xff]  ;;  %v5131_v34 = vmax.f32 %v4365_v27, 0.0 }
 0x233   :  { %v5925_v30 = vadd.f32 %v5924_v44, %v5389_v11  ;;  %v4880_v36 = vmax.f32 %v3362_v39, 0.0  ;;  %v3373_v6 = vadd.f32 %v10592_v56, %v8282_v42  ;;  %v10929_v58 = vpop.f32.mrf.mxu1  ;;  %v5394_v40 = vmin.f32 %v4882_v1, 6.0 }
 0x234   :  { %v3364_v45 = vpop.f32.mrf.mxu0  ;;  %v6214_v44 = vadd.f32 %v6213_v4, %v5638_v9  ;;  %v5640_v11 = vmin.f32 %v5128_v17, 6.0  ;;  %v4357_v10 = vadd.f32 %v10935_v28, %v10802_v14  ;;  %v4378_v52 = vadd.f32 %v10935_v28, %v10807_v55 }
 0x235   :  { %v5926_v5 = vadd.f32 %v5925_v30, %v5390_v26  ;;  %v3365_v49 = vadd.f32 %v10592_v56, %v3364_v45  ;;  %v5392_v3 = vmin.f32 %v4880_v36, 6.0  ;;  %v10939_v2 = vpop.f32.mrf.mxu1  ;;  %v4883_v26 = vmax.f32 %v3373_v6, 0.0 }
 0x236   :  { %v8285_v22 = vpop.f32.mrf.mxu0  ;;  %v6215_v42 = vadd.f32 %v6214_v44, %v5639_v63  ;;  %v5129_v9 = vmax.f32 %v4357_v10, 0.0 }
 0x237   :  { %v5927_v39 = vadd.f32 %v5926_v5, %v5391_v20  ;;  %v4881_v1 = vmax.f32 %v3365_v49, 0.0  ;;  %v3386_v56 = vadd.f32 %v10935_v28, %v8285_v22  ;;  %v10944_v30 = vpop.f32.mrf.mxu1  ;;  %v5642_v20 = vmin.f32 %v5130_v47, 6.0 }
 0x238   :  { %v3377_v29 = vpop.f32.mrf.mxu0  ;;  %v6216_v6 = vadd.f32 %v6215_v42, %v5640_v11  ;;  %v5641_v5 = vmin.f32 %v5129_v9, 6.0  ;;  %v4370_v49 = vadd.f32 %v10935_v28, %v10813_v24  ;;  %v5395_v27 = vmin.f32 %v4883_v26, 6.0 }
 0x239   :  { %v5928_v36 = vadd.f32 %v5927_v39, %v5392_v3  ;;  %v5393_v45 = vmin.f32 %v4881_v1, 6.0  ;;  %v4886_v4 = vmax.f32 %v3386_v56, 0.0  ;;  %v3378_v14 = vadd.f32 %v10935_v28, %v3377_v29  ;;  %v10949_v63 = vpop.f32.mrf.mxu1 }
 0x23a   :  { %v8286_v17 = vpop.f32.mrf.mxu0  ;;  %v5643_v3 = vmin.f32 %v5131_v34, 6.0  ;;  %v6217_v39 = vadd.f32 %v6216_v6, %v5641_v5  ;;  %v5132_v1 = vmax.f32 %v4370_v49, 0.0  ;;  %v4381_v56 = vadd.f32 %v10935_v28, %v10821_v61 }
 0x23b   :  { %v5929_v22 = vadd.f32 %v5928_v36, %v5393_v45  ;;  %v4884_v44 = vmax.f32 %v3378_v14, 0.0  ;;  %v3389_v55 = vadd.f32 %v10935_v28, %v8286_v17  ;;  %v10954_v47 = vpop.f32.mrf.mxu1  ;;  %v5398_v29 = vmin.f32 %v4886_v4, 6.0 }
 0x23c   :  { %v3380_v10 = vpop.f32.mrf.mxu0  ;;  %v5134_v42 = vmax.f32 %v4378_v52, 0.0  ;;  %v6218_v36 = vadd.f32 %v6217_v39, %v5642_v20  ;;  %v5644_v45 = vmin.f32 %v5132_v1, 6.0  ;;  %v4373_v14 = vadd.f32 %v10935_v28, %v10829_v15 }
 0x23d   :  { %v5930_v11 = vadd.f32 %v5929_v22, %v5394_v40  ;;  %v3381_v24 = vadd.f32 %v10935_v28, %v3380_v10  ;;  %v5396_v9 = vmin.f32 %v4884_v44, 6.0  ;;  %v10959_v34 = vpop.f32.mrf.mxu1  ;;  %v4887_v6 = vmax.f32 %v3389_v55, 0.0 }
 0x23e   :  { %v8289_v26 = vpop.f32.mrf.mxu0  ;;  %v6219_v40 = vadd.f32 %v6218_v36, %v5643_v3  ;;  %v5135_v4 = vmax.f32 %v4381_v56, 0.0  ;;  %v5133_v22 = vmax.f32 %v4373_v14, 0.0  ;;  %v4394_v52 = vadd.f32 %v10935_v28, %v10835_v48 }
 0x23f   :  { %v5931_v17 = vadd.f32 %v5930_v11, %v5395_v27  ;;  %v4885_v5 = vmax.f32 %v3381_v24, 0.0  ;;  %v3402_v61 = vadd.f32 %v10935_v28, %v8289_v26  ;;  %v10964_v44 = vpop.f32.mrf.mxu1  ;;  %v5646_v27 = vmin.f32 %v5134_v42, 6.0 }
 0x240   :  { %v3393_v49 = vpop.f32.mrf.mxu0  ;;  %v6220_v55 = vadd.f32 %v6219_v40, %v5644_v45  ;;  %v5645_v11 = vmin.f32 %v5133_v22, 6.0  ;;  %v4386_v24 = vadd.f32 %v10935_v28, %v10842_v0  ;;  %v5399_v56 = vmin.f32 %v4887_v6, 6.0  ;;  %v8989_v6 = vld [vmem:[%s11527_s3 + $0x8] sm:$0xff]  }
 0x241   :  { %v5932_v20 = vadd.f32 %v5931_v17, %v5396_v9  ;;  %v5397_v10 = vmin.f32 %v4885_v5, 6.0  ;;  %v4890_v39 = vmax.f32 %v3402_v61, 0.0  ;;  %v3394_v15 = vadd.f32 %v10935_v28, %v3393_v49  ;;  %v10969_v3 = vpop.f32.mrf.mxu1  ;;  %8628 = vmatpush3.bf16.msra.mxu1 %v8989_v6 }
 0x242   :  { %v8290_v1 = vpop.f32.mrf.mxu0  ;;  %v5647_v9 = vmin.f32 %v5135_v4, 6.0  ;;  %v6221_v17 = vadd.f32 %v6220_v55, %v5645_v11  ;;  %v5136_v5 = vmax.f32 %v4386_v24, 0.0  ;;  %v4397_v61 = vadd.f32 %v10935_v28, %v10849_v16 }
 0x243   :  { %v5933_v26 = vadd.f32 %v5932_v20, %v5397_v10  ;;  %v4888_v36 = vmax.f32 %v3394_v15, 0.0  ;;  %v3405_v48 = vadd.f32 %v10935_v28, %v8290_v1  ;;  %v10974_v42 = vpop.f32.mrf.mxu1  ;;  %v5402_v49 = vmin.f32 %v4890_v39, 6.0 }
 0x244   :  { %v3396_v14 = vpop.f32.mrf.mxu0  ;;  %v5138_v40 = vmax.f32 %v4394_v52, 0.0  ;;  %v6222_v10 = vadd.f32 %v6221_v17, %v5646_v27  ;;  %v5648_v4 = vmin.f32 %v5136_v5, 6.0  ;;  %v4389_v15 = vadd.f32 %v10935_v28, %v10854_v21 }
 0x245   :  { %v5934_v45 = vadd.f32 %v5933_v26, %v5398_v29  ;;  %v3397_v0 = vadd.f32 %v10935_v28, %v3396_v14  ;;  %v5400_v22 = vmin.f32 %v4888_v36, 6.0  ;;  %v10982_v1 = vpop.f32.mrf.mxu1  ;;  %v4891_v55 = vmax.f32 %v3405_v48, 0.0 }
 0x246   :  { %v8293_v20 = vpop.f32.mrf.mxu0  ;;  %v6223_v11 = vadd.f32 %v6222_v10, %v5647_v9  ;;  %v5139_v24 = vmax.f32 %v4397_v61, 0.0  ;;  %v5137_v26 = vmax.f32 %v4389_v15, 0.0  ;;  %v4410_v36 = vadd.f32 %v10935_v28, %v10863_v57 }
 0x247   :  { %v5935_v16 = vadd.f32 %v5934_v45, %v5399_v56  ;;  %v4889_v29 = vmax.f32 %v3397_v0, 0.0  ;;  %v3418_v39 = vadd.f32 %v10935_v28, %v8293_v20  ;;  %v10987_v27 = vpop.f32.mrf.mxu1  ;;  %v11547_v14 = vmov 0.0  }
 0x248   :  { %v3409_v52 = vpop.f32.mrf.mxu0  ;;  %8629 = vmatprep.subr.bf16.mxu1 %v11547_v14  ;;  %v5650_v45 = vmin.f32 %v5138_v40, 6.0  ;;  %v6224_v0 = vadd.f32 %v6223_v11, %v5648_v4  ;;  %v5649_v6 = vmin.f32 %v5137_v26, 6.0  ;;  %v4402_v9 = vadd.f32 %v10935_v28, %v10868_v38  ;;  %8631 = vmatprep.mubr.msk.bf16.mxu1 %vm9085_vm8, %v11547_v14 }
 0x249   :  { %v5936_v21 = vadd.f32 %v5935_v16, %v5400_v22  ;;  %v5401_v17 = vmin.f32 %v4889_v29, 6.0  ;;  %v4894_v5 = vmax.f32 %v3418_v39, 0.0  ;;  %v3410_v56 = vadd.f32 %v10935_v28, %v3409_v52  ;;  %v10993_v61 = vpop.f32.mrf.mxu1 }
 0x24a   :  { %v8294_v48 = vpop.f32.mrf.mxu0  ;;  %v5403_v20 = vmin.f32 %v4891_v55, 6.0  ;;  %v5651_v22 = vmin.f32 %v5139_v24, 6.0  ;;  %v6225_v16 = vadd.f32 %v6224_v0, %v5649_v6  ;;  %v5140_v29 = vmax.f32 %v4402_v9, 0.0 }
 0x24b   :  { %v5937_v57 = vadd.f32 %v5936_v21, %v5401_v17  ;;  %v4892_v10 = vmax.f32 %v3410_v56, 0.0  ;;  %v3421_v15 = vadd.f32 %v10935_v28, %v8294_v48  ;;  %v4413_v39 = vadd.f32 %v10935_v28, %v10875_v37  ;;  %v10998_v40 = vpop.f32.mrf.mxu1 }
 0x24c   :  { %v3412_v53 = vpop.f32.mrf.mxu0  ;;  %v5406_v52 = vmin.f32 %v4894_v5, 6.0  ;;  %v5142_v11 = vmax.f32 %v4410_v36, 0.0  ;;  %v6226_v21 = vadd.f32 %v6225_v16, %v5650_v45  ;;  %v5652_v17 = vmin.f32 %v5140_v29, 6.0 }
 0x24d   :  { %v5938_v4 = vadd.f32 %v5937_v57, %v5402_v49  ;;  %v3413_v38 = vadd.f32 %v10935_v28, %v3412_v53  ;;  %v5404_v26 = vmin.f32 %v4892_v10, 6.0  ;;  %v4405_v56 = vadd.f32 %v10935_v28, %v10881_v50  ;;  %v11003_v24 = vpop.f32.mrf.mxu1 }
 0x24e   :  { %v8297_v55 = vpop.f32.mrf.mxu0  ;;  %v4895_v0 = vmax.f32 %v3421_v15, 0.0  ;;  %v6227_v49 = vadd.f32 %v6226_v21, %v5651_v22  ;;  %v5143_v5 = vmax.f32 %v4413_v39, 0.0  ;;  %v4426_v53 = vadd.f32 %v10935_v28, %v10885_v59 }
 0x24f   :  { %v5939_v48 = vadd.f32 %v5938_v4, %v5403_v20  ;;  %v4893_v6 = vmax.f32 %v3413_v38, 0.0  ;;  %v3434_v37 = vadd.f32 %v10935_v28, %v8297_v55  ;;  %v5141_v57 = vmax.f32 %v4405_v56, 0.0  ;;  %v11008_v36 = vpop.f32.mrf.mxu1 }
 0x250   :  { %v3425_v9 = vpop.f32.mrf.mxu0  ;;  %v5654_v20 = vmin.f32 %v5142_v11, 6.0  ;;  %v6228_v15 = vadd.f32 %v6227_v49, %v5652_v17  ;;  %v4418_v38 = vadd.f32 %v10935_v28, %v10892_v43  ;;  %v5407_v39 = vmin.f32 %v4895_v0, 6.0 }
 0x251   :  { %v5940_v45 = vadd.f32 %v5939_v48, %v5404_v26  ;;  %v5405_v10 = vmin.f32 %v4893_v6, 6.0  ;;  %v4898_v16 = vmax.f32 %v3434_v37, 0.0  ;;  %v3426_v50 = vadd.f32 %v10935_v28, %v3425_v9  ;;  %v11013_v22 = vpop.f32.mrf.mxu1 }
 0x252   :  { %v8298_v29 = vpop.f32.mrf.mxu0  ;;  %v5653_v4 = vmin.f32 %v5141_v57, 6.0  ;;  %v5146_v21 = vmax.f32 %v4426_v53, 0.0  ;;  %v5655_v26 = vmin.f32 %v5143_v5, 6.0  ;;  %v5144_v6 = vmax.f32 %v4418_v38, 0.0 }
 0x253   :  { %v5941_v55 = vadd.f32 %v5940_v45, %v5405_v10  ;;  %v3437_v59 = vadd.f32 %v10935_v28, %v8298_v29  ;;  %v4429_v37 = vadd.f32 %v10935_v28, %v10899_v51  ;;  %v11018_v11 = vpop.f32.mrf.mxu1  ;;  %v5410_v9 = vmin.f32 %v4898_v16, 6.0 }
 0x254   :  { %v3428_v56 = vpop.f32.mrf.mxu0  ;;  %v6229_v48 = vadd.f32 %v6228_v15, %v5653_v4  ;;  %v4896_v49 = vmax.f32 %v3426_v50, 0.0  ;;  %v5656_v10 = vmin.f32 %v5144_v6, 6.0  ;;  %v4421_v53 = vadd.f32 %v10935_v28, %v10908_v32 }
 0x255   :  { %v5942_v17 = vadd.f32 %v5941_v55, %v5406_v52  ;;  %v3429_v43 = vadd.f32 %v10935_v28, %v3428_v56  ;;  %v4899_v57 = vmax.f32 %v3437_v59, 0.0  ;;  %v11023_v5 = vpop.f32.mrf.mxu1  ;;  %v5658_v4 = vmin.f32 %v5146_v21, 6.0 }
 0x256   :  { %v8301_v0 = vpop.f32.mrf.mxu0  ;;  %v6230_v45 = vadd.f32 %v6229_v48, %v5654_v20  ;;  %v5147_v51 = vmax.f32 %v4429_v37, 0.0  ;;  %v5145_v50 = vmax.f32 %v4421_v53, 0.0  ;;  %v4442_v55 = vadd.f32 %v10935_v28, %v10914_v23 }
 0x257   :  { %v5943_v29 = vadd.f32 %v5942_v17, %v5407_v39  ;;  %v4897_v15 = vmax.f32 %v3429_v43, 0.0  ;;  %v3450_v38 = vadd.f32 %v10935_v28, %v8301_v0  ;;  %v11028_v59 = vpop.f32.mrf.mxu1  ;;  %v5408_v56 = vmin.f32 %v4896_v49, 6.0 }
 0x258   :  { %v3441_v52 = vpop.f32.mrf.mxu0  ;;  %v6231_v16 = vadd.f32 %v6230_v45, %v5655_v26  ;;  %v5411_v6 = vmin.f32 %v4899_v57, 6.0  ;;  %v5657_v21 = vmin.f32 %v5145_v50, 6.0  ;;  %v4434_v37 = vadd.f32 %v10935_v28, %v10919_v35 }
 0x259   :  { %v5944_v20 = vrot.slane %v5943_v29, 4  ;;  %v5409_v48 = vmin.f32 %v4897_v15, 6.0  ;;  %v3442_v32 = vadd.f32 %v10935_v28, %v3441_v52  ;;  %v11033_v43 = vpop.f32.mrf.mxu1  ;;  %v5659_v23 = vmin.f32 %v5147_v51, 6.0 }
 0x25a   :  { %v8302_v39 = vpop.f32.mrf.mxu0  ;;  %v6232_v17 = vadd.f32 %v6231_v16, %v5656_v10  ;;  %v4902_v53 = vmax.f32 %v3450_v38, 0.0  ;;  %v5150_v49 = vmax.f32 %v4442_v55, 0.0  ;;  %v5148_v15 = vmax.f32 %v4434_v37, 0.0 }
 0x25b   :  { %v5945_v26 = vadd.f32 %v5944_v20, %v5943_v29  ;;  %v5950_v0 = vadd.f32 %v5409_v48, %v5408_v56  ;;  %v4900_v45 = vmax.f32 %v3442_v32, 0.0  ;;  %v11035_v31 = vpop.f32.mrf.mxu1  ;;  %v3453_v10 = vadd.f32 %v10935_v28, %v8302_v39 }
 0x25c   :  { %v3444_v7 = vpop.f32.mrf.mxu0  ;;  %v6233_v60 = vadd.f32 %v6232_v17, %v5657_v21  ;;  %v5660_v29 = vmin.f32 %v5148_v15, 6.0  ;;  %v4445_v51 = vadd.f32 %v10935_v28, %v10924_v8  ;;  %v5414_v32 = vmin.f32 %v4902_v53, 6.0 }
 0x25d   :  { %v5946_v57 = vrot.slane %v5945_v26, 2  ;;  %v5951_v52 = vadd.f32 %v5950_v0, %v5410_v9  ;;  %v3445_v16 = vadd.f32 %v10935_v28, %v3444_v7  ;;  %v5412_v35 = vmin.f32 %v4900_v45, 6.0  ;;  %v11041_v38 = vpop.f32.mrf.mxu1 }
 0x25e   :  { %v8305_v50 = vpop.f32.mrf.mxu0  ;;  %v6234_v13 = vadd.f32 %v6233_v60, %v5658_v4  ;;  %v4437_v7 = vadd.f32 %v10935_v28, %v10929_v58  ;;  %v4903_v21 = vmax.f32 %v3453_v10, 0.0  ;;  %v4450_v10 = vadd.f32 %v10935_v28, %v10944_v30 }
 0x25f   :  { %v5947_v20 = vadd.f32 %v5946_v57, %v5945_v26  ;;  %v5952_v55 = vadd.f32 %v5951_v52, %v5411_v6  ;;  %v4901_v56 = vmax.f32 %v3445_v16, 0.0  ;;  %v3466_v48 = vadd.f32 %v10935_v28, %v8305_v50  ;;  %v11046_v39 = vpop.f32.mrf.mxu1 }
 0x260   :  { %v3457_v9 = vpop.f32.mrf.mxu0  ;;  %v6235_v17 = vadd.f32 %v6234_v13, %v5659_v23  ;;  %v5151_v6 = vmax.f32 %v4445_v51, 0.0  ;;  %v5149_v45 = vmax.f32 %v4437_v7, 0.0  ;;  %v5662_v23 = vmin.f32 %v5150_v49, 6.0 }
 0x261   :  { %v5948_v60 = vrot.slane %v5947_v20, 1  ;;  %v5953_v4 = vadd.f32 %v5952_v55, %v5412_v35  ;;  %v5413_v37 = vmin.f32 %v4901_v56, 6.0  ;;  %v3458_v8 = vadd.f32 %v10935_v28, %v3457_v9  ;;  %v11049_v15 = vpop.f32.mrf.mxu1 }
 0x262   :  { %v8306_v0 = vpop.f32.mrf.mxu0  ;;  %v6236_v26 = vadd.f32 %v6235_v17, %v5660_v29  ;;  %v4906_v13 = vmax.f32 %v3466_v48, 0.0  ;;  %v5661_v50 = vmin.f32 %v5149_v45, 6.0  ;;  %v5415_v29 = vmin.f32 %v4903_v21, 6.0 }
 0x263   :  { %v5949_v53 = vadd.f32 %v5948_v60, %v5947_v20  ;;  %v5954_v57 = vadd.f32 %v5953_v4, %v5413_v37  ;;  %v4904_v52 = vmax.f32 %v3458_v8, 0.0  ;;  %v3469_v58 = vadd.f32 %v10935_v28, %v8306_v0  ;;  %v11054_v35 = vpop.f32.mrf.mxu1 }
 0x264   :  { %v3460_v16 = vpop.f32.mrf.mxu0  ;;  %v5663_v9 = vmin.f32 %v5151_v6, 6.0  ;;  %v6237_v48 = vadd.f32 %v6236_v26, %v5661_v50  ;;  %v4458_v49 = vadd.f32 %v10935_v28, %v10939_v2  ;;  %v5418_v37 = vmin.f32 %v4906_v13, 6.0 }
 0x265   :  { %v6326_v55 = vmul.f32 0.00390625, %v5949_v53  ;;  %v5955_v51 = vadd.f32 %v5954_v57, %v5414_v32  ;;  %v3461_v56 = vadd.f32 %v10935_v28, %v3460_v16  ;;  %v11059_v17 = vpop.f32.mrf.mxu1  ;;  %v5416_v60 = vmin.f32 %v4904_v52, 6.0 }
 0x266   :  { %v8309_v20 = vpop.f32.mrf.mxu0  ;;  %v4907_v8 = vmax.f32 %v3469_v58, 0.0  ;;  %v6238_v21 = vadd.f32 %v6237_v48, %v5662_v23  ;;  %v5152_v32 = vmax.f32 %v4450_v10, 0.0  ;;  %v5154_v50 = vmax.f32 %v4458_v49, 0.0 }
 0x267   :  { %v6342_v7 = vpack.c.bf16 %v6326_v55, %v6326_v55  ;;  %v5956_v4 = vadd.f32 %v5955_v51, %v5415_v29  ;;  %v4905_v30 = vmax.f32 %v3461_v56, 0.0  ;;  %v11061_v45 = vpop.f32.mrf.mxu1  ;;  %v4461_v52 = vadd.f32 %v10935_v28, %v10949_v63 }
 0x268   :  { %v3473_v0 = vpop.f32.mrf.mxu0  ;;  %v11064_v2 = vadd.f32 %v6238_v21, %v5663_v9  ;;  %v4453_v13 = vadd.f32 %v10935_v28, %v10954_v47  ;;  %v3482_v55 = vadd.f32 %v10935_v28, %v8309_v20  ;;  %v5664_v9 = vmin.f32 %v5152_v32, 6.0 }
 0x269   :  { %v6397_v53 = vunpack.c.l.b16 %v6342_v7  ;;  %v5957_v57 = vadd.f32 %v5956_v4, %v5416_v60  ;;  %v5417_v6 = vmin.f32 %v4905_v30, 6.0  ;;  %v3474_v26 = vadd.f32 %v10935_v28, %v3473_v0  ;;  %v11070_v58 = vpop.f32.mrf.mxu1 }
 0x26a   :  { %v8310_v16 = vpop.f32.mrf.mxu0  ;;  %v5155_v48 = vmax.f32 %v4461_v52, 0.0  ;;  %v5153_v49 = vmax.f32 %v4453_v13, 0.0  ;;  %v5419_v7 = vmin.f32 %v4907_v8, 6.0  ;;  %v5666_v30 = vmin.f32 %v5154_v50, 6.0 }
 0x26b   :  { %v11074_v23 = vsel %vm6416_vm6, %v6397_v53, %v10903_v19  ;;  %v5958_v10 = vadd.f32 %v5957_v57, %v5417_v6  ;;  %v4908_v29 = vmax.f32 %v3474_v26, 0.0  ;;  %v3485_v51 = vadd.f32 %v10935_v28, %v8310_v16  ;;  %v11078_v63 = vpop.f32.mrf.mxu1 }
 0x26c   :  { %v3476_v56 = vpop.f32.mrf.mxu0  ;;  %v5665_v19 = vmin.f32 %v5153_v49, 6.0  ;;  %v4910_v21 = vmax.f32 %v3482_v55, 0.0  ;;  %v5667_v32 = vmin.f32 %v5155_v48, 6.0  ;;  %v4466_v52 = vadd.f32 %v10935_v28, %v10964_v44 }
 0x26d   :  { %v5959_v47 = vadd.f32 %v5958_v10, %v5418_v37  ;;  %v3477_v60 = vadd.f32 %v10935_v28, %v3476_v56  ;;  %v11081_v0 = vpop.f32.mrf.mxu1  ;;  %v5420_v20 = vmin.f32 %v4908_v29, 6.0  ;;  %v4911_v6 = vmax.f32 %v3485_v51, 0.0 }
 0x26e   :  { %v8313_v4 = vpop.f32.mrf.mxu0  ;;  %v6246_v16 = vadd.f32 %v5665_v19, %v5664_v9  ;;  %v4474_v29 = vadd.f32 %v10935_v28, %v10959_v34  ;;  %v5156_v51 = vmax.f32 %v4466_v52, 0.0  ;;  %v5422_v9 = vmin.f32 %v4910_v21, 6.0 }
 0x26f   :  { %v5960_v53 = vadd.f32 %v5959_v47, %v5419_v7  ;;  %v4909_v57 = vmax.f32 %v3477_v60, 0.0  ;;  %v11085_v8 = vpop.f32.mrf.mxu1  ;;  %v3498_v50 = vadd.f32 %v10935_v28, %v8313_v4  ;;  %v5423_v4 = vmin.f32 %v4911_v6, 6.0 }
 0x270   :  { %v3489_v26 = vpop.f32.mrf.mxu0  ;;  %v6247_v55 = vadd.f32 %v6246_v16, %v5666_v30  ;;  %v5668_v60 = vmin.f32 %v5156_v51, 6.0  ;;  %v5158_v34 = vmax.f32 %v4474_v29, 0.0  ;;  %v4477_v21 = vadd.f32 %v10935_v28, %v10969_v3 }
 0x271   :  { %v5961_v37 = vadd.f32 %v5960_v53, %v5420_v20  ;;  %v5421_v13 = vmin.f32 %v4909_v57, 6.0  ;;  %v3490_v10 = vadd.f32 %v10935_v28, %v3489_v26  ;;  %v11091_v49 = vpop.f32.mrf.mxu1  ;;  %v4914_v57 = vmax.f32 %v3498_v50, 0.0 }
 0x272   :  { %v8314_v56 = vpop.f32.mrf.mxu0  ;;  %v6248_v19 = vadd.f32 %v6247_v55, %v5667_v32  ;;  %v4469_v52 = vadd.f32 %v10935_v28, %v10974_v42  ;;  %v5159_v55 = vmax.f32 %v4477_v21, 0.0  ;;  %v4490_v3 = vadd.f32 %v10935_v28, %v10982_v1 }
 0x273   :  { %v5962_v48 = vadd.f32 %v5961_v37, %v5421_v13  ;;  %v4912_v7 = vmax.f32 %v3490_v10, 0.0  ;;  %v3501_v44 = vadd.f32 %v10935_v28, %v8314_v56  ;;  %v11094_v20 = vpop.f32.mrf.mxu1 }
 0x274   :  { %v3492_v47 = vpop.f32.mrf.mxu0  ;;  %v6249_v16 = vadd.f32 %v6248_v19, %v5668_v60  ;;  %v5157_v51 = vmax.f32 %v4469_v52, 0.0  ;;  %v5671_v52 = vmin.f32 %v5159_v55, 6.0 }
 0x275   :  { %v5963_v53 = vadd.f32 %v5962_v48, %v5422_v9  ;;  %v3493_v30 = vadd.f32 %v10935_v28, %v3492_v47  ;;  %v5424_v37 = vmin.f32 %v4912_v7, 6.0  ;;  %v4915_v10 = vmax.f32 %v3501_v44, 0.0  ;;  %v11101_v56 = vpop.f32.mrf.mxu1 }
 0x276   :  { %v8317_v26 = vpop.f32.mrf.mxu0  ;;  %v5426_v47 = vmin.f32 %v4914_v57, 6.0  ;;  %v5670_v7 = vmin.f32 %v5158_v34, 6.0  ;;  %v5669_v60 = vmin.f32 %v5157_v51, 6.0  ;;  %v5162_v34 = vmax.f32 %v4490_v3, 0.0 }
 0x277   :  { %v5964_v13 = vadd.f32 %v5963_v53, %v5423_v4  ;;  %v4913_v32 = vmax.f32 %v3493_v30, 0.0  ;;  %v3514_v6 = vadd.f32 %v10935_v28, %v8317_v26  ;;  %v5427_v44 = vmin.f32 %v4915_v10, 6.0  ;;  %v11108_v30 = vpop.f32.mrf.mxu1 }
 0x278   :  { %v3505_v50 = vpop.f32.mrf.mxu0 }
 0x279   :  { %v5965_v9 = vadd.f32 %v5964_v13, %v5424_v37  ;;  %v5425_v29 = vmin.f32 %v4913_v32, 6.0  ;;  %v3506_v48 = vadd.f32 %v10935_v28, %v3505_v50  ;;  %v4918_v26 = vmax.f32 %v3514_v6, 0.0 }
 0x27a   :  { %v8318_v42 = vpop.f32.mrf.mxu0  ;;  %v6250_v37 = vadd.f32 %v6249_v16, %v5669_v60  ;;  %v4482_v13 = vadd.f32 %v10935_v28, %v10987_v27  ;;  %v4485_v6 = vadd.f32 %v10935_v28, %v10998_v40  ;;  %v11118_v27 = vpop.f32.mrf.mxu1 }
 0x27b   :  { %v5966_v19 = vadd.f32 %v5965_v9, %v5425_v29  ;;  %v4916_v4 = vmax.f32 %v3506_v48, 0.0  ;;  %v3517_v53 = vadd.f32 %v10935_v28, %v8318_v42  ;;  %v4493_v9 = vadd.f32 %v10935_v28, %v10993_v61 }
 0x27c   :  { %v3508_v21 = vpop.f32.mrf.mxu0  ;;  %v6251_v10 = vadd.f32 %v6250_v37, %v5670_v7  ;;  %v5160_v51 = vmax.f32 %v4482_v13, 0.0  ;;  %v5674_v13 = vmin.f32 %v5162_v34, 6.0  ;;  %v4509_v34 = vadd.f32 %v10935_v28, %v11013_v22 }
 0x27d   :  { %v5967_v32 = vadd.f32 %v5966_v19, %v5426_v47  ;;  %v5428_v1 = vmin.f32 %v4916_v4, 6.0  ;;  %v3509_v57 = vadd.f32 %v10935_v28, %v3508_v21  ;;  %v4919_v55 = vmax.f32 %v3517_v53, 0.0 }
 0x27e   :  { %v8321_v50 = vpop.f32.mrf.mxu0  ;;  %v5672_v42 = vmin.f32 %v5160_v51, 6.0  ;;  %v6252_v60 = vadd.f32 %v6251_v10, %v5671_v52  ;;  %v5163_v3 = vmax.f32 %v4493_v9, 0.0  ;;  %v5161_v19 = vmax.f32 %v4485_v6, 0.0  ;;  %v11124_v52 = vpop.f32.mrf.mxu1 }
 0x27f   :  { %v5968_v29 = vadd.f32 %v5967_v32, %v5427_v44  ;;  %v4917_v16 = vmax.f32 %v3509_v57, 0.0  ;;  %v3530_v48 = vadd.f32 %v10935_v28, %v8321_v50  ;;  %v4506_v53 = vadd.f32 %v10935_v28, %v11003_v24 }
 0x280   :  { %v3521_v47 = vpop.f32.mrf.mxu0  ;;  %v6253_v40 = vadd.f32 %v6252_v60, %v5672_v42  ;;  %v5673_v44 = vmin.f32 %v5161_v19, 6.0  ;;  %v5430_v32 = vmin.f32 %v4918_v26, 6.0  ;;  %v4498_v6 = vadd.f32 %v10935_v28, %v11008_v36 }
 0x281   :  { %v5969_v7 = vadd.f32 %v5968_v29, %v5428_v1  ;;  %v5429_v4 = vmin.f32 %v4917_v16, 6.0  ;;  %v4922_v21 = vmax.f32 %v3530_v48, 0.0  ;;  %v3522_v61 = vadd.f32 %v10935_v28, %v3521_v47 }
 0x282   :  { %v8322_v37 = vpop.f32.mrf.mxu0  ;;  %v5675_v1 = vmin.f32 %v5163_v3, 6.0  ;;  %v6254_v9 = vadd.f32 %v6253_v40, %v5673_v44  ;;  %v5431_v29 = vmin.f32 %v4919_v55, 6.0  ;;  %v5166_v60 = vmax.f32 %v4506_v53, 0.0 }
 0x283   :  { %v5970_v57 = vadd.f32 %v5969_v7, %v5429_v4  ;;  %v4920_v50 = vmax.f32 %v3522_v61, 0.0  ;;  %v3533_v51 = vadd.f32 %v10935_v28, %v8322_v37  ;;  %v5434_v48 = vmin.f32 %v4922_v21, 6.0  ;;  %v11132_v37 = vpop.f32.mrf.mxu1 }
 0x284   :  { %v3524_v10 = vpop.f32.mrf.mxu0  ;;  %v6255_v42 = vadd.f32 %v6254_v9, %v5674_v13  ;;  %v5164_v19 = vmax.f32 %v4498_v6, 0.0  ;;  %v5167_v55 = vmax.f32 %v4509_v34, 0.0  ;;  %v4501_v21 = vadd.f32 %v10935_v28, %v11018_v11 }
 0x285   :  { %v5971_v16 = vadd.f32 %v5970_v57, %v5430_v32  ;;  %v3525_v24 = vadd.f32 %v10935_v28, %v3524_v10  ;;  %v5432_v26 = vmin.f32 %v4920_v50, 6.0  ;;  %v4923_v4 = vmax.f32 %v3533_v51, 0.0  ;;  %v11142_v11 = vpop.f32.mrf.mxu1 }
 0x286   :  { %v8325_v47 = vpop.f32.mrf.mxu0  ;;  %v5676_v40 = vmin.f32 %v5164_v19, 6.0  ;;  %v6256_v22 = vadd.f32 %v6255_v42, %v5675_v1  ;;  %v5165_v51 = vmax.f32 %v4501_v21, 0.0  ;;  %v4522_v10 = vadd.f32 %v10935_v28, %v11023_v5 }
 0x287   :  { %v5972_v7 = vadd.f32 %v5971_v16, %v5431_v29  ;;  %v4921_v3 = vmax.f32 %v3525_v24, 0.0  ;;  %v3546_v61 = vadd.f32 %v10935_v28, %v8325_v47  ;;  %v4514_v9 = vadd.f32 %v10935_v28, %v11028_v59 }
 0x288   :  { %v3537_v36 = vpop.f32.mrf.mxu0  ;;  %v6257_v50 = vadd.f32 %v6256_v22, %v5676_v40  ;;  %v5678_v29 = vmin.f32 %v5166_v60, 6.0  ;;  %v5435_v16 = vmin.f32 %v4923_v4, 6.0  ;;  %v4525_v42 = vadd.f32 %v10935_v28, %v11033_v43 }
 0x289   :  { %v5973_v44 = vadd.f32 %v5972_v7, %v5432_v26  ;;  %v5433_v32 = vmin.f32 %v4921_v3, 6.0  ;;  %v4926_v57 = vmax.f32 %v3546_v61, 0.0  ;;  %v3538_v13 = vadd.f32 %v10935_v28, %v3537_v36 }
 0x28a   :  { %v8326_v53 = vpop.f32.mrf.mxu0  ;;  %v5677_v26 = vmin.f32 %v5165_v51, 6.0  ;;  %v5168_v47 = vmax.f32 %v4514_v9, 0.0  ;;  %v5679_v3 = vmin.f32 %v5167_v55, 6.0  ;;  %v5170_v22 = vmax.f32 %v4522_v10, 0.0 }
 0x28b   :  { %v5974_v6 = vadd.f32 %v5973_v44, %v5433_v32  ;;  %v4924_v1 = vmax.f32 %v3538_v13, 0.0  ;;  %v3549_v34 = vadd.f32 %v10935_v28, %v8326_v53  ;;  %v5438_v7 = vmin.f32 %v4926_v57, 6.0  ;;  %v11148_v32 = vpop.f32.mrf.mxu1 }
 0x28c   :  { %v3540_v24 = vpop.f32.mrf.mxu0  ;;  %v6258_v40 = vadd.f32 %v6257_v50, %v5677_v26  ;;  %v5680_v44 = vmin.f32 %v5168_v47, 6.0  ;;  %v5171_v43 = vmax.f32 %v4525_v42, 0.0  ;;  %v4538_v55 = vadd.f32 %v10935_v28, %v11041_v38 }
 0x28d   :  { %v5975_v19 = vadd.f32 %v5974_v6, %v5434_v48  ;;  %v3541_v5 = vadd.f32 %v10935_v28, %v3540_v24  ;;  %v5436_v59 = vmin.f32 %v4924_v1, 6.0  ;;  %v4927_v61 = vmax.f32 %v3549_v34, 0.0  ;;  %v11158_v47 = vpop.f32.mrf.mxu1 }
 0x28e   :  { %v8329_v36 = vpop.f32.mrf.mxu0  ;;  %v6259_v53 = vadd.f32 %v6258_v40, %v5678_v29  ;;  %v4517_v48 = vadd.f32 %v10935_v28, %v11035_v31  ;;  %v5682_v6 = vmin.f32 %v5170_v22, 6.0  ;;  %v5174_v22 = vmax.f32 %v4538_v55, 0.0 }
 0x28f   :  { %v5976_v60 = vadd.f32 %v5975_v19, %v5435_v16  ;;  %v4925_v21 = vmax.f32 %v3541_v5, 0.0  ;;  %v3562_v4 = vadd.f32 %v10935_v28, %v8329_v36  ;;  %v4530_v16 = vadd.f32 %v10935_v28, %v11046_v39 }
 0x290   :  { %v3553_v13 = vpop.f32.mrf.mxu0  ;;  %v6260_v1 = vadd.f32 %v6259_v53, %v5679_v3  ;;  %v5169_v34 = vmax.f32 %v4517_v48, 0.0  ;;  %v5439_v29 = vmin.f32 %v4927_v61, 6.0  ;;  %v5683_v19 = vmin.f32 %v5171_v43, 6.0  ;;  %v11166_v48 = vpop.f32.mrf.mxu1 }
 0x291   :  { %v5977_v57 = vadd.f32 %v5976_v60, %v5436_v59  ;;  %v5437_v51 = vmin.f32 %v4925_v21, 6.0  ;;  %v4930_v50 = vmax.f32 %v3562_v4, 0.0  ;;  %v3554_v10 = vadd.f32 %v10935_v28, %v3553_v13 }
 0x292   :  { %v8330_v9 = vpop.f32.mrf.mxu0  ;;  %v6261_v42 = vadd.f32 %v6260_v1, %v5680_v44  ;;  %v5681_v5 = vmin.f32 %v5169_v34, 6.0  ;;  %v5172_v59 = vmax.f32 %v4530_v16, 0.0  ;;  %v4541_v61 = vadd.f32 %v10935_v28, %v11049_v15 }
 0x293   :  { %v5978_v24 = vadd.f32 %v5977_v57, %v5437_v51  ;;  %v4928_v26 = vmax.f32 %v3554_v10, 0.0  ;;  %v3565_v31 = vadd.f32 %v10935_v28, %v8330_v9  ;;  %v5442_v40 = vmin.f32 %v4930_v50, 6.0 }
 0x294   :  { %v3556_v38 = vpop.f32.mrf.mxu0  ;;  %v6262_v39 = vadd.f32 %v6261_v42, %v5681_v5  ;;  %v4533_v4 = vadd.f32 %v10935_v28, %v11054_v35  ;;  %v5684_v51 = vmin.f32 %v5172_v59, 6.0  ;;  %v5175_v55 = vmax.f32 %v4541_v61, 0.0 }
 0x295   :  { %v5979_v36 = vadd.f32 %v5978_v24, %v5438_v7  ;;  %v3557_v3 = vadd.f32 %v10935_v28, %v3556_v38  ;;  %v4931_v60 = vmax.f32 %v3565_v31, 0.0  ;;  %v5440_v53 = vmin.f32 %v4928_v26, 6.0 }
 0x296   :  { %v8333_v21 = vpop.f32.mrf.mxu0  ;;  %v6263_v57 = vadd.f32 %v6262_v39, %v5682_v6  ;;  %v5173_v50 = vmax.f32 %v4533_v4, 0.0  ;;  %v4554_v15 = vadd.f32 %v10935_v28, %v11059_v17  ;;  %v5686_v16 = vmin.f32 %v5174_v22, 6.0  ;;  %v11171_v6 = vpop.f32.mrf.mxu1 }
 0x297   :  { %v5980_v13 = vadd.f32 %v5979_v36, %v5439_v29  ;;  %v4929_v44 = vmax.f32 %v3557_v3, 0.0  ;;  %v3578_v43 = vadd.f32 %v10935_v28, %v8333_v21  ;;  %v5443_v35 = vmin.f32 %v4931_v60, 6.0 }
 0x298   :  { %v3569_v7 = vpop.f32.mrf.mxu0  ;;  %v6264_v29 = vadd.f32 %v6263_v57, %v5683_v19  ;;  %v5685_v24 = vmin.f32 %v5173_v50, 6.0  ;;  %v5687_v3 = vmin.f32 %v5175_v55, 6.0  ;;  %v4546_v21 = vadd.f32 %v10935_v28, %v11061_v45 }
 0x299   :  { %v5981_v10 = vrot.slane %v5980_v13, 4  ;;  %v5441_v9 = vmin.f32 %v4929_v44, 6.0  ;;  %v3570_v1 = vadd.f32 %v10935_v28, %v3569_v7  ;;  %v4934_v38 = vmax.f32 %v3578_v43, 0.0 }
 0x29a   :  { %v8334_v34 = vpop.f32.mrf.mxu0  ;;  %v6265_v36 = vadd.f32 %v6264_v29, %v5684_v51  ;;  %v5178_v19 = vmax.f32 %v4554_v15, 0.0  ;;  %v11180_v51 = vpop.f32.mrf.mxu1 }
 0x29b   :  { %v5982_v26 = vadd.f32 %v5981_v10, %v5980_v13  ;;  %v5987_v31 = vadd.f32 %v5441_v9, %v5440_v53  ;;  %v4932_v42 = vmax.f32 %v3570_v1, 0.0  ;;  %v3581_v5 = vadd.f32 %v10935_v28, %v8334_v34 }
 0x29c   :  { %v3572_v59 = vpop.f32.mrf.mxu0  ;;  %v6266_v4 = vadd.f32 %v6265_v36, %v5685_v24  ;;  %v5176_v13 = vmax.f32 %v4546_v21, 0.0  ;;  %v4557_v53 = vadd.f32 %v10935_v28, %v11070_v58  ;;  %v5446_v45 = vmin.f32 %v4934_v38, 6.0  ;;  %v11185_v58 = vld [vmem:[%s11526_s2] ss:$0 sm:$0xff] }
 0x29d   :  { %v5983_v17 = vrot.slane %v5982_v26, 2  ;;  %v5988_v60 = vadd.f32 %v5987_v31, %v5442_v40  ;;  %v3573_v22 = vadd.f32 %v10935_v28, %v3572_v59  ;;  %v5444_v39 = vmin.f32 %v4932_v42, 6.0  ;;  %v8990_v59 = vld [vmem:[%s11527_s3] sm:$0xff]  }
 0x29e   :  { %v8337_v61 = vpop.f32.mrf.mxu0  ;;  %v4935_v40 = vmax.f32 %v3581_v5, 0.0  ;;  %v6267_v50 = vadd.f32 %v6266_v4, %v5686_v16  ;;  %v5688_v10 = vmin.f32 %v5176_v13, 6.0  ;;  %v5179_v34 = vmax.f32 %v4557_v53, 0.0  ;;  %v11191_v5 = vpop.f32.mrf.mxu1  ;;  %8630 = vmatpush3.bf16.msra.mxu1 %v8990_v59 }
 0x29f   :  { %v5984_v44 = vadd.f32 %v5983_v17, %v5982_v26  ;;  %v5989_v43 = vadd.f32 %v5988_v60, %v5443_v35  ;;  %v4933_v7 = vmax.f32 %v3573_v22, 0.0  ;;  %v3594_v57 = vadd.f32 %v10935_v28, %v8337_v61  ;;  %8635 = vmatprep.subr.bf16.mxu1 %v11547_v14 }
 0x2a0   :  { %v3585_v55 = vpop.f32.mrf.mxu0  ;;  %v6268_v24 = vadd.f32 %v6267_v50, %v5687_v3  ;;  %v4549_v26 = vadd.f32 %v11185_v58, %v11078_v63  ;;  %v5690_v42 = vmin.f32 %v5178_v19, 6.0  ;;  %v4570_v3 = vadd.f32 %v11185_v58, %v11081_v0  ;;  %v11202_v0 = vpop.f32.mrf.mxu1 }
 0x2a1   :  { %v5985_v9 = vrot.slane %v5984_v44, 1  ;;  %v5990_v1 = vadd.f32 %v5989_v43, %v5444_v39  ;;  %v5445_v15 = vmin.f32 %v4933_v7, 6.0  ;;  %v4938_v29 = vmax.f32 %v3594_v57, 0.0 }
 0x2a2   :  { %v3586_v28 = vadd.f32 %v11185_v58, %v3585_v55  ;;  %v8338_v35 = vpop.f32.mrf.mxu0  ;;  %v6269_v17 = vadd.f32 %v6268_v24, %v5688_v10  ;;  %v5177_v60 = vmax.f32 %v4549_v26, 0.0  ;;  %v5447_v63 = vmin.f32 %v4935_v40, 6.0 }
 0x2a3   :  { %v5986_v31 = vadd.f32 %v5985_v9, %v5984_v44  ;;  %v5991_v16 = vadd.f32 %v5990_v1, %v5445_v15  ;;  %v3597_v38 = vadd.f32 %v11185_v58, %v8338_v35  ;;  %v5450_v19 = vmin.f32 %v4938_v29, 6.0 }
 0x2a4   :  { %v4936_v36 = vmax.f32 %v3586_v28, 0.0  ;;  %v3588_v21 = vpop.f32.mrf.mxu0  ;;  %v5691_v13 = vmin.f32 %v5179_v34, 6.0  ;;  %v5689_v53 = vmin.f32 %v5177_v60, 6.0  ;;  %v4562_v44 = vadd.f32 %v11185_v58, %v11085_v8 }
 0x2a5   :  { %v6327_v22 = vmul.f32 0.00390625, %v5986_v31  ;;  %v5992_v39 = vadd.f32 %v5991_v16, %v5446_v45  ;;  %v3589_v61 = vadd.f32 %v11185_v58, %v3588_v21  ;;  %v4939_v40 = vmax.f32 %v3597_v38, 0.0 }
 0x2a6   :  { %v8341_v4 = vpop.f32.mrf.mxu0  ;;  %v5448_v7 = vmin.f32 %v4936_v36, 6.0  ;;  %v6270_v50 = vadd.f32 %v6269_v17, %v5689_v53  ;;  %v5182_v10 = vmax.f32 %v4570_v3, 0.0  ;;  %v5180_v9 = vmax.f32 %v4562_v44, 0.0  ;;  %v11213_v36 = vpop.f32.mrf.mxu1 }
 0x2a7   :  { %v6343_v43 = vpack.c.bf16 %v6327_v22, %v6327_v22  ;;  %v5993_v57 = vadd.f32 %v5992_v39, %v5447_v63  ;;  %v4937_v55 = vmax.f32 %v3589_v61, 0.0  ;;  %v3610_v8 = vadd.f32 %v11185_v58, %v8341_v4 }
 0x2a8   :  { %v3601_v45 = vpop.f32.mrf.mxu0  ;;  %v6271_v35 = vadd.f32 %v6270_v50, %v5690_v42  ;;  %v5692_v24 = vmin.f32 %v5180_v9, 6.0  ;;  %v4573_v26 = vadd.f32 %v11185_v58, %v11091_v49  ;;  %v4565_v60 = vadd.f32 %v11185_v58, %v11094_v20 }
 0x2a9   :  { %v6398_v1 = vunpack.c.l.b16 %v6343_v43  ;;  %v5994_v15 = vadd.f32 %v5993_v57, %v5448_v7  ;;  %v5449_v34 = vmin.f32 %v4937_v55, 6.0  ;;  %v3602_v29 = vadd.f32 %v11185_v58, %v3601_v45  ;;  %v11218_v57 = vpop.f32.mrf.mxu1 }
 0x2aa   :  { %v8342_v28 = vpop.f32.mrf.mxu0  ;;  %v6272_v17 = vadd.f32 %v6271_v35, %v5691_v13  ;;  %v5451_v42 = vmin.f32 %v4939_v40, 6.0  ;;  %v5694_v49 = vmin.f32 %v5182_v10, 6.0  ;;  %v4942_v63 = vmax.f32 %v3610_v8, 0.0 }
 0x2ab   :  { %v11210_v31 = vsel %vm6418_vm7, %v6398_v1, %v11074_v23  ;;  %v5995_v16 = vadd.f32 %v5994_v15, %v5449_v34  ;;  %v4940_v38 = vmax.f32 %v3602_v29, 0.0  ;;  %v3613_v59 = vadd.f32 %v11185_v58, %v8342_v28 }
 0x2ac   :  { %v3604_v21 = vpop.f32.mrf.mxu0  ;;  %v6273_v23 = vadd.f32 %v6272_v17, %v5692_v24  ;;  %v5183_v61 = vmax.f32 %v4573_v26, 0.0  ;;  %v5181_v4 = vmax.f32 %v4565_v60, 0.0  ;;  %v4578_v40 = vadd.f32 %v11185_v58, %v11108_v30  ;;  %v11228_v26 = vpop.f32.mrf.mxu1 }
 0x2ad   :  { %v5996_v3 = vadd.f32 %v5995_v16, %v5450_v19  ;;  %v3605_v22 = vadd.f32 %v11185_v58, %v3604_v21  ;;  %v5452_v53 = vmin.f32 %v4940_v38, 6.0  ;;  %v4943_v43 = vmax.f32 %v3613_v59, 0.0 }
 0x2ae   :  { %v8345_v39 = vpop.f32.mrf.mxu0  ;;  %v5693_v20 = vmin.f32 %v5181_v4, 6.0  ;;  %v4586_v19 = vadd.f32 %v11185_v58, %v11101_v56  ;;  %v4589_v9 = vadd.f32 %v11185_v58, %v11118_v27  ;;  %v5695_v15 = vmin.f32 %v5183_v61, 6.0  ;;  %v11240_v4 = vpop.f32.mrf.mxu1 }
 0x2af   :  { %v5997_v44 = vadd.f32 %v5996_v3, %v5451_v42  ;;  %v4941_v7 = vmax.f32 %v3605_v22, 0.0  ;;  %v3626_v13 = vadd.f32 %v11185_v58, %v8345_v39  ;;  %v5184_v29 = vmax.f32 %v4578_v40, 0.0 }
 0x2b0   :  { %v3617_v55 = vpop.f32.mrf.mxu0  ;;  %v6274_v34 = vadd.f32 %v6273_v23, %v5693_v20  ;;  %v5454_v8 = vmin.f32 %v4942_v63, 6.0  ;;  %v5455_v28 = vmin.f32 %v4943_v43, 6.0  ;;  %v5186_v38 = vmax.f32 %v4586_v19, 0.0 }
 0x2b1   :  { %v5998_v45 = vadd.f32 %v5997_v44, %v5452_v53  ;;  %v5453_v50 = vmin.f32 %v4941_v7, 6.0  ;;  %v3618_v10 = vadd.f32 %v11185_v58, %v3617_v55  ;;  %v4946_v56 = vmax.f32 %v3626_v13, 0.0 }
 0x2b2   :  { %v8346_v1 = vpop.f32.mrf.mxu0  ;;  %v6275_v30 = vadd.f32 %v6274_v34, %v5694_v49  ;;  %v4581_v59 = vadd.f32 %v11185_v58, %v11124_v52  ;;  %v5187_v60 = vmax.f32 %v4589_v9, 0.0  ;;  %v5696_v22 = vmin.f32 %v5184_v29, 6.0 }
 0x2b3   :  { %v5999_v35 = vadd.f32 %v5998_v45, %v5453_v50  ;;  %v4944_v24 = vmax.f32 %v3618_v10, 0.0  ;;  %v3629_v27 = vadd.f32 %v11185_v58, %v8346_v1  ;;  %v4594_v39 = vadd.f32 %v11185_v58, %v11142_v11 }
 0x2b4   :  { %v3620_v16 = vpop.f32.mrf.mxu0  ;;  %v11234_v3 = vadd.f32 %v6275_v30, %v5695_v15  ;;  %v5185_v63 = vmax.f32 %v4581_v59, 0.0  ;;  %v4602_v52 = vadd.f32 %v11185_v58, %v11132_v37  ;;  %v5698_v44 = vmin.f32 %v5186_v38, 6.0  ;;  %v11244_v15 = vpop.f32.mrf.mxu1 }
 0x2b5   :  { %v6000_v21 = vadd.f32 %v5999_v35, %v5454_v8  ;;  %v3621_v17 = vadd.f32 %v11185_v58, %v3620_v16  ;;  %v5456_v23 = vmin.f32 %v4944_v24, 6.0  ;;  %v5188_v7 = vmax.f32 %v4594_v39, 0.0 }
 0x2b6   :  { %v8349_v42 = vpop.f32.mrf.mxu0  ;;  %v5697_v43 = vmin.f32 %v5185_v63, 6.0  ;;  %v4947_v55 = vmax.f32 %v3629_v27, 0.0  ;;  %v5458_v40 = vmin.f32 %v4946_v56, 6.0  ;;  %v5699_v11 = vmin.f32 %v5187_v60, 6.0  ;;  %v11252_v63 = vpop.f32.mrf.mxu1 }
 0x2b7   :  { %v6001_v49 = vadd.f32 %v6000_v21, %v5455_v28  ;;  %v4945_v61 = vmax.f32 %v3621_v17, 0.0  ;;  %v3642_v9 = vadd.f32 %v11185_v58, %v8349_v42  ;;  %v5190_v37 = vmax.f32 %v4602_v52, 0.0 }
 0x2b8   :  { %v3633_v53 = vpop.f32.mrf.mxu0  ;;  %v6283_v50 = vadd.f32 %v5697_v43, %v5696_v22  ;;  %v5700_v8 = vmin.f32 %v5188_v7, 6.0  ;;  %v4605_v28 = vadd.f32 %v11185_v58, %v11148_v32  ;;  %v4597_v35 = vadd.f32 %v11185_v58, %v11158_v47 }
 0x2b9   :  { %v6002_v13 = vadd.f32 %v6001_v49, %v5456_v23  ;;  %v5457_v20 = vmin.f32 %v4945_v61, 6.0  ;;  %v3634_v19 = vadd.f32 %v11185_v58, %v3633_v53  ;;  %v5459_v24 = vmin.f32 %v4947_v55, 6.0 }
 0x2ba   :  { %v8350_v45 = vpop.f32.mrf.mxu0  ;;  %v6284_v29 = vadd.f32 %v6283_v50, %v5698_v44  ;;  %v5191_v21 = vmax.f32 %v4605_v28, 0.0  ;;  %v5189_v27 = vmax.f32 %v4597_v35, 0.0  ;;  %v4950_v17 = vmax.f32 %v3642_v9, 0.0 }
 0x2bb   :  { %v6003_v10 = vadd.f32 %v6002_v13, %v5457_v20  ;;  %v4948_v1 = vmax.f32 %v3634_v19, 0.0  ;;  %v3645_v16 = vadd.f32 %v11185_v58, %v8350_v45  ;;  %v5702_v39 = vmin.f32 %v5190_v37, 6.0 }
 0x2bc   :  { %v3636_v34 = vpop.f32.mrf.mxu0  ;;  %v6285_v59 = vadd.f32 %v6284_v29, %v5699_v11  ;;  %v5701_v47 = vmin.f32 %v5189_v27, 6.0  ;;  %v5703_v7 = vmin.f32 %v5191_v21, 6.0  ;;  %v4610_v55 = vadd.f32 %v11185_v58, %v11171_v6  ;;  %v11260_v11 = vpop.f32.mrf.mxu1 }
 0x2bd   :  { %v6004_v56 = vadd.f32 %v6003_v10, %v5458_v40  ;;  %v3637_v30 = vadd.f32 %v11185_v58, %v3636_v34  ;;  %v5460_v60 = vmin.f32 %v4948_v1, 6.0  ;;  %v4951_v61 = vmax.f32 %v3645_v16, 0.0 }
 0x2be   :  { %v8353_v38 = vpop.f32.mrf.mxu0  ;;  %v6286_v23 = vadd.f32 %v6285_v59, %v5700_v8  ;;  %v5462_v20 = vmin.f32 %v4950_v17, 6.0  ;;  %v4618_v45 = vadd.f32 %v11185_v58, %v11166_v48  ;;  %v5192_v1 = vmax.f32 %v4610_v55, 0.0  ;;  %v11264_v48 = vpop.f32.mrf.mxu1 }
 0x2bf   :  { %v6005_v42 = vadd.f32 %v6004_v56, %v5459_v24  ;;  %v4949_v22 = vmax.f32 %v3637_v30, 0.0  ;;  %v3658_v44 = vadd.f32 %v11185_v58, %v8353_v38  ;;  %v5463_v37 = vmin.f32 %v4951_v61, 6.0 }
 0x2c0   :  { %v3649_v32 = vpop.f32.mrf.mxu0  ;;  %v6287_v13 = vadd.f32 %v6286_v23, %v5701_v47  ;;  %v5704_v6 = vmin.f32 %v5192_v1, 6.0  ;;  %v5194_v30 = vmax.f32 %v4618_v45, 0.0  ;;  %v4621_v27 = vadd.f32 %v11185_v58, %v11180_v51 }
 0x2c1   :  { %v6006_v49 = vadd.f32 %v6005_v42, %v5460_v60  ;;  %v5461_v52 = vmin.f32 %v4949_v22, 6.0  ;;  %v3650_v53 = vadd.f32 %v11185_v58, %v3649_v32  ;;  %v4954_v8 = vmax.f32 %v3658_v44, 0.0 }
 0x2c2   :  { %v8354_v43 = vpop.f32.mrf.mxu0  ;;  %v6288_v9 = vadd.f32 %v6287_v13, %v5702_v39  ;;  %v4613_v17 = vadd.f32 %v11185_v58, %v11191_v5  ;;  %v5195_v23 = vmax.f32 %v4621_v27, 0.0  ;;  %v4626_v61 = vadd.f32 %v11185_v58, %v11213_v36  ;;  %v11277_v5 = vpop.f32.mrf.mxu1 }
 0x2c3   :  { %v6007_v19 = vadd.f32 %v6006_v49, %v5461_v52  ;;  %v4952_v40 = vmax.f32 %v3650_v53, 0.0  ;;  %v3661_v50 = vadd.f32 %v11185_v58, %v8354_v43  ;;  %v4634_v49 = vadd.f32 %v11185_v58, %v11202_v0 }
 0x2c4   :  { %v3652_v10 = vpop.f32.mrf.mxu0  ;;  %v6289_v35 = vadd.f32 %v6288_v9, %v5703_v7  ;;  %v5193_v47 = vmax.f32 %v4613_v17, 0.0  ;;  %v5466_v52 = vmin.f32 %v4954_v8, 6.0  ;;  %v5706_v13 = vmin.f32 %v5194_v30, 6.0 }
 0x2c5   :  { %v6008_v34 = vadd.f32 %v6007_v19, %v5462_v20  ;;  %v3653_v29 = vadd.f32 %v11185_v58, %v3652_v10  ;;  %v5464_v24 = vmin.f32 %v4952_v40, 6.0  ;;  %v4955_v38 = vmax.f32 %v3661_v50, 0.0 }
 0x2c6   :  { %v8357_v28 = vpop.f32.mrf.mxu0  ;;  %v6290_v32 = vadd.f32 %v6289_v35, %v5704_v6  ;;  %v5705_v55 = vmin.f32 %v5193_v47, 6.0  ;;  %v5196_v20 = vmax.f32 %v4626_v61, 0.0  ;;  %v5707_v0 = vmin.f32 %v5195_v23, 6.0 }
 0x2c7   :  { %v6009_v56 = vadd.f32 %v6008_v34, %v5463_v37  ;;  %v4953_v16 = vmax.f32 %v3653_v29, 0.0  ;;  %v3674_v59 = vadd.f32 %v11185_v58, %v8357_v28  ;;  %v5467_v43 = vmin.f32 %v4955_v38, 6.0  ;;  %v11283_v28 = vpop.f32.mrf.mxu1 }
 0x2c8   :  { %v3665_v21 = vpop.f32.mrf.mxu0  ;;  %v6291_v36 = vadd.f32 %v6290_v32, %v5705_v55  ;;  %v5198_v9 = vmax.f32 %v4634_v49, 0.0  ;;  %v4637_v1 = vadd.f32 %v11185_v58, %v11218_v57 }
 0x2c9   :  { %v6010_v60 = vadd.f32 %v6009_v56, %v5464_v24  ;;  %v5465_v42 = vmin.f32 %v4953_v16, 6.0  ;;  %v3666_v22 = vadd.f32 %v11185_v58, %v3665_v21  ;;  %v4958_v40 = vmax.f32 %v3674_v59, 0.0  ;;  %v11290_v23 = vpop.f32.mrf.mxu1 }
 0x2ca   :  { %v8358_v39 = vpop.f32.mrf.mxu0  ;;  %v6292_v35 = vadd.f32 %v6291_v36, %v5706_v13  ;;  %v5708_v24 = vmin.f32 %v5196_v20, 6.0  ;;  %v4629_v56 = vadd.f32 %v11185_v58, %v11228_v26  ;;  %v5199_v59 = vmax.f32 %v4637_v1, 0.0 }
 0x2cb   :  { %v6011_v53 = vadd.f32 %v6010_v60, %v5465_v42  ;;  %v4956_v51 = vmax.f32 %v3666_v22, 0.0  ;;  %v3677_v44 = vadd.f32 %v11185_v58, %v8358_v39  ;;  %v5470_v21 = vmin.f32 %v4958_v40, 6.0 }
 0x2cc   :  { %v3668_v7 = vpop.f32.mrf.mxu0  ;;  %v5710_v27 = vmin.f32 %v5198_v9, 6.0  ;;  %v6293_v17 = vadd.f32 %v6292_v35, %v5707_v0  ;;  %v5197_v60 = vmax.f32 %v4629_v56, 0.0  ;;  %v4650_v39 = vadd.f32 %v11185_v58, %v11240_v4 }
 0x2cd   :  { %v6012_v19 = vadd.f32 %v6011_v53, %v5466_v52  ;;  %v3669_v45 = vadd.f32 %v11185_v58, %v3668_v7  ;;  %v5468_v50 = vmin.f32 %v4956_v51, 6.0  ;;  %v4959_v34 = vmax.f32 %v3677_v44, 0.0 }
 0x2ce   :  { %v8361_v10 = vpop.f32.mrf.mxu0  ;;  %v6294_v49 = vadd.f32 %v6293_v17, %v5708_v24  ;;  %v5709_v61 = vmin.f32 %v5197_v60, 6.0  ;;  %v4642_v52 = vadd.f32 %v11185_v58, %v11244_v15  ;;  %v4653_v4 = vadd.f32 %v11185_v58, %v11252_v63 }
 0x2cf   :  { %v6013_v37 = vadd.f32 %v6012_v19, %v5467_v43  ;;  %v4957_v29 = vmax.f32 %v3669_v45, 0.0  ;;  %v3690_v8 = vadd.f32 %v11185_v58, %v8361_v10  ;;  %v5471_v42 = vmin.f32 %v4959_v34, 6.0 }
 0x2d0   :  { %v3681_v6 = vpop.f32.mrf.mxu0  ;;  %v5711_v43 = vmin.f32 %v5199_v59, 6.0  ;;  %v6295_v13 = vadd.f32 %v6294_v49, %v5709_v61  ;;  %v5200_v55 = vmax.f32 %v4642_v52, 0.0  ;;  %v4645_v20 = vadd.f32 %v11185_v58, %v11260_v11 }
 0x2d1   :  { %v6014_v16 = vadd.f32 %v6013_v37, %v5468_v50  ;;  %v5469_v30 = vmin.f32 %v4957_v29, 6.0  ;;  %v3682_v38 = vadd.f32 %v11185_v58, %v3681_v6  ;;  %v4962_v32 = vmax.f32 %v3690_v8, 0.0  ;;  %v11300_v50 = vpop.f32.mrf.mxu1 }
 0x2d2   :  { %v8362_v57 = vpop.f32.mrf.mxu0  ;;  %v5202_v0 = vmax.f32 %v4650_v39, 0.0  ;;  %v6296_v36 = vadd.f32 %v6295_v13, %v5710_v27  ;;  %v5712_v9 = vmin.f32 %v5200_v55, 6.0  ;;  %v5201_v1 = vmax.f32 %v4645_v20, 0.0 }
 0x2d3   :  { %v6015_v22 = vadd.f32 %v6014_v16, %v5469_v30  ;;  %v3693_v26 = vadd.f32 %v11185_v58, %v8362_v57  ;;  %v4960_v51 = vmax.f32 %v3682_v38, 0.0  ;;  %v5474_v40 = vmin.f32 %v4962_v32, 6.0  ;;  %v4673_v59 = vpop.f32.mrf.mxu1 }
 0x2d4   :  { %v3684_v47 = vpop.f32.mrf.mxu0  ;;  %v6297_v11 = vadd.f32 %v6296_v36, %v5711_v43  ;;  %v5203_v35 = vmax.f32 %v4653_v4, 0.0  ;;  %v5713_v24 = vmin.f32 %v5201_v1, 6.0  ;;  %v5714_v38 = vmin.f32 %v5202_v0, 6.0 }
 0x2d5   :  { %v6016_v53 = vadd.f32 %v6015_v22, %v5470_v21  ;;  %v3685_v44 = vadd.f32 %v11185_v58, %v3684_v47  ;;  %v4963_v15 = vmax.f32 %v3693_v26, 0.0  ;;  %v5472_v34 = vmin.f32 %v4960_v51, 6.0 }
 0x2d6   :  { %v8365_v7 = vpop.f32.mrf.mxu0  ;;  %v6298_v27 = vadd.f32 %v6297_v11, %v5712_v9  ;;  %v4666_v17 = vadd.f32 %v11185_v58, %v11264_v48  ;;  %v4658_v60 = vadd.f32 %v11185_v58, %v11277_v5  ;;  %v5715_v49 = vmin.f32 %v5203_v35, 6.0 }
 0x2d7   :  { %v6017_v19 = vadd.f32 %v6016_v53, %v5471_v42  ;;  %v4961_v45 = vmax.f32 %v3685_v44, 0.0  ;;  %v3706_v63 = vadd.f32 %v11185_v58, %v8365_v7  ;;  %v5475_v21 = vmin.f32 %v4963_v15, 6.0  ;;  %v8610_v7 = vpop.f32.mrf.mxu1 }
 0x2d8   :  { %v3697_v10 = vpop.f32.mrf.mxu0  ;;  %v6299_v61 = vadd.f32 %v6298_v27, %v5713_v24  ;;  %v5204_v52 = vmax.f32 %v4658_v60, 0.0  ;;  %v4669_v5 = vadd.f32 %v11185_v58, %v11283_v28  ;;  %v4661_v36 = vadd.f32 %v11185_v58, %v11290_v23 }
 0x2d9   :  { %v6018_v37 = vrot.slane %v6017_v19, 4  ;;  %v5473_v29 = vmin.f32 %v4961_v45, 6.0  ;;  %v3698_v8 = vadd.f32 %v11185_v58, %v3697_v10  ;;  %v4966_v26 = vmax.f32 %v3706_v63, 0.0 }
 0x2da   :  { %v8366_v6 = vpop.f32.mrf.mxu0  ;;  %v6300_v13 = vadd.f32 %v6299_v61, %v5714_v38  ;;  %v5716_v55 = vmin.f32 %v5204_v52, 6.0  ;;  %v5207_v63 = vmax.f32 %v4669_v5, 0.0  ;;  %v4674_v23 = vadd.f32 %v11185_v58, %v4673_v59 }
 0x2db   :  { %v6019_v56 = vadd.f32 %v6018_v37, %v6017_v19  ;;  %v6024_v16 = vadd.f32 %v5473_v29, %v5472_v34  ;;  %v4964_v30 = vmax.f32 %v3698_v8, 0.0  ;;  %v3709_v32 = vadd.f32 %v11185_v58, %v8366_v6  ;;  %v4676_v34 = vpop.f32.mrf.mxu1 }
 0x2dc   :  { %v3700_v57 = vpop.f32.mrf.mxu0  ;;  %v6301_v10 = vadd.f32 %v6300_v13, %v5715_v49  ;;  %v5478_v1 = vmin.f32 %v4966_v26, 6.0  ;;  %v5205_v6 = vmax.f32 %v4661_v36, 0.0  ;;  %v5208_v26 = vmax.f32 %v4674_v23, 0.0 }
 0x2dd   :  { %v6020_v42 = vrot.slane %v6019_v56, 2  ;;  %v6025_v22 = vadd.f32 %v6024_v16, %v5474_v40  ;;  %v3701_v39 = vadd.f32 %v11185_v58, %v3700_v57  ;;  %v5476_v51 = vmin.f32 %v4964_v30, 6.0 }
 0x2de   :  { %v8369_v47 = vpop.f32.mrf.mxu0  ;;  %v4967_v20 = vmax.f32 %v3709_v32, 0.0  ;;  %v5206_v40 = vmax.f32 %v4666_v17, 0.0  ;;  %v6302_v28 = vadd.f32 %v6301_v10, %v5716_v55  ;;  %v5719_v32 = vmin.f32 %v5207_v63, 6.0 }
 0x2df   :  { %v6021_v53 = vadd.f32 %v6020_v42, %v6019_v56  ;;  %v6026_v44 = vadd.f32 %v6025_v22, %v5475_v21  ;;  %v4965_v43 = vmax.f32 %v3701_v39, 0.0  ;;  %v3722_v45 = vadd.f32 %v11185_v58, %v8369_v47  ;;  %v11319_v42 = vpop.f32.mrf.mxu1 }
 0x2e0   :  { %v3713_v48 = vpop.f32.mrf.mxu0  ;;  %v5479_v11 = vmin.f32 %v4967_v20, 6.0  ;;  %v5718_v38 = vmin.f32 %v5206_v40, 6.0  ;;  %v5717_v21 = vmin.f32 %v5205_v6, 6.0  ;;  %v4682_v59 = vadd.f32 %v11185_v58, %v11300_v50 }
 0x2e1   :  { %v6027_v4 = vadd.f32 %v6026_v44, %v5476_v51  ;;  %v5477_v19 = vmin.f32 %v4965_v43, 6.0  ;;  %v3714_v0 = vadd.f32 %v11185_v58, %v3713_v48  ;;  %v6022_v9 = vrot.slane %v6021_v53, 1 }
 0x2e2   :  { %v8370_v15 = vpop.f32.mrf.mxu0  ;;  %v4970_v16 = vmax.f32 %v3722_v45, 0.0  ;;  %v6303_v39 = vadd.f32 %v6302_v28, %v5717_v21  ;;  %v4685_v45 = vadd.f32 %v11185_v58, %v8610_v7 }
 0x2e3   :  { %v6028_v37 = vadd.f32 %v6027_v4, %v5477_v19  ;;  %v4968_v29 = vmax.f32 %v3714_v0, 0.0  ;;  %v3725_v24 = vadd.f32 %v11185_v58, %v8370_v15  ;;  %v6023_v57 = vadd.f32 %v6022_v9, %v6021_v53  ;;  %v4689_v4 = vpop.f32.mrf.mxu1 }
 0x2e4   :  { %v3716_v8 = vpop.f32.mrf.mxu0  ;;  %v5482_v51 = vmin.f32 %v4970_v16, 6.0  ;;  %v6304_v43 = vadd.f32 %v6303_v39, %v5718_v38  ;;  %v5720_v53 = vmin.f32 %v5208_v26, 6.0  ;;  %v4677_v0 = vadd.f32 %v11185_v58, %v4676_v34 }
 0x2e5   :  { %v6029_v35 = vadd.f32 %v6028_v37, %v5478_v1  ;;  %v3717_v56 = vadd.f32 %v11185_v58, %v3716_v8  ;;  %v5480_v27 = vmin.f32 %v4968_v29, 6.0  ;;  %v4971_v49 = vmax.f32 %v3725_v24, 0.0  ;;  %v8614_v6 = vpop.f32.mrf.mxu1 }
 0x2e6   :  { %v8373_v30 = vpop.f32.mrf.mxu0  ;;  %v6328_v48 = vmul.f32 0.00390625, %v6023_v57  ;;  %v6305_v40 = vadd.f32 %v6304_v43, %v5719_v32  ;;  %v5210_v9 = vmax.f32 %v4682_v59, 0.0  ;;  %v5209_v37 = vmax.f32 %v4677_v0, 0.0 }
 0x2e7   :  { %v6030_v17 = vadd.f32 %v6029_v35, %v5479_v11  ;;  %v4969_v60 = vmax.f32 %v3717_v56, 0.0  ;;  %v3738_v55 = vadd.f32 %v11185_v58, %v8373_v30  ;;  %v5483_v15 = vmin.f32 %v4971_v49, 6.0  ;;  %v4692_v32 = vpop.f32.mrf.mxu1 }
 0x2e8   :  { %v3729_v22 = vpop.f32.mrf.mxu0  ;;  %v6306_v1 = vadd.f32 %v6305_v40, %v5720_v53  ;;  %v6344_v11 = vpack.c.bf16 %v6328_v48, %v6328_v48  ;;  %v5211_v56 = vmax.f32 %v4685_v45, 0.0  ;;  %v5721_v7 = vmin.f32 %v5209_v37, 6.0 }
 0x2e9   :  { %v6031_v47 = vadd.f32 %v6030_v17, %v5480_v27  ;;  %v5481_v61 = vmin.f32 %v4969_v60, 6.0  ;;  %v3730_v52 = vadd.f32 %v11185_v58, %v3729_v22  ;;  %v4974_v29 = vmax.f32 %v3738_v55, 0.0 }
 0x2ea   :  { %v8374_v44 = vpop.f32.mrf.mxu0  ;;  %v5722_v23 = vmin.f32 %v5210_v9, 6.0  ;;  %v6307_v57 = vadd.f32 %v6306_v1, %v5721_v7  ;;  %v4690_v27 = vadd.f32 %v11185_v58, %v4689_v4  ;;  %v3762_v39 = vadd.f32 %v11185_v58, %v9586_v18 }
 0x2eb   :  { %v6032_v13 = vadd.f32 %v6031_v47, %v5481_v61  ;;  %v4972_v5 = vmax.f32 %v3730_v52, 0.0  ;;  %v3741_v20 = vadd.f32 %v11185_v58, %v8374_v44  ;;  %v5486_v17 = vmin.f32 %v4974_v29, 6.0 }
 0x2ec   :  { %v3732_v19 = vpop.f32.mrf.mxu0  ;;  %v6399_v26 = vunpack.c.l.b16 %v6344_v11  ;;  %v5723_v61 = vmin.f32 %v5211_v56, 6.0  ;;  %v6308_v59 = vadd.f32 %v6307_v57, %v5722_v23  ;;  %v5212_v53 = vmax.f32 %v4690_v27, 0.0 }
 0x2ed   :  { %v6033_v10 = vadd.f32 %v6032_v13, %v5482_v51  ;;  %v3733_v36 = vadd.f32 %v11185_v58, %v3732_v19  ;;  %v5484_v8 = vmin.f32 %v4972_v5, 6.0  ;;  %v4975_v35 = vmax.f32 %v3741_v20, 0.0 }
 0x2ee   :  { %v8377_v50 = vpop.f32.mrf.mxu0  ;;  %v4693_v48 = vadd.f32 %v11185_v58, %v4692_v32  ;;  %v11341_v18 = vsel %vm6420_vm9, %v6399_v26, %v11210_v31  ;;  %v3765_v4 = vadd.f32 %v11185_v58, %v9601_v33  ;;  %v3770_v45 = vadd.f32 %v11185_v58, %v9578_v12 }
 0x2ef   :  { %v6034_v28 = vadd.f32 %v6033_v10, %v5483_v15  ;;  %v4973_v63 = vmax.f32 %v3733_v36, 0.0  ;;  %v3754_v30 = vadd.f32 %v11185_v58, %v8377_v50  ;;  %v5487_v47 = vmin.f32 %v4975_v35, 6.0 }
 0x2f0   :  { %v3745_v24 = vpop.f32.mrf.mxu0  ;;  %v4980_v0 = vmax.f32 %v3762_v39, 0.0  ;;  %v4698_v10 = vadd.f32 %v11185_v58, %v11319_v42  ;;  %v5724_v50 = vmin.f32 %v5212_v53, 6.0  ;;  %v6309_v9 = vadd.f32 %v6308_v59, %v5723_v61  ;;  %v11548_v39 = vld [vmem:[#allocation6_spill] sm:$0xff]  ;;  %v11551_v53 = vld [vmem:[#allocation5_spill] sm:$0xff] }
 0x2f1   :  { %v6035_v16 = vadd.f32 %v6034_v28, %v5484_v8  ;;  %v5485_v34 = vmin.f32 %v4973_v63, 6.0  ;;  %v3746_v38 = vadd.f32 %v11185_v58, %v3745_v24  ;;  %v4978_v51 = vmax.f32 %v3754_v30, 0.0 }
 0x2f2   :  { %v8378_v21 = vpop.f32.mrf.mxu0  ;;  %v5213_v1 = vmax.f32 %v4693_v48, 0.0  ;;  %v3773_v31 = vadd.f32 %v11185_v58, %v9590_v25  ;;  %v4981_v37 = vmax.f32 %v3765_v4, 0.0  ;;  %v4982_v8 = vmax.f32 %v3770_v45, 0.0  ;;  %v11553_v4 = vld [vmem:[#allocation11_spill] sm:$0xff] }
 0x2f3   :  { %v6036_v60 = vadd.f32 %v6035_v16, %v5485_v34  ;;  %v4976_v22 = vmax.f32 %v3746_v38, 0.0  ;;  %v3757_v44 = vadd.f32 %v11185_v58, %v8378_v21  ;;  %v5490_v15 = vmin.f32 %v4978_v51, 6.0 }
 0x2f4   :  { %v3748_v49 = vpop.f32.mrf.mxu0  ;;  %v5492_v28 = vmin.f32 %v4980_v0, 6.0  ;;  %v3778_v12 = vadd.f32 %v11185_v58, %v9611_v46  ;;  %v5214_v63 = vmax.f32 %v4698_v10, 0.0  ;;  %v6310_v35 = vadd.f32 %v6309_v9, %v5724_v50  ;;  %v11554_v0 = vld [vmem:[#allocation7_spill] sm:$0xff]  ;;  %v11555_v10 = vld [vmem:[#allocation12_spill] sm:$0xff] }
 0x2f5   :  { %v6037_v52 = vadd.f32 %v6036_v60, %v5486_v17  ;;  %v3749_v43 = vadd.f32 %v11185_v58, %v3748_v49  ;;  %v5488_v13 = vmin.f32 %v4976_v22, 6.0  ;;  %v4979_v19 = vmax.f32 %v3757_v44, 0.0  ;;  %v11550_v44 = vld [vmem:[#allocation9_spill] sm:$0xff] }
 0x2f6   :  { %v4701_v42 = vadd.f32 %v11185_v58, %v8614_v6  ;;  %v5725_v24 = vmin.f32 %v5213_v1, 6.0  ;;  %v4983_v56 = vmax.f32 %v3773_v31, 0.0  ;;  %v5493_v7 = vmin.f32 %v4981_v37, 6.0 }
 0x2f7   :  { %v6038_v55 = vadd.f32 %v6037_v52, %v5487_v47  ;;  %v4977_v5 = vmax.f32 %v3749_v43, 0.0  ;;  %v5491_v33 = vmin.f32 %v4979_v19, 6.0  ;;  %v3781_v16 = vadd.f32 %v11185_v58, %v9629_v62  ;;  %v11549_v52 = vld [vmem:[#allocation8_spill] sm:$0xff] }
 0x2f8   :  { %v5494_v34 = vmin.f32 %v4982_v8, 6.0  ;;  %v3786_v30 = vadd.f32 %v11185_v58, %v9606_v41  ;;  %v4984_v38 = vmax.f32 %v3778_v12, 0.0  ;;  %v5726_v23 = vmin.f32 %v5214_v63, 6.0 }
 0x2f9   :  { %v6039_v20 = vadd.f32 %v6038_v55, %v5488_v13  ;;  %v5489_v40 = vmin.f32 %v4977_v5, 6.0  ;;  %v5215_v46 = vmax.f32 %v4701_v42, 0.0  ;;  %v6311_v57 = vadd.f32 %v6310_v35, %v5725_v24  ;;  %v11552_v13 = vld [vmem:[#allocation10_spill] sm:$0xff] }
 0x2fa   :  { %v3789_v27 = vadd.f32 %v11185_v58, %v9618_v54  ;;  %v5495_v6 = vmin.f32 %v4983_v56, 6.0  ;;  %v4985_v17 = vmax.f32 %v3781_v16, 0.0  ;;  %v4986_v22 = vmax.f32 %v3786_v30, 0.0 }
 0x2fb   :  { %v6040_v36 = vadd.f32 %v6039_v20, %v5489_v40  ;;  %v5496_v32 = vmin.f32 %v4984_v38, 6.0  ;;  %v3794_v62 = vadd.f32 %v11185_v58, %v11548_v39  ;;  %v5727_v47 = vmin.f32 %v5215_v46, 6.0 }
 0x2fc   :  { %v6312_v49 = vadd.f32 %v6311_v57, %v5726_v23  ;;  %v4987_v41 = vmax.f32 %v3789_v27, 0.0  ;;  %v5497_v61 = vmin.f32 %v4985_v17, 6.0  ;;  %v3797_v51 = vadd.f32 %v11185_v58, %v11549_v52 }
 0x2fd   :  { %v6041_v29 = vadd.f32 %v6040_v36, %v5490_v15  ;;  %v6092_v43 = vrot.slane %v11550_v44, 4  ;;  %v5498_v54 = vmin.f32 %v4986_v22, 6.0  ;;  %v3802_v48 = vadd.f32 %v11185_v58, %v11551_v53 }
 0x2fe   :  { %v6129_v55 = vrot.slane %v11552_v13, 4  ;;  %v4988_v5 = vmax.f32 %v3794_v62, 0.0  ;;  %v6166_v20 = vrot.slane %v11553_v4, 4  ;;  %v6313_v40 = vadd.f32 %v6312_v49, %v5727_v47 }
 0x2ff   :  { %v6042_v11 = vadd.f32 %v6041_v29, %v5491_v33  ;;  %v5499_v45 = vmin.f32 %v4987_v41, 6.0  ;;  %v3805_v15 = vadd.f32 %v11185_v58, %v11554_v0  ;;  %v6203_v36 = vrot.slane %v11555_v10, 4 }
 0x300   :  { %v4989_v50 = vmax.f32 %v3797_v51, 0.0  ;;  %v6093_v9 = vadd.f32 %v6092_v43, %v11550_v44  ;;  %v6240_v1 = vrot.slane %v11064_v2, 4  ;;  %v4990_v37 = vmax.f32 %v3802_v48, 0.0 }
 0x301   :  { %v6043_v25 = vadd.f32 %v6042_v11, %v5492_v28  ;;  %v6130_v33 = vadd.f32 %v6129_v55, %v11552_v13  ;;  %v6277_v29 = vrot.slane %v11234_v3, 4  ;;  %v5500_v8 = vmin.f32 %v4988_v5, 6.0 }
 0x302   :  { %v6167_v28 = vadd.f32 %v6166_v20, %v11553_v4  ;;  %v6314_v63 = vrot.slane %v6313_v40, 4  ;;  %v4991_v11 = vmax.f32 %v3805_v15, 0.0  ;;  %v6204_v58 = vadd.f32 %v6203_v36, %v11555_v10 }
 0x303   :  { %v6044_v21 = vadd.f32 %v6043_v25, %v5493_v7  ;;  %v5501_v35 = vmin.f32 %v4989_v50, 6.0  ;;  %v6094_v42 = vrot.slane %v6093_v9, 2  ;;  %v6241_v24 = vadd.f32 %v6240_v1, %v11064_v2 }
 0x304   :  { %v6131_v7 = vrot.slane %v6130_v33, 2  ;;  %v6278_v16 = vadd.f32 %v6277_v29, %v11234_v3  ;;  %v5502_v25 = vmin.f32 %v4990_v37, 6.0  ;;  %v6315_v38 = vadd.f32 %v6314_v63, %v6313_v40 }
 0x305   :  { %v6045_v60 = vadd.f32 %v6044_v21, %v5494_v34  ;;  %v6168_v34 = vrot.slane %v6167_v28, 2  ;;  %v6205_v21 = vrot.slane %v6204_v58, 2  ;;  %v5503_v23 = vmin.f32 %v4991_v11, 6.0 }
 0x306   :  { %v6095_v46 = vadd.f32 %v6094_v42, %v6093_v9  ;;  %v6242_v57 = vrot.slane %v6241_v24, 2  ;;  %v6279_v17 = vrot.slane %v6278_v16, 2 }
 0x307   :  { %v6046_v26 = vadd.f32 %v6045_v60, %v5495_v6  ;;  %v6132_v6 = vadd.f32 %v6131_v7, %v6130_v33  ;;  %v6169_v60 = vadd.f32 %v6168_v34, %v6167_v28  ;;  %v6206_v39 = vadd.f32 %v6205_v21, %v6204_v58 }
 0x308   :  { %v6096_v2 = vrot.slane %v6095_v46, 1  ;;  %v6243_v62 = vadd.f32 %v6242_v57, %v6241_v24  ;;  %v6280_v3 = vadd.f32 %v6279_v17, %v6278_v16  ;;  %v11390_v57 = vld [vmem:[%s11528_s4 + $0x8] sm:$0xff]   ;;  %v9086_v17 = vmov 0  }
 0x309   :  { %v6047_v59 = vadd.f32 %v6046_v26, %v5496_v32  ;;  %v6316_v32 = vrot.slane %v6315_v38, 2  ;;  %v6133_v47 = vrot.slane %v6132_v6, 1  ;;  %v6170_v49 = vrot.slane %v6169_v60, 1 }
 0x30a   :  { %v6207_v52 = vrot.slane %v6206_v39, 1  ;;  %v6097_v51 = vadd.f32 %v6096_v2, %v6095_v46  ;;  %v6244_v44 = vrot.slane %v6243_v62, 1 }
 0x30b   :  { %v6048_v19 = vadd.f32 %v6047_v59, %v5497_v61  ;;  %v6317_v61 = vadd.f32 %v6316_v32, %v6315_v38  ;;  %v6134_v59 = vadd.f32 %v6133_v47, %v6132_v6  ;;  %v6171_v53 = vadd.f32 %v6170_v49, %v6169_v60  ;;  %v11397_v6 = vld [vmem:[%s11528_s4] sm:$0xff]  }
 0x30c   :  { %v6208_v55 = vadd.f32 %v6207_v52, %v6206_v39  ;;  %v6330_v5 = vmul.f32 0.00390625, %v6097_v51  ;;  %v6245_v4 = vadd.f32 %v6244_v44, %v6243_v62 }
 0x30d   :  { %v6049_v31 = vadd.f32 %v6048_v19, %v5498_v54  ;;  %v6281_v54 = vrot.slane %v6280_v3, 1  ;;  %v6318_v13 = vrot.slane %v6317_v61, 1  ;;  %v6331_v19 = vmul.f32 0.00390625, %v6134_v59 }
 0x30e   :  { %v6333_v10 = vmul.f32 0.00390625, %v6208_v55  ;;  %v6346_v36 = vpack.c.bf16 %v6330_v5, %v6330_v5  ;;  %v6334_v50 = vmul.f32 0.00390625, %v6245_v4 }
 0x30f   :  { %v6050_v12 = vadd.f32 %v6049_v31, %v5499_v45  ;;  %v6282_v40 = vadd.f32 %v6281_v54, %v6280_v3  ;;  %v6332_v45 = vmul.f32 0.00390625, %v6171_v53  ;;  %v6319_v15 = vadd.f32 %v6318_v13, %v6317_v61 }
 0x310   :  { %v6347_v1 = vpack.c.bf16 %v6331_v19, %v6331_v19  ;;  %v6401_v28 = vunpack.c.l.b16 %v6346_v36 }
 0x311   :  { %v6051_v56 = vadd.f32 %v6050_v12, %v5500_v8  ;;  %v6335_v31 = vmul.f32 0.00390625, %v6282_v40  ;;  %v6348_v37 = vpack.c.bf16 %v6332_v45, %v6332_v45  ;;  %v6336_v33 = vmul.f32 0.00390625, %v6319_v15 }
 0x312   :  { %v6349_v8 = vpack.c.bf16 %v6333_v10, %v6333_v10  ;;  %v6350_v12 = vpack.c.bf16 %v6334_v50, %v6334_v50  ;;  %v6402_v11 = vunpack.c.l.b16 %v6347_v1 }
 0x313   :  { %v6052_v30 = vadd.f32 %v6051_v56, %v5501_v35  ;;  %v6351_v58 = vpack.c.bf16 %v6335_v31, %v6335_v31  ;;  %v6403_v35 = vunpack.c.l.b16 %v6348_v37  ;;  %v6352_v42 = vpack.c.bf16 %v6336_v33, %v6336_v33 }
 0x314   :  { %v6404_v56 = vunpack.c.l.b16 %v6349_v8  ;;  %v6405_v16 = vunpack.c.l.b16 %v6350_v12 }
 0x315   :  { %v6053_v27 = vadd.f32 %v6052_v30, %v5502_v25  ;;  %v6406_v34 = vunpack.c.l.b16 %v6351_v58  ;;  %v6407_v38 = vunpack.c.l.b16 %v6352_v42 }
 0x317   :  { %v6054_v22 = vadd.f32 %v6053_v27, %v5503_v23 }
 0x319   :  { %v6055_v26 = vrot.slane %v6054_v22, 4 }
 0x31b   :  { %v6056_v41 = vadd.f32 %v6055_v26, %v6054_v22  ;;  %v7772_v22 = vld [vmem:[%s11529_s5] ss:$0 sm:$0xff]  ;;  %s9088_s5 = smov 32  }
 0x31d   :  { %v6057_v43 = vrot.slane %v6056_v41, 2 }
 0x31f   :  { %v6058_v48 = vadd.f32 %v6057_v43, %v6056_v41 }
 0x321   :  { %v6059_v20 = vrot.slane %v6058_v48, 1 }
 0x323   :  { %v6060_v0 = vadd.f32 %v6059_v20, %v6058_v48 }
 0x325   :  { %v6329_v9 = vmul.f32 0.00390625, %v6060_v0 }
 0x327   :  { %v6345_v29 = vpack.c.bf16 %v6329_v9, %v6329_v9 }
 0x329   :  { %v6400_v63 = vunpack.c.l.b16 %v6345_v29 }
 0x32b   :  { %v6422_v24 = vsel %vm6408_vm2, %v6401_v28, %v6400_v63 }
 0x32c   :  { %v6423_v7 = vsel %vm6410_vm3, %v6402_v11, %v6422_v24 }
 0x32d   :  { %v6424_v25 = vsel %vm6412_vm4, %v6403_v35, %v6423_v7 }
 0x32e   :  { %v6425_v30 = vsel %vm6414_vm5, %v6404_v56, %v6424_v25 }
 0x32f   :  { %v6426_v21 = vsel %vm6416_vm6, %v6405_v16, %v6425_v30 }
 0x330   :  { %v6427_v23 = vsel %vm6418_vm7, %v6406_v34, %v6426_v21 }
 0x331   :  { %v6428_v46 = vsel %vm6420_vm9, %v6407_v38, %v6427_v23 }
 0x332   :  { %v6429_v27 = vpack.c.b16 %v6428_v46, %v11341_v18 }
 0x334   :  { %8632 = vmatmul.mubr.bf16.vlgmr.msra.gmra.mxu1 %v6429_v27 }
 0x335   :  { %8636 = vmatpush3.bf16.msra.mxu1 %v11390_v57  ;;  %8639 = vmatprep.mubr.msk.bf16.mxu1 %vm9085_vm8, %v11547_v14 }
 0x336   :  { %8637 = vmatprep.subr.bf16.mxu1 %v11547_v14 }
 0x339   :  { %8638 = vmatpush3.bf16.msra.mxu1 %v11397_v6 }
 0x33a   :  { %8643 = vmatprep.subr.bf16.mxu1 %v11547_v14 }
 0x33c   :  { %8640 = vmatmul.mubr.bf16.vlgmr.msra.gmra.mxu1 %v9086_v17 }
 0x33d   :  { %8644 = vmatpush3.bf16.msra.mxu1 %v11390_v57  ;;  %8647 = vmatprep.mubr.msk.bf16.mxu1 %vm9085_vm8, %v11547_v14 }
 0x33e   :  { %8645 = vmatprep.subr.bf16.mxu1 %v11547_v14 }
 0x341   :  { %8646 = vmatpush3.bf16.msra.mxu1 %v11397_v6 }
 0x342   :  { %8651 = vmatprep.subr.bf16.mxu1 %v11547_v14 }
 0x3f4   :  { %v6513_v18 = vpop.f32.mrf.mxu1 }
 0x3f5   :  { %v11415_v62 = vadd.f32 %v7772_v22, %v6513_v18 }
 0x3f6   :  { %v8633_v60 = vpop.f32.mrf.mxu1 }
 0x3f8   :  { %v6516_v32 = vpop.f32.mrf.mxu1 }
 0x3f9   :  { %v11413_v39 = vadd.f32 %v7772_v22, %v6516_v32 }
 0x3fa   :  { %v8634_v2 = vpop.f32.mrf.mxu1 }
 0x3fc   :  { %v6574_v26 = vpop.f32.mrf.mxu1 }
 0x3fd   :  { %v6580_v47 = vadd.f32 %v6574_v26, %v11415_v62 }
 0x3fe   :  { %v8641_v3 = vpop.f32.mrf.mxu1 }
 0x3ff   :  { %8993 = vtanh.f32 %v6580_v47  ;;  %v7783_v52 = vmul.f32 -1.442695, %v6580_v47 }
 0x400   :  { %v6577_v49 = vpop.f32.mrf.mxu1 }
 0x401   :  { %8995 = vpow2.f32 %v7783_v52 }
 0x402   :  { %v8642_v41 = vpop.f32.mrf.mxu1 }
 0x40c   :  { %v8994_v61 = vpop.eup %8993 }
 0x40d   :  { %6590 = vrot.lane.b32.xlu0 %v8994_v61, %s9087_s23 }
 0x40e   :  { %v8996_v51 = vpop.eup %8995 }
 0x40f   :  { %v6584_v44 = vadd.f32 1.0, %v8996_v51 }
 0x411   :  { %8997 = vrcp.f32 %v6584_v44 }
 0x41e   :  { %v8998_v43 = vpop.eup %8997 }
 0x41f   :  { %v6588_v53 = vmul.f32 0.0, %v8998_v43 }
 0x47f   :  { %v6591_v59 = vpop.permute.xlu0 %6590 }
 0x480   :  { %v6593_v54 = vmul.f32 %v8998_v43, %v6591_v59 }
 0x482   :  { %6595 = vrot.lane.b32.xlu0 %v6593_v54, %s9088_s5 }
 0x4f4   :  { %v6596_v48 = vpop.permute.xlu0 %6595 }
 0x4f5   :  { %v6598_v13 = vadd.f32 %v6596_v48, %v6588_v53 }
 0x4f7   :  { %8999 = vtanh.f32 %v6598_v13  ;;  %v6664_v8 = vrot.slane %v6598_v13, 6 }
 0x504   :  { %v9000_v55 = vpop.eup %8999 }
 0x505   :  { %6601 = vrot.lane.b32.xlu1 %v9000_v55, %s9087_s23 }
 0x577   :  { %v6602_v5 = vpop.permute.xlu1 %6601 }
 0x578   :  { %v6604_v4 = vmul.f32 %v8998_v43, %v6602_v5 }
 0x57a   :  { %v6605_v20 = vpack.c.bf16 %v6604_v4, %v6604_v4 }
 0x57c   :  { %6607 = vrot.lane.b32.xlu1 %v6605_v20, %s9088_s5 }
 0x5ee   :  { %v6608_v19 = vpop.permute.xlu1 %6607 }
 0x5ef   :  { %8648 = vmatmul.mubr.msk.bf16.vlgmr.msra.gmra.mxu1 %vm6536_vm10, %v6608_v19 }
 0x5f0   :  { %8652 = vmatpush3.bf16.msra.mxu1 %v11390_v57  ;;  %8655 = vmatprep.mubr.msk.bf16.mxu1 %vm9085_vm8, %v11547_v14 }
 0x5f1   :  { %8653 = vmatprep.subr.bf16.mxu1 %v11547_v14 }
 0x5f4   :  { %8654 = vmatpush3.bf16.msra.mxu1 %v11397_v6 }
 0x5f5   :  { %8659 = vmatprep.subr.bf16.mxu1 %v11547_v14 }
 0x6af   :  { %v6646_v40 = vpop.f32.mrf.mxu1 }
 0x6b0   :  { %v6653_v45 = vrot.slane %v6646_v40, 6 }
 0x6b1   :  { %v8649_v0 = vpop.f32.mrf.mxu1 }
 0x6b2   :  { %v6655_v15 = vadd.f32 %v6653_v45, %v11415_v62 }
 0x6b3   :  { %v6649_v10 = vpop.f32.mrf.mxu1 }
 0x6b4   :  { %9001 = vtanh.f32 %v6655_v15  ;;  %v7785_v9 = vmul.f32 -1.442695, %v6655_v15 }
 0x6b5   :  { %v8650_v36 = vpop.f32.mrf.mxu1 }
 0x6b6   :  { %9003 = vpow2.f32 %v7785_v9 }
 0x6c1   :  { %v9002_v50 = vpop.eup %9001 }
 0x6c2   :  { %6668 = vrot.lane.b32.xlu0 %v9002_v50, %s9087_s23 }
 0x6c3   :  { %v9004_v1 = vpop.eup %9003 }
 0x6c4   :  { %v6659_v31 = vadd.f32 1.0, %v9004_v1 }
 0x6c6   :  { %9005 = vrcp.f32 %v6659_v31 }
 0x6d3   :  { %v9006_v37 = vpop.eup %9005 }
 0x6d4   :  { %v6666_v28 = vmul.f32 %v9006_v37, %v6664_v8 }
 0x734   :  { %v6669_v33 = vpop.permute.xlu0 %6668 }
 0x735   :  { %v6671_v29 = vmul.f32 %v9006_v37, %v6669_v33 }
 0x737   :  { %6673 = vrot.lane.b32.xlu1 %v6671_v29, %s9088_s5 }
 0x7a9   :  { %v6674_v12 = vpop.permute.xlu1 %6673 }
 0x7aa   :  { %v6676_v63 = vadd.f32 %v6674_v12, %v6666_v28 }
 0x7ac   :  { %9007 = vtanh.f32 %v6676_v63  ;;  %v6743_v22 = vrot.slane %v6676_v63, 6 }
 0x7b9   :  { %v9008_v11 = vpop.eup %9007 }
 0x7ba   :  { %6679 = vrot.lane.b32.xlu0 %v9008_v11, %s9087_s23 }
 0x82c   :  { %v6680_v58 = vpop.permute.xlu0 %6679 }
 0x82d   :  { %v6682_v35 = vmul.f32 %v9006_v37, %v6680_v58 }
 0x82f   :  { %v6683_v42 = vpack.c.bf16 %v6682_v35, %v6682_v35 }
 0x831   :  { %v6685_v24 = vrot.slane %v6683_v42, 1 }
 0x833   :  { %6686 = vrot.lane.b32.xlu1 %v6685_v24, %s9088_s5 }
 0x8a5   :  { %v6687_v56 = vpop.permute.xlu1 %6686 }
 0x8a6   :  { %8656 = vmatmul.mubr.msk.bf16.vlgmr.msra.gmra.mxu1 %vm6536_vm10, %v6687_v56 }
 0x8a7   :  { %8660 = vmatpush3.bf16.msra.mxu1 %v11390_v57  ;;  %8663 = vmatprep.mubr.msk.bf16.mxu1 %vm9085_vm8, %v11547_v14 }
 0x8a8   :  { %8661 = vmatprep.subr.bf16.mxu1 %v11547_v14 }
 0x8ab   :  { %8662 = vmatpush3.bf16.msra.mxu1 %v11397_v6 }
 0x8ac   :  { %8667 = vmatprep.subr.bf16.mxu1 %v11547_v14 }
 0x966   :  { %v6725_v7 = vpop.f32.mrf.mxu1 }
 0x967   :  { %v6732_v16 = vrot.slane %v6725_v7, 4 }
 0x968   :  { %v8657_v25 = vpop.f32.mrf.mxu1 }
 0x969   :  { %v6734_v34 = vadd.f32 %v6732_v16, %v11415_v62 }
 0x96a   :  { %v6728_v30 = vpop.f32.mrf.mxu1 }
 0x96b   :  { %9009 = vtanh.f32 %v6734_v34  ;;  %v7787_v23 = vmul.f32 -1.442695, %v6734_v34 }
 0x96c   :  { %v8658_v38 = vpop.f32.mrf.mxu1 }
 0x96d   :  { %9011 = vpow2.f32 %v7787_v23 }
 0x978   :  { %v9010_v21 = vpop.eup %9009 }
 0x979   :  { %6747 = vrot.lane.b32.xlu0 %v9010_v21, %s9087_s23 }
 0x97a   :  { %v9012_v46 = vpop.eup %9011 }
 0x97b   :  { %v6738_v27 = vadd.f32 1.0, %v9012_v46 }
 0x97d   :  { %9013 = vrcp.f32 %v6738_v27 }
 0x98a   :  { %v9014_v17 = vpop.eup %9013 }
 0x98b   :  { %v6745_v32 = vmul.f32 %v9014_v17, %v6743_v22 }
 0x9eb   :  { %v6748_v18 = vpop.permute.xlu0 %6747 }
 0x9ec   :  { %v6750_v60 = vmul.f32 %v9014_v17, %v6748_v18 }
 0x9ee   :  { %6752 = vrot.lane.b32.xlu1 %v6750_v60, %s9088_s5 }
 0xa60   :  { %v6753_v2 = vpop.permute.xlu1 %6752 }
 0xa61   :  { %v6755_v26 = vadd.f32 %v6753_v2, %v6745_v32 }
 0xa63   :  { %9015 = vtanh.f32 %v6755_v26  ;;  %v6822_v40 = vrot.slane %v6755_v26, 6 }
 0xa70   :  { %v9016_v47 = vpop.eup %9015 }
 0xa71   :  { %6758 = vrot.lane.b32.xlu0 %v9016_v47, %s9087_s23 }
 0xae3   :  { %v6759_v3 = vpop.permute.xlu0 %6758 }
 0xae4   :  { %v6761_v49 = vmul.f32 %v9014_v17, %v6759_v3 }
 0xae6   :  { %v6762_v41 = vpack.c.bf16 %v6761_v49, %v6761_v49 }
 0xae8   :  { %v6764_v61 = vrot.slane %v6762_v41, 2 }
 0xaea   :  { %6765 = vrot.lane.b32.xlu1 %v6764_v61, %s9088_s5 }
 0xb5c   :  { %v6766_v52 = vpop.permute.xlu1 %6765 }
 0xb5d   :  { %8664 = vmatmul.mubr.msk.bf16.vlgmr.msra.gmra.mxu1 %vm6536_vm10, %v6766_v52 }
 0xb5e   :  { %8668 = vmatpush3.bf16.msra.mxu1 %v11390_v57  ;;  %8671 = vmatprep.mubr.msk.bf16.mxu1 %vm9085_vm8, %v11547_v14 }
 0xb5f   :  { %8669 = vmatprep.subr.bf16.mxu1 %v11547_v14 }
 0xb62   :  { %8670 = vmatpush3.bf16.msra.mxu1 %v11397_v6 }
 0xb63   :  { %8675 = vmatprep.subr.bf16.mxu1 %v11547_v14 }
 0xc1d   :  { %v6804_v51 = vpop.f32.mrf.mxu1 }
 0xc1e   :  { %v6811_v44 = vrot.slane %v6804_v51, 2 }
 0xc1f   :  { %v8665_v43 = vpop.f32.mrf.mxu1 }
 0xc20   :  { %v6813_v59 = vadd.f32 %v6811_v44, %v11415_v62 }
 0xc21   :  { %v6807_v54 = vpop.f32.mrf.mxu1 }
 0xc22   :  { %9017 = vtanh.f32 %v6813_v59  ;;  %v7789_v13 = vmul.f32 -1.442695, %v6813_v59 }
 0xc23   :  { %v8666_v53 = vpop.f32.mrf.mxu1 }
 0xc24   :  { %9019 = vpow2.f32 %v7789_v13 }
 0xc2f   :  { %v9018_v48 = vpop.eup %9017 }
 0xc30   :  { %6826 = vrot.lane.b32.xlu0 %v9018_v48, %s9087_s23 }
 0xc31   :  { %v9020_v55 = vpop.eup %9019 }
 0xc32   :  { %v6817_v5 = vadd.f32 1.0, %v9020_v55 }
 0xc34   :  { %9021 = vrcp.f32 %v6817_v5 }
 0xc41   :  { %v9022_v4 = vpop.eup %9021 }
 0xc42   :  { %v6824_v45 = vmul.f32 %v9022_v4, %v6822_v40 }
 0xca2   :  { %v6827_v20 = vpop.permute.xlu0 %6826 }
 0xca3   :  { %v6829_v19 = vmul.f32 %v9022_v4, %v6827_v20 }
 0xca5   :  { %6831 = vrot.lane.b32.xlu1 %v6829_v19, %s9088_s5 }
 0xd17   :  { %v6832_v0 = vpop.permute.xlu1 %6831 }
 0xd18   :  { %v6834_v62 = vadd.f32 %v6832_v0, %v6824_v45 }
 0xd1a   :  { %9023 = vtanh.f32 %v6834_v62  ;;  %v6898_v24 = vrot.slane %v6834_v62, 6 }
 0xd27   :  { %v9024_v15 = vpop.eup %9023 }
 0xd28   :  { %6837 = vrot.lane.b32.xlu0 %v9024_v15, %s9087_s23 }
 0xd9a   :  { %v6838_v10 = vpop.permute.xlu0 %6837 }
 0xd9b   :  { %v6840_v36 = vmul.f32 %v9022_v4, %v6838_v10 }
 0xd9d   :  { %v6841_v50 = vpack.c.bf16 %v6840_v36, %v6840_v36 }
 0xd9f   :  { %v6843_v9 = vrot.slane %v6841_v50, 3 }
 0xda1   :  { %6844 = vrot.lane.b32.xlu1 %v6843_v9, %s9088_s5 }
 0xe13   :  { %v6845_v1 = vpop.permute.xlu1 %6844 }
 0xe14   :  { %8672 = vmatmul.mubr.msk.bf16.vlgmr.msra.gmra.mxu1 %vm6536_vm10, %v6845_v1 }
 0xe15   :  { %8676 = vmatpush3.bf16.msra.mxu1 %v11390_v57  ;;  %8679 = vmatprep.mubr.msk.bf16.mxu1 %vm9085_vm8, %v11547_v14 }
 0xe16   :  { %8677 = vmatprep.subr.bf16.mxu1 %v11547_v14 }
 0xe19   :  { %8678 = vmatpush3.bf16.msra.mxu1 %v11397_v6 }
 0xe1a   :  { %8683 = vmatprep.subr.bf16.mxu1 %v11547_v14 }
 0xed4   :  { %v6883_v31 = vpop.f32.mrf.mxu1 }
 0xed5   :  { %v6889_v37 = vadd.f32 %v6883_v31, %v11413_v39 }
 0xed6   :  { %v8673_v33 = vpop.f32.mrf.mxu1 }
 0xed7   :  { %9025 = vtanh.f32 %v6889_v37  ;;  %v7791_v12 = vmul.f32 -1.442695, %v6889_v37 }
 0xed8   :  { %v6886_v29 = vpop.f32.mrf.mxu1 }
 0xed9   :  { %9027 = vpow2.f32 %v7791_v12 }
 0xeda   :  { %v8674_v8 = vpop.f32.mrf.mxu1 }
 0xee4   :  { %v9026_v28 = vpop.eup %9025 }
 0xee5   :  { %6902 = vrot.lane.b32.xlu0 %v9026_v28, %s9087_s23 }
 0xee6   :  { %v9028_v63 = vpop.eup %9027 }
 0xee7   :  { %v6893_v11 = vadd.f32 1.0, %v9028_v63 }
 0xee9   :  { %9029 = vrcp.f32 %v6893_v11 }
 0xef6   :  { %v9030_v58 = vpop.eup %9029 }
 0xef7   :  { %v6900_v56 = vmul.f32 %v9030_v58, %v6898_v24 }
 0xf57   :  { %v6903_v35 = vpop.permute.xlu0 %6902 }
 0xf58   :  { %v6905_v42 = vmul.f32 %v9030_v58, %v6903_v35 }
 0xf5a   :  { %6907 = vrot.lane.b32.xlu1 %v6905_v42, %s9088_s5 }
 0xfcc   :  { %v6908_v7 = vpop.permute.xlu1 %6907 }
 0xfcd   :  { %v6910_v16 = vadd.f32 %v6908_v7, %v6900_v56 }
 0xfcf   :  { %9031 = vtanh.f32 %v6910_v16  ;;  %v6976_v41 = vrot.slane %v6910_v16, 6 }
 0xfdc   :  { %v9032_v25 = vpop.eup %9031 }
 0xfdd   :  { %6913 = vrot.lane.b32.xlu0 %v9032_v25, %s9087_s23 }
0x104f   :  { %v6914_v34 = vpop.permute.xlu0 %6913 }
0x1050   :  { %v6916_v30 = vmul.f32 %v9030_v58, %v6914_v34 }
0x1052   :  { %v6917_v38 = vpack.c.bf16 %v6916_v30, %v6916_v30 }
0x1054   :  { %6919 = vrot.lane.b32.xlu1 %v6917_v38, %s9088_s5 }
0x10c6   :  { %v6920_v21 = vpop.permute.xlu1 %6919 }
0x10c7   :  { %8680 = vmatmul.mubr.msk.bf16.vlgmr.msra.gmra.mxu1 %vm6536_vm10, %v6920_v21 }
0x10c8   :  { %8684 = vmatpush3.bf16.msra.mxu1 %v11390_v57  ;;  %8687 = vmatprep.mubr.msk.bf16.mxu1 %vm9085_vm8, %v11547_v14 }
0x10c9   :  { %8685 = vmatprep.subr.bf16.mxu1 %v11547_v14 }
0x10cc   :  { %8686 = vmatpush3.bf16.msra.mxu1 %v11397_v6 }
0x10cd   :  { %8691 = vmatprep.subr.bf16.mxu1 %v11547_v14 }
0x1187   :  { %v6958_v23 = vpop.f32.mrf.mxu1 }
0x1188   :  { %v6965_v46 = vrot.slane %v6958_v23, 6  ;;  %v7156_v23 = vld [vmem:[%s11530_s6 + $0x18] sm:$0xff] }
0x1189   :  { %v8681_v27 = vpop.f32.mrf.mxu1 }
0x118a   :  { %v6967_v17 = vadd.f32 %v6965_v46, %v11413_v39  ;;  %v7155_v46 = vld [vmem:[%s11530_s6 + $0x10] sm:$0xff]  ;;  %v7154_v27 = vld [vmem:[%s11530_s6 + $0x8] sm:$0xff] }
0x118b   :  { %v6961_v18 = vpop.f32.mrf.mxu1 }
0x118c   :  { %9033 = vtanh.f32 %v6967_v17  ;;  %v7793_v32 = vmul.f32 -1.442695, %v6967_v17  ;;  %v7153_v17 = vld [vmem:[%s11530_s6] sm:$0xff]  ;;  %s9089_s6 = smov [#allocation2]  }
0x118d   :  { %v8682_v60 = vpop.f32.mrf.mxu1  ;;  %s7248_s12 = sshll.u32 %s9089_s6, 4  ;;  %s7249_s12 = int_to_ptr.vmem [resolvable:$true] %s7248_s12 }
0x118e   :  { %9035 = vpow2.f32 %v7793_v32  ;;  %s9062_s13 = scalar_lea.vmem %s7249_s12, 32  ;;  %p9067_p1 = scmp.lt.s32.totalorder %s7249_s12, %s7249_s12 }
0x118f   :  { %p9063_p0 = scmp.ne.s32.totalorder %s7249_s12, %s9062_s13  ;;  %p9068_p2 = scmp.lt.s32.totalorder %s9062_s13, %s9062_s13 }
0x1191   :  { %p9069_p3 = por %p9068_p2, %p9067_p1 }
0x1193   :  { %p9070_p4 = pnand %p9069_p3, %p9063_p0 }
0x1199   :  { %v9034_v22 = vpop.eup %9033 }
0x119a   :  { %6980 = vrot.lane.b32.xlu0 %v9034_v22, %s9087_s23 }
0x119b   :  { %v9036_v2 = vpop.eup %9035 }
0x119c   :  { %v6971_v26 = vadd.f32 1.0, %v9036_v2 }
0x119e   :  { %9037 = vrcp.f32 %v6971_v26  ;;  %v7798_v26 = vld [vmem:[%s11531_s7] ss:$0 sm:$0xff] }
0x11ab   :  { %v9038_v47 = vpop.eup %9037 }
0x11ac   :  { %v6978_v61 = vmul.f32 %v9038_v47, %v6976_v41 }
0x120c   :  { %v6981_v3 = vpop.permute.xlu0 %6980 }
0x120d   :  { %v6983_v49 = vmul.f32 %v9038_v47, %v6981_v3 }
0x120f   :  { %6985 = vrot.lane.b32.xlu1 %v6983_v49, %s9088_s5 }
0x1281   :  { %v6986_v52 = vpop.permute.xlu1 %6985 }
0x1282   :  { %v6988_v51 = vadd.f32 %v6986_v52, %v6978_v61 }
0x1284   :  { %9039 = vtanh.f32 %v6988_v51  ;;  %v7055_v10 = vrot.slane %v6988_v51, 6 }
0x1291   :  { %v9040_v44 = vpop.eup %9039 }
0x1292   :  { %6991 = vrot.lane.b32.xlu0 %v9040_v44, %s9087_s23 }
0x1304   :  { %v6992_v43 = vpop.permute.xlu0 %6991 }
0x1305   :  { %v6994_v59 = vmul.f32 %v9038_v47, %v6992_v43 }
0x1307   :  { %v6995_v54 = vpack.c.bf16 %v6994_v59, %v6994_v59 }
0x1309   :  { %v6997_v53 = vrot.slane %v6995_v54, 1 }
0x130b   :  { %6998 = vrot.lane.b32.xlu1 %v6997_v53, %s9088_s5 }
0x137d   :  { %v6999_v48 = vpop.permute.xlu1 %6998 }
0x137e   :  { %8688 = vmatmul.mubr.msk.bf16.vlgmr.msra.gmra.mxu1 %vm6536_vm10, %v6999_v48 }
0x137f   :  { %8692 = vmatpush3.bf16.msra.mxu1 %v11390_v57  ;;  %8695 = vmatprep.mubr.msk.bf16.mxu1 %vm9085_vm8, %v11547_v14 }
0x1380   :  { %8693 = vmatprep.subr.bf16.mxu1 %v11547_v14 }
0x1383   :  { %8694 = vmatpush3.bf16.msra.mxu1 %v11397_v6 }
0x1384   :  { %8699 = vmatprep.subr.mxu1 %v11547_v14 }
0x143e   :  { %v7037_v13 = vpop.f32.mrf.mxu1 }
0x143f   :  { %v7044_v55 = vrot.slane %v7037_v13, 4 }
0x1440   :  { %v8689_v5 = vpop.f32.mrf.mxu1 }
0x1441   :  { %v7046_v4 = vadd.f32 %v7044_v55, %v11413_v39 }
0x1442   :  { %v7040_v20 = vpop.f32.mrf.mxu1 }
0x1443   :  { %9041 = vtanh.f32 %v7046_v4  ;;  %v7795_v57 = vmul.f32 -1.442695, %v7046_v4 }
0x1444   :  { %v8690_v19 = vpop.f32.mrf.mxu1 }
0x1445   :  { %9043 = vpow2.f32 %v7795_v57 }
0x1450   :  { %v9042_v40 = vpop.eup %9041 }
0x1451   :  { %7059 = vrot.lane.b32.xlu0 %v9042_v40, %s9087_s23 }
0x1452   :  { %v9044_v45 = vpop.eup %9043 }
0x1453   :  { %v7050_v0 = vadd.f32 1.0, %v9044_v45 }
0x1455   :  { %9045 = vrcp.f32 %v7050_v0 }
0x1462   :  { %v9046_v62 = vpop.eup %9045 }
0x1463   :  { %v7057_v36 = vmul.f32 %v9046_v62, %v7055_v10 }
0x14c3   :  { %v7060_v6 = vpop.permute.xlu0 %7059 }
0x14c4   :  { %v7062_v15 = vmul.f32 %v9046_v62, %v7060_v6 }
0x14c6   :  { %7064 = vrot.lane.b32.xlu1 %v7062_v15, %s9088_s5 }
0x1538   :  { %v7065_v50 = vpop.permute.xlu1 %7064 }
0x1539   :  { %v7067_v9 = vadd.f32 %v7065_v50, %v7057_v36 }
0x153b   :  { %9047 = vtanh.f32 %v7067_v9  ;;  %v7134_v30 = vrot.slane %v7067_v9, 6 }
0x1548   :  { %v9048_v1 = vpop.eup %9047 }
0x1549   :  { %7070 = vrot.lane.b32.xlu0 %v9048_v1, %s9087_s23 }
0x15bb   :  { %v7071_v31 = vpop.permute.xlu0 %7070 }
0x15bc   :  { %v7073_v37 = vmul.f32 %v9046_v62, %v7071_v31 }
0x15be   :  { %v7074_v33 = vpack.c.bf16 %v7073_v37, %v7073_v37 }
0x15c0   :  { %v7076_v29 = vrot.slane %v7074_v33, 2 }
0x15c2   :  { %7077 = vrot.lane.b32.xlu1 %v7076_v29, %s9088_s5 }
0x1634   :  { %v7078_v8 = vpop.permute.xlu1 %7077 }
0x1635   :  { %8696 = vmatmul.mubr.msk.bf16.vlgmr.msra.gmra.mxu1 %vm6536_vm10, %v7078_v8 }
0x1636   :  { %8707 = vmatprep.mubr.msk.f32.mxu1 %vm9085_vm8, %v11547_v14  ;;  %8700 = vmatpush3.msra.mxu1 %v7156_v23 }
0x1637   :  { %8701 = vmatprep.subr.mxu1 %v11547_v14 }
0x1638   :  { %8702 = vmatpush3.msra.mxu1 %v7155_v46 }
0x1639   :  { %8703 = vmatprep.subr.mxu1 %v11547_v14 }
0x163a   :  { %8704 = vmatpush3.msra.mxu1 %v7154_v27 }
0x163b   :  { %8705 = vmatprep.subr.mxu1 %v11547_v14 }
0x163c   :  { %8706 = vmatpush3.msra.mxu1 %v7153_v17 }
0x16f5   :  { %v7116_v28 = vpop.f32.mrf.mxu1 }
0x16f6   :  { %v7123_v12 = vrot.slane %v7116_v28, 2 }
0x16f7   :  { %v8697_v63 = vpop.f32.mrf.mxu1 }
0x16f8   :  { %v7125_v11 = vadd.f32 %v7123_v12, %v11413_v39 }
0x16f9   :  { %v7119_v58 = vpop.f32.mrf.mxu1 }
0x16fa   :  { %9049 = vtanh.f32 %v7125_v11  ;;  %v7797_v24 = vmul.f32 -1.442695, %v7125_v11 }
0x16fb   :  { %v8698_v35 = vpop.f32.mrf.mxu1 }
0x16fc   :  { %9051 = vpow2.f32 %v7797_v24 }
0x1707   :  { %v9050_v42 = vpop.eup %9049 }
0x1708   :  { %7138 = vrot.lane.b32.xlu0 %v9050_v42, %s9087_s23 }
0x1709   :  { %v9052_v56 = vpop.eup %9051 }
0x170a   :  { %v7129_v7 = vadd.f32 1.0, %v9052_v56 }
0x170c   :  { %9053 = vrcp.f32 %v7129_v7 }
0x1719   :  { %v9054_v16 = vpop.eup %9053 }
0x171a   :  { %v7136_v38 = vmul.f32 %v9054_v16, %v7134_v30 }
0x177a   :  { %v7139_v25 = vpop.permute.xlu0 %7138 }
0x177b   :  { %v7141_v34 = vmul.f32 %v9054_v16, %v7139_v25 }
0x177d   :  { %7143 = vrot.lane.b32.xlu1 %v7141_v34, %s9088_s5 }
0x17ef   :  { %v7144_v21 = vpop.permute.xlu1 %7143 }
0x17f0   :  { %v7146_v39 = vadd.f32 %v7144_v21, %v7136_v38 }
0x17f2   :  { %9055 = vtanh.f32 %v7146_v39 }
0x17ff   :  { %v9056_v18 = vpop.eup %9055 }
0x1800   :  { %7149 = vrot.lane.b32.xlu0 %v9056_v18, %s9087_s23 }
0x1872   :  { %v7150_v60 = vpop.permute.xlu0 %7149 }
0x1873   :  { %v7152_v22 = vmul.f32 %v9054_v16, %v7150_v60 }
0x1875   :  { %v7165_v32 = vrot.slane %v7152_v22, 6 }
0x1877   :  { %7166 = vrot.lane.b32.xlu1 %v7165_v32, %s9088_s5 }
0x18e9   :  { %v7167_v2 = vpop.permute.xlu1 %7166 }
0x18ea   :  { %8708 = vmatmul.mubr.msk.f32.vlgmr.msra.gmra.mxu1 %vm6536_vm10, %v7167_v2 }
0x19aa   :  { %v7236_v47 = vpop.f32.mrf.mxu1 }
0x19ab   :  { %v7237_v14 = vadd.f32 %v7798_v26, %v7236_v47 }
0x19ac   :  { %v8709_v3 = vpop.f32.mrf.mxu1 }
0x19ad   :  { %7241 = vst.msk [vmem:[#allocation2] sm:$0x3] %vm7240_vm11, %v7237_v14 }
0x19ae   :  { %9073 = shalt.err (!%p9070_p4)
}
0x19af   :  { %7251 = dma.vmem_to_hbm [thread:$0]  %s7249_s12, 32, %s11532_s8, [#allocation3]  }
0x19b0   :  { %9082 = dma.done.wait [#allocation3], 32  }
0x19b1   :  { %9083 = vsyncadd [#allocation3], 4294967264 }
0x19b2   :  { %7255 = vsyncpa [#allocation3], 1 }

</bundles_post_ra>
